<compile_context>
chip_gen: v5e
topology: v5e:2x2
jax: 0.10.0
libtpu: 0.0.40
codegen_flags: <defaults>
</compile_context>

<pallas_src>
import jax
import jax.numpy as jnp
from jax.experimental import pallas as pl
from jax.experimental.pallas import tpu as pltpu


def _lstm_fc_kernel(x_ref, w_ih0_ref, w_hh0_ref, wr_ref, b_ref,
                    w_fc_ref, b_fc_ref, out_ref):
    B, T, Din = x_ref.shape
    Lm1, _, H4 = wr_ref.shape
    L = Lm1 + 1
    H = H4 // 4

    # Load everything once; it stays resident for the whole (single) invocation.
    x = x_ref[...]                                        # (B, T, Din)
    w_hh0 = w_hh0_ref[...]                                # (H, 4H)
    wr = [wr_ref[l] for l in range(Lm1)]                  # each (2H, 4H)
    # Hoisted bias broadcast: (1, 4H) -> (B, 4H), once per layer, outside loops.
    biases = [jnp.broadcast_to(b_ref[l], (B, H4)) for l in range(L)]
    w_fc = w_fc_ref[...]                                  # (1, H)
    b_fc = b_fc_ref[...]                                  # (1, 1)

    # Hoist ALL layer-0 input projections out of the recurrence: a single MXU
    # matmul with M = B*T instead of T tiny M = B matmuls on the critical path.
    xw0 = jnp.dot(x.reshape(B * T, Din), w_ih0_ref[...],
                  preferred_element_type=jnp.float32).reshape(B, T, H4)

    # Lane mask: lanes [2H, 3H) hold the 'g' gate (tanh); the rest use sigmoid.
    lane = jax.lax.broadcasted_iota(jnp.int32, (B, H4), 1)
    is_g = jnp.logical_and(lane >= 2 * H, lane < 3 * H)

    def gates_to_hc(gates, c_prev):
        # Full-vreg activations (2 EUP calls) + lane select, then split.
        act = jnp.where(is_g, jnp.tanh(gates), jax.nn.sigmoid(gates))
        i = act[:, 0 * H:1 * H]
        f = act[:, 1 * H:2 * H]
        g = act[:, 2 * H:3 * H]
        o = act[:, 3 * H:4 * H]
        c_new = f * c_prev + i * g
        h_new = o * jnp.tanh(c_new)
        return h_new, c_new

    # State carried in registers (tiny: L x (B, H) f32).
    h = [jnp.zeros((B, H), jnp.float32) for _ in range(L)]
    c = [jnp.zeros((B, H), jnp.float32) for _ in range(L)]

    # Fully-unrolled time loop (T is small and static), one basic block.
    inp = None
    for t in range(T):
        # Layer 0: input projection was precomputed; only the recurrent matmul
        # remains on the critical path.
        gates = (xw0[:, t, :]
                 + jnp.dot(h[0], w_hh0, preferred_element_type=jnp.float32)
                 + biases[0])
        h[0], c[0] = gates_to_hc(gates, c[0])
        inp = h[0]

        # Layers 1..L-1: single fused matmul per cell.
        for l in range(1, L):
            # TODO(synk): nn.LSTM applies dropout(p=0.2) between layers in
            # training mode only; eval-mode (no dropout) is implemented here.
            z = jnp.concatenate([inp, h[l]], axis=-1)     # (B, 2H)
            gates = (jnp.dot(z, wr[l - 1], preferred_element_type=jnp.float32)
                     + biases[l])
            h[l], c[l] = gates_to_hc(gates, c[l])
            inp = h[l]

    # fc(H -> 1): VPU multiply + lane reduction (avoids an N=1 MXU pass).
    out_ref[...] = jnp.sum(inp * w_fc, axis=-1, keepdims=True) + b_fc


def lstm_model_forward(x, params):
    """x: (B, T, D_in) float32, batch_first like the PyTorch module. Returns (B, 1)."""
    B, T, Din = x.shape
    vmem = lambda: pl.BlockSpec(memory_space=pltpu.MemorySpace.VMEM)
    return pl.pallas_call(
        _lstm_fc_kernel,
        out_shape=jax.ShapeDtypeStruct((B, 1), jnp.float32),
        in_specs=[vmem() for _ in range(7)],
        out_specs=vmem(),
    )(x, params["w_ih0"], params["w_hh0"], params["wr"],
      params["bias"], params["w_fc"], params["b_fc"])


def init_params(key, input_size=4, hidden_size=32, num_layers=3):
    """Deterministic synthetic init (uniform(-1/sqrt(H), 1/sqrt(H)), like PyTorch)."""
    assert num_layers >= 2, "packed-weight layout assumes num_layers >= 2"
    H = hidden_size
    k = 1.0 / float(H) ** 0.5
    keys = jax.random.split(key, 4 * num_layers + 2)

    def u(kk, shape):
        return jax.random.uniform(kk, shape, jnp.float32, -k, k)

    w_ih, w_hh, bias = [], [], []
    ki = 0
    for l in range(num_layers):
        in_dim = input_size if l == 0 else H
        w_ih.append(u(keys[ki], (4 * H, in_dim))); ki += 1   # PyTorch weight_ih_l{k}
        w_hh.append(u(keys[ki], (4 * H, H))); ki += 1        # PyTorch weight_hh_l{k}
        b_ih = u(keys[ki], (4 * H,)); ki += 1
        b_hh = u(keys[ki], (4 * H,)); ki += 1
        bias.append(b_ih + b_hh)                             # biases fold together

    w_fc = u(keys[ki], (1, H)); ki += 1
    b_fc = u(keys[ki], (1,)); ki += 1

    return {
        "w_ih0": w_ih[0].T,                                  # (Din, 4H)
        "w_hh0": w_hh[0].T,                                  # (H, 4H)
        # Layers 1..L-1: fused [W_ih ; W_hh] -> (L-1, 2H, 4H)
        "wr": jnp.stack(
            [jnp.concatenate([w_ih[l].T, w_hh[l].T], axis=0)
             for l in range(1, num_layers)], 0),
        "bias": jnp.stack(bias, 0)[:, None, :],              # (L, 1, 4H)
        "w_fc": w_fc,                                        # (1, H)
        "b_fc": b_fc[None, :],                               # (1, 1)
    }


def lstm_model_ref(x, params):
    """Pure-JAX reference of the same eval-mode forward, for correctness check."""
    B, T, _ = x.shape
    L = params["bias"].shape[0]
    H4 = params["bias"].shape[-1]
    H = H4 // 4
    h = [jnp.zeros((B, H), jnp.float32) for _ in range(L)]
    c = [jnp.zeros((B, H), jnp.float32) for _ in range(L)]
    inp = None
    for t in range(T):
        inp = x[:, t, :]
        for l in range(L):
            if l == 0:
                gates = (inp @ params["w_ih0"] + h[l] @ params["w_hh0"]
                         + params["bias"][l])
            else:
                w = params["wr"][l - 1]
                gates = inp @ w[:H] + h[l] @ w[H:] + params["bias"][l]
            i = jax.nn.sigmoid(gates[:, :H])
            f = jax.nn.sigmoid(gates[:, H:2 * H])
            g = jnp.tanh(gates[:, 2 * H:3 * H])
            o = jax.nn.sigmoid(gates[:, 3 * H:])
            c[l] = f * c[l] + i * g
            h[l] = o * jnp.tanh(c[l])
            inp = h[l]
    return inp @ params["w_fc"].T + params["b_fc"]


if __name__ == "__main__":
    key = jax.random.PRNGKey(0)
    kx, kp = jax.random.split(key)

    # Small shapes consistent with the module (input_size=4); hidden scaled to 32
    # so 4H = 128 is exactly lane-dense.
    B, T, Din, H, L = 4, 8, 4, 32, 3
    x = jax.random.normal(kx, (B, T, Din), jnp.float32)
    params = init_params(kp, input_size=Din, hidden_size=H, num_layers=L)

    out = jax.block_until_ready(lstm_model_forward(x, params))
    ref = lstm_model_ref(x, params)

    assert out.shape == (B, 1)
    assert jnp.allclose(out, ref, atol=1e-5, rtol=1e-5), (out, ref)
    print("KERNEL_OK")
</pallas_src>

<mosaic_0001>
module attributes {stable_mosaic.version = 11 : i64} {
  func.func @_lstm_fc_kernel(%arg0: memref<4x8x4xf32, #tpu.memory_space<vmem>>, %arg1: memref<4x128xf32, #tpu.memory_space<vmem>>, %arg2: memref<32x128xf32, #tpu.memory_space<vmem>>, %arg3: memref<2x64x128xf32, #tpu.memory_space<vmem>>, %arg4: memref<3x1x128xf32, #tpu.memory_space<vmem>>, %arg5: memref<1x32xf32, #tpu.memory_space<vmem>>, %arg6: memref<1x1xf32, #tpu.memory_space<vmem>>, %arg7: memref<4x1xf32, #tpu.memory_space<vmem>>) attributes {dimension_semantics = [], scalar_prefetch = 0 : i64, scratch_operands = 0 : i64, tpu.core_type = #tpu.core_type<tc>} {
    %c0 = arith.constant 0 : index
    %c0_0 = arith.constant 0 : index
    %c0_1 = arith.constant 0 : index
    %0 = vector.load %arg0[%c0, %c0_0, %c0_1] : memref<4x8x4xf32, #tpu.memory_space<vmem>>, vector<4x8x4xf32>
    %c0_2 = arith.constant 0 : index
    %c0_3 = arith.constant 0 : index
    %1 = vector.load %arg2[%c0_2, %c0_3] : memref<32x128xf32, #tpu.memory_space<vmem>>, vector<32x128xf32>
    %c0_4 = arith.constant 0 : index
    %c0_5 = arith.constant 0 : index
    %c0_6 = arith.constant 0 : index
    %2 = vector.load %arg3[%c0_4, %c0_5, %c0_6] : memref<2x64x128xf32, #tpu.memory_space<vmem>>, vector<1x64x128xf32>
    %3 = vector.shape_cast %2 : vector<1x64x128xf32> to vector<64x128xf32>
    %c1 = arith.constant 1 : index
    %c0_7 = arith.constant 0 : index
    %c0_8 = arith.constant 0 : index
    %4 = vector.load %arg3[%c1, %c0_7, %c0_8] : memref<2x64x128xf32, #tpu.memory_space<vmem>>, vector<1x64x128xf32>
    %5 = vector.shape_cast %4 : vector<1x64x128xf32> to vector<64x128xf32>
    %c0_9 = arith.constant 0 : index
    %c0_10 = arith.constant 0 : index
    %c0_11 = arith.constant 0 : index
    %6 = vector.load %arg4[%c0_9, %c0_10, %c0_11] : memref<3x1x128xf32, #tpu.memory_space<vmem>>, vector<1x1x128xf32>
    %7 = vector.shape_cast %6 : vector<1x1x128xf32> to vector<1x128xf32>
    %8 = vector.shape_cast %7 : vector<1x128xf32> to vector<1x128xf32>
    %9 = vector.broadcast %8 : vector<1x128xf32> to vector<4x128xf32>
    %c1_12 = arith.constant 1 : index
    %c0_13 = arith.constant 0 : index
    %c0_14 = arith.constant 0 : index
    %10 = vector.load %arg4[%c1_12, %c0_13, %c0_14] : memref<3x1x128xf32, #tpu.memory_space<vmem>>, vector<1x1x128xf32>
    %11 = vector.shape_cast %10 : vector<1x1x128xf32> to vector<1x128xf32>
    %12 = vector.shape_cast %11 : vector<1x128xf32> to vector<1x128xf32>
    %13 = vector.broadcast %12 : vector<1x128xf32> to vector<4x128xf32>
    %c2 = arith.constant 2 : index
    %c0_15 = arith.constant 0 : index
    %c0_16 = arith.constant 0 : index
    %14 = vector.load %arg4[%c2, %c0_15, %c0_16] : memref<3x1x128xf32, #tpu.memory_space<vmem>>, vector<1x1x128xf32>
    %15 = vector.shape_cast %14 : vector<1x1x128xf32> to vector<1x128xf32>
    %16 = vector.shape_cast %15 : vector<1x128xf32> to vector<1x128xf32>
    %17 = vector.broadcast %16 : vector<1x128xf32> to vector<4x128xf32>
    %c0_17 = arith.constant 0 : index
    %c0_18 = arith.constant 0 : index
    %18 = vector.load %arg5[%c0_17, %c0_18] : memref<1x32xf32, #tpu.memory_space<vmem>>, vector<1x32xf32>
    %c0_19 = arith.constant 0 : index
    %c0_20 = arith.constant 0 : index
    %19 = vector.load %arg6[%c0_19, %c0_20] : memref<1x1xf32, #tpu.memory_space<vmem>>, vector<1x1xf32>
    %20 = vector.shape_cast %0 : vector<4x8x4xf32> to vector<32x4xf32>
    %c0_21 = arith.constant 0 : index
    %c0_22 = arith.constant 0 : index
    %21 = vector.load %arg1[%c0_21, %c0_22] : memref<4x128xf32, #tpu.memory_space<vmem>>, vector<4x128xf32>
    %cst = arith.constant dense<0.000000e+00> : vector<32x128xf32>
    %22 = tpu.matmul %20, %21, %cst {dimension_numbers = #tpu.dot_dimension_numbers<[1], [0], [0], [1], [0, 0, 1, 1], [], []>} : vector<32x4xf32>, vector<4x128xf32>, vector<32x128xf32> -> vector<32x128xf32>
    %23 = vector.shape_cast %22 : vector<32x128xf32> to vector<4x8x128xf32>
    %24 = tpu.iota {dimensions = array<i32: 1>} : vector<4x128xi32>
    %c64_i32 = arith.constant 64 : i32
    %25 = vector.broadcast %c64_i32 : i32 to vector<4x128xi32>
    %26 = arith.cmpi sge, %24, %25 : vector<4x128xi32>
    %c96_i32 = arith.constant 96 : i32
    %27 = vector.broadcast %c96_i32 : i32 to vector<4x128xi32>
    %28 = arith.cmpi slt, %24, %27 : vector<4x128xi32>
    %29 = arith.andi %26, %28 : vector<4x128xi1>
    %cst_23 = arith.constant 0.000000e+00 : f32
    %30 = vector.broadcast %cst_23 : f32 to vector<4x32xf32>
    %cst_24 = arith.constant 0.000000e+00 : f32
    %31 = vector.broadcast %cst_24 : f32 to vector<4x32xf32>
    %cst_25 = arith.constant 0.000000e+00 : f32
    %32 = vector.broadcast %cst_25 : f32 to vector<4x32xf32>
    %cst_26 = arith.constant 0.000000e+00 : f32
    %33 = vector.broadcast %cst_26 : f32 to vector<4x32xf32>
    %cst_27 = arith.constant 0.000000e+00 : f32
    %34 = vector.broadcast %cst_27 : f32 to vector<4x32xf32>
    %cst_28 = arith.constant 0.000000e+00 : f32
    %35 = vector.broadcast %cst_28 : f32 to vector<4x32xf32>
    %36 = vector.extract_strided_slice %23 {offsets = [0, 0, 0], sizes = [4, 1, 128], strides = [1, 1, 1]} : vector<4x8x128xf32> to vector<4x1x128xf32>
    %37 = vector.shape_cast %36 : vector<4x1x128xf32> to vector<4x128xf32>
    %cst_29 = arith.constant dense<0.000000e+00> : vector<4x128xf32>
    %38 = tpu.matmul %30, %1, %cst_29 {dimension_numbers = #tpu.dot_dimension_numbers<[1], [0], [0], [1], [0, 0, 1, 1], [], []>} : vector<4x32xf32>, vector<32x128xf32>, vector<4x128xf32> -> vector<4x128xf32>
    %39 = arith.addf %37, %38 : vector<4x128xf32>
    %40 = arith.addf %39, %9 : vector<4x128xf32>
    %41 = math.tanh %40 : vector<4x128xf32>
    %42 = arith.negf %40 : vector<4x128xf32>
    %43 = math.exp %42 : vector<4x128xf32>
    %cst_30 = arith.constant 1.000000e+00 : f32
    %44 = vector.broadcast %cst_30 : f32 to vector<4x128xf32>
    %45 = arith.addf %44, %43 : vector<4x128xf32>
    %46 = arith.divf %44, %45 : vector<4x128xf32>
    %47 = arith.select %29, %41, %46 : vector<4x128xi1>, vector<4x128xf32>
    %48 = vector.extract_strided_slice %47 {offsets = [0, 0], sizes = [4, 32], strides = [1, 1]} : vector<4x128xf32> to vector<4x32xf32>
    %49 = vector.extract_strided_slice %47 {offsets = [0, 32], sizes = [4, 32], strides = [1, 1]} : vector<4x128xf32> to vector<4x32xf32>
    %50 = vector.extract_strided_slice %47 {offsets = [0, 64], sizes = [4, 32], strides = [1, 1]} : vector<4x128xf32> to vector<4x32xf32>
    %51 = vector.extract_strided_slice %47 {offsets = [0, 96], sizes = [4, 32], strides = [1, 1]} : vector<4x128xf32> to vector<4x32xf32>
    %52 = arith.mulf %49, %33 : vector<4x32xf32>
    %53 = arith.mulf %48, %50 : vector<4x32xf32>
    %54 = arith.addf %52, %53 : vector<4x32xf32>
    %55 = math.tanh %54 : vector<4x32xf32>
    %56 = arith.mulf %51, %55 : vector<4x32xf32>
    %57 = tpu.concatenate %56, %31 in 1 : vector<4x32xf32>, vector<4x32xf32> -> vector<4x64xf32>
    %cst_31 = arith.constant dense<0.000000e+00> : vector<4x128xf32>
    %58 = tpu.matmul %57, %3, %cst_31 {dimension_numbers = #tpu.dot_dimension_numbers<[1], [0], [0], [1], [0, 0, 1, 1], [], []>} : vector<4x64xf32>, vector<64x128xf32>, vector<4x128xf32> -> vector<4x128xf32>
    %59 = arith.addf %58, %13 : vector<4x128xf32>
    %60 = math.tanh %59 : vector<4x128xf32>
    %61 = arith.negf %59 : vector<4x128xf32>
    %62 = math.exp %61 : vector<4x128xf32>
    %cst_32 = arith.constant 1.000000e+00 : f32
    %63 = vector.broadcast %cst_32 : f32 to vector<4x128xf32>
    %64 = arith.addf %63, %62 : vector<4x128xf32>
    %65 = arith.divf %63, %64 : vector<4x128xf32>
    %66 = arith.select %29, %60, %65 : vector<4x128xi1>, vector<4x128xf32>
    %67 = vector.extract_strided_slice %66 {offsets = [0, 0], sizes = [4, 32], strides = [1, 1]} : vector<4x128xf32> to vector<4x32xf32>
    %68 = vector.extract_strided_slice %66 {offsets = [0, 32], sizes = [4, 32], strides = [1, 1]} : vector<4x128xf32> to vector<4x32xf32>
    %69 = vector.extract_strided_slice %66 {offsets = [0, 64], sizes = [4, 32], strides = [1, 1]} : vector<4x128xf32> to vector<4x32xf32>
    %70 = vector.extract_strided_slice %66 {offsets = [0, 96], sizes = [4, 32], strides = [1, 1]} : vector<4x128xf32> to vector<4x32xf32>
    %71 = arith.mulf %68, %34 : vector<4x32xf32>
    %72 = arith.mulf %67, %69 : vector<4x32xf32>
    %73 = arith.addf %71, %72 : vector<4x32xf32>
    %74 = math.tanh %73 : vector<4x32xf32>
    %75 = arith.mulf %70, %74 : vector<4x32xf32>
    %76 = tpu.concatenate %75, %32 in 1 : vector<4x32xf32>, vector<4x32xf32> -> vector<4x64xf32>
    %cst_33 = arith.constant dense<0.000000e+00> : vector<4x128xf32>
    %77 = tpu.matmul %76, %5, %cst_33 {dimension_numbers = #tpu.dot_dimension_numbers<[1], [0], [0], [1], [0, 0, 1, 1], [], []>} : vector<4x64xf32>, vector<64x128xf32>, vector<4x128xf32> -> vector<4x128xf32>
    %78 = arith.addf %77, %17 : vector<4x128xf32>
    %79 = math.tanh %78 : vector<4x128xf32>
    %80 = arith.negf %78 : vector<4x128xf32>
    %81 = math.exp %80 : vector<4x128xf32>
    %cst_34 = arith.constant 1.000000e+00 : f32
    %82 = vector.broadcast %cst_34 : f32 to vector<4x128xf32>
    %83 = arith.addf %82, %81 : vector<4x128xf32>
    %84 = arith.divf %82, %83 : vector<4x128xf32>
    %85 = arith.select %29, %79, %84 : vector<4x128xi1>, vector<4x128xf32>
    %86 = vector.extract_strided_slice %85 {offsets = [0, 0], sizes = [4, 32], strides = [1, 1]} : vector<4x128xf32> to vector<4x32xf32>
    %87 = vector.extract_strided_slice %85 {offsets = [0, 32], sizes = [4, 32], strides = [1, 1]} : vector<4x128xf32> to vector<4x32xf32>
    %88 = vector.extract_strided_slice %85 {offsets = [0, 64], sizes = [4, 32], strides = [1, 1]} : vector<4x128xf32> to vector<4x32xf32>
    %89 = vector.extract_strided_slice %85 {offsets = [0, 96], sizes = [4, 32], strides = [1, 1]} : vector<4x128xf32> to vector<4x32xf32>
    %90 = arith.mulf %87, %35 : vector<4x32xf32>
    %91 = arith.mulf %86, %88 : vector<4x32xf32>
    %92 = arith.addf %90, %91 : vector<4x32xf32>
    %93 = math.tanh %92 : vector<4x32xf32>
    %94 = arith.mulf %89, %93 : vector<4x32xf32>
    %95 = vector.extract_strided_slice %23 {offsets = [0, 1, 0], sizes = [4, 1, 128], strides = [1, 1, 1]} : vector<4x8x128xf32> to vector<4x1x128xf32>
    %96 = vector.shape_cast %95 : vector<4x1x128xf32> to vector<4x128xf32>
    %cst_35 = arith.constant dense<0.000000e+00> : vector<4x128xf32>
    %97 = tpu.matmul %56, %1, %cst_35 {dimension_numbers = #tpu.dot_dimension_numbers<[1], [0], [0], [1], [0, 0, 1, 1], [], []>} : vector<4x32xf32>, vector<32x128xf32>, vector<4x128xf32> -> vector<4x128xf32>
    %98 = arith.addf %96, %97 : vector<4x128xf32>
    %99 = arith.addf %98, %9 : vector<4x128xf32>
    %100 = math.tanh %99 : vector<4x128xf32>
    %101 = arith.negf %99 : vector<4x128xf32>
    %102 = math.exp %101 : vector<4x128xf32>
    %cst_36 = arith.constant 1.000000e+00 : f32
    %103 = vector.broadcast %cst_36 : f32 to vector<4x128xf32>
    %104 = arith.addf %103, %102 : vector<4x128xf32>
    %105 = arith.divf %103, %104 : vector<4x128xf32>
    %106 = arith.select %29, %100, %105 : vector<4x128xi1>, vector<4x128xf32>
    %107 = vector.extract_strided_slice %106 {offsets = [0, 0], sizes = [4, 32], strides = [1, 1]} : vector<4x128xf32> to vector<4x32xf32>
    %108 = vector.extract_strided_slice %106 {offsets = [0, 32], sizes = [4, 32], strides = [1, 1]} : vector<4x128xf32> to vector<4x32xf32>
    %109 = vector.extract_strided_slice %106 {offsets = [0, 64], sizes = [4, 32], strides = [1, 1]} : vector<4x128xf32> to vector<4x32xf32>
    %110 = vector.extract_strided_slice %106 {offsets = [0, 96], sizes = [4, 32], strides = [1, 1]} : vector<4x128xf32> to vector<4x32xf32>
    %111 = arith.mulf %108, %54 : vector<4x32xf32>
    %112 = arith.mulf %107, %109 : vector<4x32xf32>
    %113 = arith.addf %111, %112 : vector<4x32xf32>
    %114 = math.tanh %113 : vector<4x32xf32>
    %115 = arith.mulf %110, %114 : vector<4x32xf32>
    %116 = tpu.concatenate %115, %75 in 1 : vector<4x32xf32>, vector<4x32xf32> -> vector<4x64xf32>
    %cst_37 = arith.constant dense<0.000000e+00> : vector<4x128xf32>
    %117 = tpu.matmul %116, %3, %cst_37 {dimension_numbers = #tpu.dot_dimension_numbers<[1], [0], [0], [1], [0, 0, 1, 1], [], []>} : vector<4x64xf32>, vector<64x128xf32>, vector<4x128xf32> -> vector<4x128xf32>
    %118 = arith.addf %117, %13 : vector<4x128xf32>
    %119 = math.tanh %118 : vector<4x128xf32>
    %120 = arith.negf %118 : vector<4x128xf32>
    %121 = math.exp %120 : vector<4x128xf32>
    %cst_38 = arith.constant 1.000000e+00 : f32
    %122 = vector.broadcast %cst_38 : f32 to vector<4x128xf32>
    %123 = arith.addf %122, %121 : vector<4x128xf32>
    %124 = arith.divf %122, %123 : vector<4x128xf32>
    %125 = arith.select %29, %119, %124 : vector<4x128xi1>, vector<4x128xf32>
    %126 = vector.extract_strided_slice %125 {offsets = [0, 0], sizes = [4, 32], strides = [1, 1]} : vector<4x128xf32> to vector<4x32xf32>
    %127 = vector.extract_strided_slice %125 {offsets = [0, 32], sizes = [4, 32], strides = [1, 1]} : vector<4x128xf32> to vector<4x32xf32>
    %128 = vector.extract_strided_slice %125 {offsets = [0, 64], sizes = [4, 32], strides = [1, 1]} : vector<4x128xf32> to vector<4x32xf32>
    %129 = vector.extract_strided_slice %125 {offsets = [0, 96], sizes = [4, 32], strides = [1, 1]} : vector<4x128xf32> to vector<4x32xf32>
    %130 = arith.mulf %127, %73 : vector<4x32xf32>
    %131 = arith.mulf %126, %128 : vector<4x32xf32>
    %132 = arith.addf %130, %131 : vector<4x32xf32>
    %133 = math.tanh %132 : vector<4x32xf32>
    %134 = arith.mulf %129, %133 : vector<4x32xf32>
    %135 = tpu.concatenate %134, %94 in 1 : vector<4x32xf32>, vector<4x32xf32> -> vector<4x64xf32>
    %cst_39 = arith.constant dense<0.000000e+00> : vector<4x128xf32>
    %136 = tpu.matmul %135, %5, %cst_39 {dimension_numbers = #tpu.dot_dimension_numbers<[1], [0], [0], [1], [0, 0, 1, 1], [], []>} : vector<4x64xf32>, vector<64x128xf32>, vector<4x128xf32> -> vector<4x128xf32>
    %137 = arith.addf %136, %17 : vector<4x128xf32>
    %138 = math.tanh %137 : vector<4x128xf32>
    %139 = arith.negf %137 : vector<4x128xf32>
    %140 = math.exp %139 : vector<4x128xf32>
    %cst_40 = arith.constant 1.000000e+00 : f32
    %141 = vector.broadcast %cst_40 : f32 to vector<4x128xf32>
    %142 = arith.addf %141, %140 : vector<4x128xf32>
    %143 = arith.divf %141, %142 : vector<4x128xf32>
    %144 = arith.select %29, %138, %143 : vector<4x128xi1>, vector<4x128xf32>
    %145 = vector.extract_strided_slice %144 {offsets = [0, 0], sizes = [4, 32], strides = [1, 1]} : vector<4x128xf32> to vector<4x32xf32>
    %146 = vector.extract_strided_slice %144 {offsets = [0, 32], sizes = [4, 32], strides = [1, 1]} : vector<4x128xf32> to vector<4x32xf32>
    %147 = vector.extract_strided_slice %144 {offsets = [0, 64], sizes = [4, 32], strides = [1, 1]} : vector<4x128xf32> to vector<4x32xf32>
    %148 = vector.extract_strided_slice %144 {offsets = [0, 96], sizes = [4, 32], strides = [1, 1]} : vector<4x128xf32> to vector<4x32xf32>
    %149 = arith.mulf %146, %92 : vector<4x32xf32>
    %150 = arith.mulf %145, %147 : vector<4x32xf32>
    %151 = arith.addf %149, %150 : vector<4x32xf32>
    %152 = math.tanh %151 : vector<4x32xf32>
    %153 = arith.mulf %148, %152 : vector<4x32xf32>
    %154 = vector.extract_strided_slice %23 {offsets = [0, 2, 0], sizes = [4, 1, 128], strides = [1, 1, 1]} : vector<4x8x128xf32> to vector<4x1x128xf32>
    %155 = vector.shape_cast %154 : vector<4x1x128xf32> to vector<4x128xf32>
    %cst_41 = arith.constant dense<0.000000e+00> : vector<4x128xf32>
    %156 = tpu.matmul %115, %1, %cst_41 {dimension_numbers = #tpu.dot_dimension_numbers<[1], [0], [0], [1], [0, 0, 1, 1], [], []>} : vector<4x32xf32>, vector<32x128xf32>, vector<4x128xf32> -> vector<4x128xf32>
    %157 = arith.addf %155, %156 : vector<4x128xf32>
    %158 = arith.addf %157, %9 : vector<4x128xf32>
    %159 = math.tanh %158 : vector<4x128xf32>
    %160 = arith.negf %158 : vector<4x128xf32>
    %161 = math.exp %160 : vector<4x128xf32>
    %cst_42 = arith.constant 1.000000e+00 : f32
    %162 = vector.broadcast %cst_42 : f32 to vector<4x128xf32>
    %163 = arith.addf %162, %161 : vector<4x128xf32>
    %164 = arith.divf %162, %163 : vector<4x128xf32>
    %165 = arith.select %29, %159, %164 : vector<4x128xi1>, vector<4x128xf32>
    %166 = vector.extract_strided_slice %165 {offsets = [0, 0], sizes = [4, 32], strides = [1, 1]} : vector<4x128xf32> to vector<4x32xf32>
    %167 = vector.extract_strided_slice %165 {offsets = [0, 32], sizes = [4, 32], strides = [1, 1]} : vector<4x128xf32> to vector<4x32xf32>
    %168 = vector.extract_strided_slice %165 {offsets = [0, 64], sizes = [4, 32], strides = [1, 1]} : vector<4x128xf32> to vector<4x32xf32>
    %169 = vector.extract_strided_slice %165 {offsets = [0, 96], sizes = [4, 32], strides = [1, 1]} : vector<4x128xf32> to vector<4x32xf32>
    %170 = arith.mulf %167, %113 : vector<4x32xf32>
    %171 = arith.mulf %166, %168 : vector<4x32xf32>
    %172 = arith.addf %170, %171 : vector<4x32xf32>
    %173 = math.tanh %172 : vector<4x32xf32>
    %174 = arith.mulf %169, %173 : vector<4x32xf32>
    %175 = tpu.concatenate %174, %134 in 1 : vector<4x32xf32>, vector<4x32xf32> -> vector<4x64xf32>
    %cst_43 = arith.constant dense<0.000000e+00> : vector<4x128xf32>
    %176 = tpu.matmul %175, %3, %cst_43 {dimension_numbers = #tpu.dot_dimension_numbers<[1], [0], [0], [1], [0, 0, 1, 1], [], []>} : vector<4x64xf32>, vector<64x128xf32>, vector<4x128xf32> -> vector<4x128xf32>
    %177 = arith.addf %176, %13 : vector<4x128xf32>
    %178 = math.tanh %177 : vector<4x128xf32>
    %179 = arith.negf %177 : vector<4x128xf32>
    %180 = math.exp %179 : vector<4x128xf32>
    %cst_44 = arith.constant 1.000000e+00 : f32
    %181 = vector.broadcast %cst_44 : f32 to vector<4x128xf32>
    %182 = arith.addf %181, %180 : vector<4x128xf32>
    %183 = arith.divf %181, %182 : vector<4x128xf32>
    %184 = arith.select %29, %178, %183 : vector<4x128xi1>, vector<4x128xf32>
    %185 = vector.extract_strided_slice %184 {offsets = [0, 0], sizes = [4, 32], strides = [1, 1]} : vector<4x128xf32> to vector<4x32xf32>
    %186 = vector.extract_strided_slice %184 {offsets = [0, 32], sizes = [4, 32], strides = [1, 1]} : vector<4x128xf32> to vector<4x32xf32>
    %187 = vector.extract_strided_slice %184 {offsets = [0, 64], sizes = [4, 32], strides = [1, 1]} : vector<4x128xf32> to vector<4x32xf32>
    %188 = vector.extract_strided_slice %184 {offsets = [0, 96], sizes = [4, 32], strides = [1, 1]} : vector<4x128xf32> to vector<4x32xf32>
    %189 = arith.mulf %186, %132 : vector<4x32xf32>
    %190 = arith.mulf %185, %187 : vector<4x32xf32>
    %191 = arith.addf %189, %190 : vector<4x32xf32>
    %192 = math.tanh %191 : vector<4x32xf32>
    %193 = arith.mulf %188, %192 : vector<4x32xf32>
    %194 = tpu.concatenate %193, %153 in 1 : vector<4x32xf32>, vector<4x32xf32> -> vector<4x64xf32>
    %cst_45 = arith.constant dense<0.000000e+00> : vector<4x128xf32>
    %195 = tpu.matmul %194, %5, %cst_45 {dimension_numbers = #tpu.dot_dimension_numbers<[1], [0], [0], [1], [0, 0, 1, 1], [], []>} : vector<4x64xf32>, vector<64x128xf32>, vector<4x128xf32> -> vector<4x128xf32>
    %196 = arith.addf %195, %17 : vector<4x128xf32>
    %197 = math.tanh %196 : vector<4x128xf32>
    %198 = arith.negf %196 : vector<4x128xf32>
    %199 = math.exp %198 : vector<4x128xf32>
    %cst_46 = arith.constant 1.000000e+00 : f32
    %200 = vector.broadcast %cst_46 : f32 to vector<4x128xf32>
    %201 = arith.addf %200, %199 : vector<4x128xf32>
    %202 = arith.divf %200, %201 : vector<4x128xf32>
    %203 = arith.select %29, %197, %202 : vector<4x128xi1>, vector<4x128xf32>
    %204 = vector.extract_strided_slice %203 {offsets = [0, 0], sizes = [4, 32], strides = [1, 1]} : vector<4x128xf32> to vector<4x32xf32>
    %205 = vector.extract_strided_slice %203 {offsets = [0, 32], sizes = [4, 32], strides = [1, 1]} : vector<4x128xf32> to vector<4x32xf32>
    %206 = vector.extract_strided_slice %203 {offsets = [0, 64], sizes = [4, 32], strides = [1, 1]} : vector<4x128xf32> to vector<4x32xf32>
    %207 = vector.extract_strided_slice %203 {offsets = [0, 96], sizes = [4, 32], strides = [1, 1]} : vector<4x128xf32> to vector<4x32xf32>
    %208 = arith.mulf %205, %151 : vector<4x32xf32>
    %209 = arith.mulf %204, %206 : vector<4x32xf32>
    %210 = arith.addf %208, %209 : vector<4x32xf32>
    %211 = math.tanh %210 : vector<4x32xf32>
    %212 = arith.mulf %207, %211 : vector<4x32xf32>
    %213 = vector.extract_strided_slice %23 {offsets = [0, 3, 0], sizes = [4, 1, 128], strides = [1, 1, 1]} : vector<4x8x128xf32> to vector<4x1x128xf32>
    %214 = vector.shape_cast %213 : vector<4x1x128xf32> to vector<4x128xf32>
    %cst_47 = arith.constant dense<0.000000e+00> : vector<4x128xf32>
    %215 = tpu.matmul %174, %1, %cst_47 {dimension_numbers = #tpu.dot_dimension_numbers<[1], [0], [0], [1], [0, 0, 1, 1], [], []>} : vector<4x32xf32>, vector<32x128xf32>, vector<4x128xf32> -> vector<4x128xf32>
    %216 = arith.addf %214, %215 : vector<4x128xf32>
    %217 = arith.addf %216, %9 : vector<4x128xf32>
    %218 = math.tanh %217 : vector<4x128xf32>
    %219 = arith.negf %217 : vector<4x128xf32>
    %220 = math.exp %219 : vector<4x128xf32>
    %cst_48 = arith.constant 1.000000e+00 : f32
    %221 = vector.broadcast %cst_48 : f32 to vector<4x128xf32>
    %222 = arith.addf %221, %220 : vector<4x128xf32>
    %223 = arith.divf %221, %222 : vector<4x128xf32>
    %224 = arith.select %29, %218, %223 : vector<4x128xi1>, vector<4x128xf32>
    %225 = vector.extract_strided_slice %224 {offsets = [0, 0], sizes = [4, 32], strides = [1, 1]} : vector<4x128xf32> to vector<4x32xf32>
    %226 = vector.extract_strided_slice %224 {offsets = [0, 32], sizes = [4, 32], strides = [1, 1]} : vector<4x128xf32> to vector<4x32xf32>
    %227 = vector.extract_strided_slice %224 {offsets = [0, 64], sizes = [4, 32], strides = [1, 1]} : vector<4x128xf32> to vector<4x32xf32>
    %228 = vector.extract_strided_slice %224 {offsets = [0, 96], sizes = [4, 32], strides = [1, 1]} : vector<4x128xf32> to vector<4x32xf32>
    %229 = arith.mulf %226, %172 : vector<4x32xf32>
    %230 = arith.mulf %225, %227 : vector<4x32xf32>
    %231 = arith.addf %229, %230 : vector<4x32xf32>
    %232 = math.tanh %231 : vector<4x32xf32>
    %233 = arith.mulf %228, %232 : vector<4x32xf32>
    %234 = tpu.concatenate %233, %193 in 1 : vector<4x32xf32>, vector<4x32xf32> -> vector<4x64xf32>
    %cst_49 = arith.constant dense<0.000000e+00> : vector<4x128xf32>
    %235 = tpu.matmul %234, %3, %cst_49 {dimension_numbers = #tpu.dot_dimension_numbers<[1], [0], [0], [1], [0, 0, 1, 1], [], []>} : vector<4x64xf32>, vector<64x128xf32>, vector<4x128xf32> -> vector<4x128xf32>
    %236 = arith.addf %235, %13 : vector<4x128xf32>
    %237 = math.tanh %236 : vector<4x128xf32>
    %238 = arith.negf %236 : vector<4x128xf32>
    %239 = math.exp %238 : vector<4x128xf32>
    %cst_50 = arith.constant 1.000000e+00 : f32
    %240 = vector.broadcast %cst_50 : f32 to vector<4x128xf32>
    %241 = arith.addf %240, %239 : vector<4x128xf32>
    %242 = arith.divf %240, %241 : vector<4x128xf32>
    %243 = arith.select %29, %237, %242 : vector<4x128xi1>, vector<4x128xf32>
    %244 = vector.extract_strided_slice %243 {offsets = [0, 0], sizes = [4, 32], strides = [1, 1]} : vector<4x128xf32> to vector<4x32xf32>
    %245 = vector.extract_strided_slice %243 {offsets = [0, 32], sizes = [4, 32], strides = [1, 1]} : vector<4x128xf32> to vector<4x32xf32>
    %246 = vector.extract_strided_slice %243 {offsets = [0, 64], sizes = [4, 32], strides = [1, 1]} : vector<4x128xf32> to vector<4x32xf32>
    %247 = vector.extract_strided_slice %243 {offsets = [0, 96], sizes = [4, 32], strides = [1, 1]} : vector<4x128xf32> to vector<4x32xf32>
    %248 = arith.mulf %245, %191 : vector<4x32xf32>
    %249 = arith.mulf %244, %246 : vector<4x32xf32>
    %250 = arith.addf %248, %249 : vector<4x32xf32>
    %251 = math.tanh %250 : vector<4x32xf32>
    %252 = arith.mulf %247, %251 : vector<4x32xf32>
    %253 = tpu.concatenate %252, %212 in 1 : vector<4x32xf32>, vector<4x32xf32> -> vector<4x64xf32>
    %cst_51 = arith.constant dense<0.000000e+00> : vector<4x128xf32>
    %254 = tpu.matmul %253, %5, %cst_51 {dimension_numbers = #tpu.dot_dimension_numbers<[1], [0], [0], [1], [0, 0, 1, 1], [], []>} : vector<4x64xf32>, vector<64x128xf32>, vector<4x128xf32> -> vector<4x128xf32>
    %255 = arith.addf %254, %17 : vector<4x128xf32>
    %256 = math.tanh %255 : vector<4x128xf32>
    %257 = arith.negf %255 : vector<4x128xf32>
    %258 = math.exp %257 : vector<4x128xf32>
    %cst_52 = arith.constant 1.000000e+00 : f32
    %259 = vector.broadcast %cst_52 : f32 to vector<4x128xf32>
    %260 = arith.addf %259, %258 : vector<4x128xf32>
    %261 = arith.divf %259, %260 : vector<4x128xf32>
    %262 = arith.select %29, %256, %261 : vector<4x128xi1>, vector<4x128xf32>
    %263 = vector.extract_strided_slice %262 {offsets = [0, 0], sizes = [4, 32], strides = [1, 1]} : vector<4x128xf32> to vector<4x32xf32>
    %264 = vector.extract_strided_slice %262 {offsets = [0, 32], sizes = [4, 32], strides = [1, 1]} : vector<4x128xf32> to vector<4x32xf32>
    %265 = vector.extract_strided_slice %262 {offsets = [0, 64], sizes = [4, 32], strides = [1, 1]} : vector<4x128xf32> to vector<4x32xf32>
    %266 = vector.extract_strided_slice %262 {offsets = [0, 96], sizes = [4, 32], strides = [1, 1]} : vector<4x128xf32> to vector<4x32xf32>
    %267 = arith.mulf %264, %210 : vector<4x32xf32>
    %268 = arith.mulf %263, %265 : vector<4x32xf32>
    %269 = arith.addf %267, %268 : vector<4x32xf32>
    %270 = math.tanh %269 : vector<4x32xf32>
    %271 = arith.mulf %266, %270 : vector<4x32xf32>
    %272 = vector.extract_strided_slice %23 {offsets = [0, 4, 0], sizes = [4, 1, 128], strides = [1, 1, 1]} : vector<4x8x128xf32> to vector<4x1x128xf32>
    %273 = vector.shape_cast %272 : vector<4x1x128xf32> to vector<4x128xf32>
    %cst_53 = arith.constant dense<0.000000e+00> : vector<4x128xf32>
    %274 = tpu.matmul %233, %1, %cst_53 {dimension_numbers = #tpu.dot_dimension_numbers<[1], [0], [0], [1], [0, 0, 1, 1], [], []>} : vector<4x32xf32>, vector<32x128xf32>, vector<4x128xf32> -> vector<4x128xf32>
    %275 = arith.addf %273, %274 : vector<4x128xf32>
    %276 = arith.addf %275, %9 : vector<4x128xf32>
    %277 = math.tanh %276 : vector<4x128xf32>
    %278 = arith.negf %276 : vector<4x128xf32>
    %279 = math.exp %278 : vector<4x128xf32>
    %cst_54 = arith.constant 1.000000e+00 : f32
    %280 = vector.broadcast %cst_54 : f32 to vector<4x128xf32>
    %281 = arith.addf %280, %279 : vector<4x128xf32>
    %282 = arith.divf %280, %281 : vector<4x128xf32>
    %283 = arith.select %29, %277, %282 : vector<4x128xi1>, vector<4x128xf32>
    %284 = vector.extract_strided_slice %283 {offsets = [0, 0], sizes = [4, 32], strides = [1, 1]} : vector<4x128xf32> to vector<4x32xf32>
    %285 = vector.extract_strided_slice %283 {offsets = [0, 32], sizes = [4, 32], strides = [1, 1]} : vector<4x128xf32> to vector<4x32xf32>
    %286 = vector.extract_strided_slice %283 {offsets = [0, 64], sizes = [4, 32], strides = [1, 1]} : vector<4x128xf32> to vector<4x32xf32>
    %287 = vector.extract_strided_slice %283 {offsets = [0, 96], sizes = [4, 32], strides = [1, 1]} : vector<4x128xf32> to vector<4x32xf32>
    %288 = arith.mulf %285, %231 : vector<4x32xf32>
    %289 = arith.mulf %284, %286 : vector<4x32xf32>
    %290 = arith.addf %288, %289 : vector<4x32xf32>
    %291 = math.tanh %290 : vector<4x32xf32>
    %292 = arith.mulf %287, %291 : vector<4x32xf32>
    %293 = tpu.concatenate %292, %252 in 1 : vector<4x32xf32>, vector<4x32xf32> -> vector<4x64xf32>
    %cst_55 = arith.constant dense<0.000000e+00> : vector<4x128xf32>
    %294 = tpu.matmul %293, %3, %cst_55 {dimension_numbers = #tpu.dot_dimension_numbers<[1], [0], [0], [1], [0, 0, 1, 1], [], []>} : vector<4x64xf32>, vector<64x128xf32>, vector<4x128xf32> -> vector<4x128xf32>
    %295 = arith.addf %294, %13 : vector<4x128xf32>
    %296 = math.tanh %295 : vector<4x128xf32>
    %297 = arith.negf %295 : vector<4x128xf32>
    %298 = math.exp %297 : vector<4x128xf32>
    %cst_56 = arith.constant 1.000000e+00 : f32
    %299 = vector.broadcast %cst_56 : f32 to vector<4x128xf32>
    %300 = arith.addf %299, %298 : vector<4x128xf32>
    %301 = arith.divf %299, %300 : vector<4x128xf32>
    %302 = arith.select %29, %296, %301 : vector<4x128xi1>, vector<4x128xf32>
    %303 = vector.extract_strided_slice %302 {offsets = [0, 0], sizes = [4, 32], strides = [1, 1]} : vector<4x128xf32> to vector<4x32xf32>
    %304 = vector.extract_strided_slice %302 {offsets = [0, 32], sizes = [4, 32], strides = [1, 1]} : vector<4x128xf32> to vector<4x32xf32>
    %305 = vector.extract_strided_slice %302 {offsets = [0, 64], sizes = [4, 32], strides = [1, 1]} : vector<4x128xf32> to vector<4x32xf32>
    %306 = vector.extract_strided_slice %302 {offsets = [0, 96], sizes = [4, 32], strides = [1, 1]} : vector<4x128xf32> to vector<4x32xf32>
    %307 = arith.mulf %304, %250 : vector<4x32xf32>
    %308 = arith.mulf %303, %305 : vector<4x32xf32>
    %309 = arith.addf %307, %308 : vector<4x32xf32>
    %310 = math.tanh %309 : vector<4x32xf32>
    %311 = arith.mulf %306, %310 : vector<4x32xf32>
    %312 = tpu.concatenate %311, %271 in 1 : vector<4x32xf32>, vector<4x32xf32> -> vector<4x64xf32>
    %cst_57 = arith.constant dense<0.000000e+00> : vector<4x128xf32>
    %313 = tpu.matmul %312, %5, %cst_57 {dimension_numbers = #tpu.dot_dimension_numbers<[1], [0], [0], [1], [0, 0, 1, 1], [], []>} : vector<4x64xf32>, vector<64x128xf32>, vector<4x128xf32> -> vector<4x128xf32>
    %314 = arith.addf %313, %17 : vector<4x128xf32>
    %315 = math.tanh %314 : vector<4x128xf32>
    %316 = arith.negf %314 : vector<4x128xf32>
    %317 = math.exp %316 : vector<4x128xf32>
    %cst_58 = arith.constant 1.000000e+00 : f32
    %318 = vector.broadcast %cst_58 : f32 to vector<4x128xf32>
    %319 = arith.addf %318, %317 : vector<4x128xf32>
    %320 = arith.divf %318, %319 : vector<4x128xf32>
    %321 = arith.select %29, %315, %320 : vector<4x128xi1>, vector<4x128xf32>
    %322 = vector.extract_strided_slice %321 {offsets = [0, 0], sizes = [4, 32], strides = [1, 1]} : vector<4x128xf32> to vector<4x32xf32>
    %323 = vector.extract_strided_slice %321 {offsets = [0, 32], sizes = [4, 32], strides = [1, 1]} : vector<4x128xf32> to vector<4x32xf32>
    %324 = vector.extract_strided_slice %321 {offsets = [0, 64], sizes = [4, 32], strides = [1, 1]} : vector<4x128xf32> to vector<4x32xf32>
    %325 = vector.extract_strided_slice %321 {offsets = [0, 96], sizes = [4, 32], strides = [1, 1]} : vector<4x128xf32> to vector<4x32xf32>
    %326 = arith.mulf %323, %269 : vector<4x32xf32>
    %327 = arith.mulf %322, %324 : vector<4x32xf32>
    %328 = arith.addf %326, %327 : vector<4x32xf32>
    %329 = math.tanh %328 : vector<4x32xf32>
    %330 = arith.mulf %325, %329 : vector<4x32xf32>
    %331 = vector.extract_strided_slice %23 {offsets = [0, 5, 0], sizes = [4, 1, 128], strides = [1, 1, 1]} : vector<4x8x128xf32> to vector<4x1x128xf32>
    %332 = vector.shape_cast %331 : vector<4x1x128xf32> to vector<4x128xf32>
    %cst_59 = arith.constant dense<0.000000e+00> : vector<4x128xf32>
    %333 = tpu.matmul %292, %1, %cst_59 {dimension_numbers = #tpu.dot_dimension_numbers<[1], [0], [0], [1], [0, 0, 1, 1], [], []>} : vector<4x32xf32>, vector<32x128xf32>, vector<4x128xf32> -> vector<4x128xf32>
    %334 = arith.addf %332, %333 : vector<4x128xf32>
    %335 = arith.addf %334, %9 : vector<4x128xf32>
    %336 = math.tanh %335 : vector<4x128xf32>
    %337 = arith.negf %335 : vector<4x128xf32>
    %338 = math.exp %337 : vector<4x128xf32>
    %cst_60 = arith.constant 1.000000e+00 : f32
    %339 = vector.broadcast %cst_60 : f32 to vector<4x128xf32>
    %340 = arith.addf %339, %338 : vector<4x128xf32>
    %341 = arith.divf %339, %340 : vector<4x128xf32>
    %342 = arith.select %29, %336, %341 : vector<4x128xi1>, vector<4x128xf32>
    %343 = vector.extract_strided_slice %342 {offsets = [0, 0], sizes = [4, 32], strides = [1, 1]} : vector<4x128xf32> to vector<4x32xf32>
    %344 = vector.extract_strided_slice %342 {offsets = [0, 32], sizes = [4, 32], strides = [1, 1]} : vector<4x128xf32> to vector<4x32xf32>
    %345 = vector.extract_strided_slice %342 {offsets = [0, 64], sizes = [4, 32], strides = [1, 1]} : vector<4x128xf32> to vector<4x32xf32>
    %346 = vector.extract_strided_slice %342 {offsets = [0, 96], sizes = [4, 32], strides = [1, 1]} : vector<4x128xf32> to vector<4x32xf32>
    %347 = arith.mulf %344, %290 : vector<4x32xf32>
    %348 = arith.mulf %343, %345 : vector<4x32xf32>
    %349 = arith.addf %347, %348 : vector<4x32xf32>
    %350 = math.tanh %349 : vector<4x32xf32>
    %351 = arith.mulf %346, %350 : vector<4x32xf32>
    %352 = tpu.concatenate %351, %311 in 1 : vector<4x32xf32>, vector<4x32xf32> -> vector<4x64xf32>
    %cst_61 = arith.constant dense<0.000000e+00> : vector<4x128xf32>
    %353 = tpu.matmul %352, %3, %cst_61 {dimension_numbers = #tpu.dot_dimension_numbers<[1], [0], [0], [1], [0, 0, 1, 1], [], []>} : vector<4x64xf32>, vector<64x128xf32>, vector<4x128xf32> -> vector<4x128xf32>
    %354 = arith.addf %353, %13 : vector<4x128xf32>
    %355 = math.tanh %354 : vector<4x128xf32>
    %356 = arith.negf %354 : vector<4x128xf32>
    %357 = math.exp %356 : vector<4x128xf32>
    %cst_62 = arith.constant 1.000000e+00 : f32
    %358 = vector.broadcast %cst_62 : f32 to vector<4x128xf32>
    %359 = arith.addf %358, %357 : vector<4x128xf32>
    %360 = arith.divf %358, %359 : vector<4x128xf32>
    %361 = arith.select %29, %355, %360 : vector<4x128xi1>, vector<4x128xf32>
    %362 = vector.extract_strided_slice %361 {offsets = [0, 0], sizes = [4, 32], strides = [1, 1]} : vector<4x128xf32> to vector<4x32xf32>
    %363 = vector.extract_strided_slice %361 {offsets = [0, 32], sizes = [4, 32], strides = [1, 1]} : vector<4x128xf32> to vector<4x32xf32>
    %364 = vector.extract_strided_slice %361 {offsets = [0, 64], sizes = [4, 32], strides = [1, 1]} : vector<4x128xf32> to vector<4x32xf32>
    %365 = vector.extract_strided_slice %361 {offsets = [0, 96], sizes = [4, 32], strides = [1, 1]} : vector<4x128xf32> to vector<4x32xf32>
    %366 = arith.mulf %363, %309 : vector<4x32xf32>
    %367 = arith.mulf %362, %364 : vector<4x32xf32>
    %368 = arith.addf %366, %367 : vector<4x32xf32>
    %369 = math.tanh %368 : vector<4x32xf32>
    %370 = arith.mulf %365, %369 : vector<4x32xf32>
    %371 = tpu.concatenate %370, %330 in 1 : vector<4x32xf32>, vector<4x32xf32> -> vector<4x64xf32>
    %cst_63 = arith.constant dense<0.000000e+00> : vector<4x128xf32>
    %372 = tpu.matmul %371, %5, %cst_63 {dimension_numbers = #tpu.dot_dimension_numbers<[1], [0], [0], [1], [0, 0, 1, 1], [], []>} : vector<4x64xf32>, vector<64x128xf32>, vector<4x128xf32> -> vector<4x128xf32>
    %373 = arith.addf %372, %17 : vector<4x128xf32>
    %374 = math.tanh %373 : vector<4x128xf32>
    %375 = arith.negf %373 : vector<4x128xf32>
    %376 = math.exp %375 : vector<4x128xf32>
    %cst_64 = arith.constant 1.000000e+00 : f32
    %377 = vector.broadcast %cst_64 : f32 to vector<4x128xf32>
    %378 = arith.addf %377, %376 : vector<4x128xf32>
    %379 = arith.divf %377, %378 : vector<4x128xf32>
    %380 = arith.select %29, %374, %379 : vector<4x128xi1>, vector<4x128xf32>
    %381 = vector.extract_strided_slice %380 {offsets = [0, 0], sizes = [4, 32], strides = [1, 1]} : vector<4x128xf32> to vector<4x32xf32>
    %382 = vector.extract_strided_slice %380 {offsets = [0, 32], sizes = [4, 32], strides = [1, 1]} : vector<4x128xf32> to vector<4x32xf32>
    %383 = vector.extract_strided_slice %380 {offsets = [0, 64], sizes = [4, 32], strides = [1, 1]} : vector<4x128xf32> to vector<4x32xf32>
    %384 = vector.extract_strided_slice %380 {offsets = [0, 96], sizes = [4, 32], strides = [1, 1]} : vector<4x128xf32> to vector<4x32xf32>
    %385 = arith.mulf %382, %328 : vector<4x32xf32>
    %386 = arith.mulf %381, %383 : vector<4x32xf32>
    %387 = arith.addf %385, %386 : vector<4x32xf32>
    %388 = math.tanh %387 : vector<4x32xf32>
    %389 = arith.mulf %384, %388 : vector<4x32xf32>
    %390 = vector.extract_strided_slice %23 {offsets = [0, 6, 0], sizes = [4, 1, 128], strides = [1, 1, 1]} : vector<4x8x128xf32> to vector<4x1x128xf32>
    %391 = vector.shape_cast %390 : vector<4x1x128xf32> to vector<4x128xf32>
    %cst_65 = arith.constant dense<0.000000e+00> : vector<4x128xf32>
    %392 = tpu.matmul %351, %1, %cst_65 {dimension_numbers = #tpu.dot_dimension_numbers<[1], [0], [0], [1], [0, 0, 1, 1], [], []>} : vector<4x32xf32>, vector<32x128xf32>, vector<4x128xf32> -> vector<4x128xf32>
    %393 = arith.addf %391, %392 : vector<4x128xf32>
    %394 = arith.addf %393, %9 : vector<4x128xf32>
    %395 = math.tanh %394 : vector<4x128xf32>
    %396 = arith.negf %394 : vector<4x128xf32>
    %397 = math.exp %396 : vector<4x128xf32>
    %cst_66 = arith.constant 1.000000e+00 : f32
    %398 = vector.broadcast %cst_66 : f32 to vector<4x128xf32>
    %399 = arith.addf %398, %397 : vector<4x128xf32>
    %400 = arith.divf %398, %399 : vector<4x128xf32>
    %401 = arith.select %29, %395, %400 : vector<4x128xi1>, vector<4x128xf32>
    %402 = vector.extract_strided_slice %401 {offsets = [0, 0], sizes = [4, 32], strides = [1, 1]} : vector<4x128xf32> to vector<4x32xf32>
    %403 = vector.extract_strided_slice %401 {offsets = [0, 32], sizes = [4, 32], strides = [1, 1]} : vector<4x128xf32> to vector<4x32xf32>
    %404 = vector.extract_strided_slice %401 {offsets = [0, 64], sizes = [4, 32], strides = [1, 1]} : vector<4x128xf32> to vector<4x32xf32>
    %405 = vector.extract_strided_slice %401 {offsets = [0, 96], sizes = [4, 32], strides = [1, 1]} : vector<4x128xf32> to vector<4x32xf32>
    %406 = arith.mulf %403, %349 : vector<4x32xf32>
    %407 = arith.mulf %402, %404 : vector<4x32xf32>
    %408 = arith.addf %406, %407 : vector<4x32xf32>
    %409 = math.tanh %408 : vector<4x32xf32>
    %410 = arith.mulf %405, %409 : vector<4x32xf32>
    %411 = tpu.concatenate %410, %370 in 1 : vector<4x32xf32>, vector<4x32xf32> -> vector<4x64xf32>
    %cst_67 = arith.constant dense<0.000000e+00> : vector<4x128xf32>
    %412 = tpu.matmul %411, %3, %cst_67 {dimension_numbers = #tpu.dot_dimension_numbers<[1], [0], [0], [1], [0, 0, 1, 1], [], []>} : vector<4x64xf32>, vector<64x128xf32>, vector<4x128xf32> -> vector<4x128xf32>
    %413 = arith.addf %412, %13 : vector<4x128xf32>
    %414 = math.tanh %413 : vector<4x128xf32>
    %415 = arith.negf %413 : vector<4x128xf32>
    %416 = math.exp %415 : vector<4x128xf32>
    %cst_68 = arith.constant 1.000000e+00 : f32
    %417 = vector.broadcast %cst_68 : f32 to vector<4x128xf32>
    %418 = arith.addf %417, %416 : vector<4x128xf32>
    %419 = arith.divf %417, %418 : vector<4x128xf32>
    %420 = arith.select %29, %414, %419 : vector<4x128xi1>, vector<4x128xf32>
    %421 = vector.extract_strided_slice %420 {offsets = [0, 0], sizes = [4, 32], strides = [1, 1]} : vector<4x128xf32> to vector<4x32xf32>
    %422 = vector.extract_strided_slice %420 {offsets = [0, 32], sizes = [4, 32], strides = [1, 1]} : vector<4x128xf32> to vector<4x32xf32>
    %423 = vector.extract_strided_slice %420 {offsets = [0, 64], sizes = [4, 32], strides = [1, 1]} : vector<4x128xf32> to vector<4x32xf32>
    %424 = vector.extract_strided_slice %420 {offsets = [0, 96], sizes = [4, 32], strides = [1, 1]} : vector<4x128xf32> to vector<4x32xf32>
    %425 = arith.mulf %422, %368 : vector<4x32xf32>
    %426 = arith.mulf %421, %423 : vector<4x32xf32>
    %427 = arith.addf %425, %426 : vector<4x32xf32>
    %428 = math.tanh %427 : vector<4x32xf32>
    %429 = arith.mulf %424, %428 : vector<4x32xf32>
    %430 = tpu.concatenate %429, %389 in 1 : vector<4x32xf32>, vector<4x32xf32> -> vector<4x64xf32>
    %cst_69 = arith.constant dense<0.000000e+00> : vector<4x128xf32>
    %431 = tpu.matmul %430, %5, %cst_69 {dimension_numbers = #tpu.dot_dimension_numbers<[1], [0], [0], [1], [0, 0, 1, 1], [], []>} : vector<4x64xf32>, vector<64x128xf32>, vector<4x128xf32> -> vector<4x128xf32>
    %432 = arith.addf %431, %17 : vector<4x128xf32>
    %433 = math.tanh %432 : vector<4x128xf32>
    %434 = arith.negf %432 : vector<4x128xf32>
    %435 = math.exp %434 : vector<4x128xf32>
    %cst_70 = arith.constant 1.000000e+00 : f32
    %436 = vector.broadcast %cst_70 : f32 to vector<4x128xf32>
    %437 = arith.addf %436, %435 : vector<4x128xf32>
    %438 = arith.divf %436, %437 : vector<4x128xf32>
    %439 = arith.select %29, %433, %438 : vector<4x128xi1>, vector<4x128xf32>
    %440 = vector.extract_strided_slice %439 {offsets = [0, 0], sizes = [4, 32], strides = [1, 1]} : vector<4x128xf32> to vector<4x32xf32>
    %441 = vector.extract_strided_slice %439 {offsets = [0, 32], sizes = [4, 32], strides = [1, 1]} : vector<4x128xf32> to vector<4x32xf32>
    %442 = vector.extract_strided_slice %439 {offsets = [0, 64], sizes = [4, 32], strides = [1, 1]} : vector<4x128xf32> to vector<4x32xf32>
    %443 = vector.extract_strided_slice %439 {offsets = [0, 96], sizes = [4, 32], strides = [1, 1]} : vector<4x128xf32> to vector<4x32xf32>
    %444 = arith.mulf %441, %387 : vector<4x32xf32>
    %445 = arith.mulf %440, %442 : vector<4x32xf32>
    %446 = arith.addf %444, %445 : vector<4x32xf32>
    %447 = math.tanh %446 : vector<4x32xf32>
    %448 = arith.mulf %443, %447 : vector<4x32xf32>
    %449 = vector.extract_strided_slice %23 {offsets = [0, 7, 0], sizes = [4, 1, 128], strides = [1, 1, 1]} : vector<4x8x128xf32> to vector<4x1x128xf32>
    %450 = vector.shape_cast %449 : vector<4x1x128xf32> to vector<4x128xf32>
    %cst_71 = arith.constant dense<0.000000e+00> : vector<4x128xf32>
    %451 = tpu.matmul %410, %1, %cst_71 {dimension_numbers = #tpu.dot_dimension_numbers<[1], [0], [0], [1], [0, 0, 1, 1], [], []>} : vector<4x32xf32>, vector<32x128xf32>, vector<4x128xf32> -> vector<4x128xf32>
    %452 = arith.addf %450, %451 : vector<4x128xf32>
    %453 = arith.addf %452, %9 : vector<4x128xf32>
    %454 = math.tanh %453 : vector<4x128xf32>
    %455 = arith.negf %453 : vector<4x128xf32>
    %456 = math.exp %455 : vector<4x128xf32>
    %cst_72 = arith.constant 1.000000e+00 : f32
    %457 = vector.broadcast %cst_72 : f32 to vector<4x128xf32>
    %458 = arith.addf %457, %456 : vector<4x128xf32>
    %459 = arith.divf %457, %458 : vector<4x128xf32>
    %460 = arith.select %29, %454, %459 : vector<4x128xi1>, vector<4x128xf32>
    %461 = vector.extract_strided_slice %460 {offsets = [0, 0], sizes = [4, 32], strides = [1, 1]} : vector<4x128xf32> to vector<4x32xf32>
    %462 = vector.extract_strided_slice %460 {offsets = [0, 32], sizes = [4, 32], strides = [1, 1]} : vector<4x128xf32> to vector<4x32xf32>
    %463 = vector.extract_strided_slice %460 {offsets = [0, 64], sizes = [4, 32], strides = [1, 1]} : vector<4x128xf32> to vector<4x32xf32>
    %464 = vector.extract_strided_slice %460 {offsets = [0, 96], sizes = [4, 32], strides = [1, 1]} : vector<4x128xf32> to vector<4x32xf32>
    %465 = arith.mulf %462, %408 : vector<4x32xf32>
    %466 = arith.mulf %461, %463 : vector<4x32xf32>
    %467 = arith.addf %465, %466 : vector<4x32xf32>
    %468 = math.tanh %467 : vector<4x32xf32>
    %469 = arith.mulf %464, %468 : vector<4x32xf32>
    %470 = tpu.concatenate %469, %429 in 1 : vector<4x32xf32>, vector<4x32xf32> -> vector<4x64xf32>
    %cst_73 = arith.constant dense<0.000000e+00> : vector<4x128xf32>
    %471 = tpu.matmul %470, %3, %cst_73 {dimension_numbers = #tpu.dot_dimension_numbers<[1], [0], [0], [1], [0, 0, 1, 1], [], []>} : vector<4x64xf32>, vector<64x128xf32>, vector<4x128xf32> -> vector<4x128xf32>
    %472 = arith.addf %471, %13 : vector<4x128xf32>
    %473 = math.tanh %472 : vector<4x128xf32>
    %474 = arith.negf %472 : vector<4x128xf32>
    %475 = math.exp %474 : vector<4x128xf32>
    %cst_74 = arith.constant 1.000000e+00 : f32
    %476 = vector.broadcast %cst_74 : f32 to vector<4x128xf32>
    %477 = arith.addf %476, %475 : vector<4x128xf32>
    %478 = arith.divf %476, %477 : vector<4x128xf32>
    %479 = arith.select %29, %473, %478 : vector<4x128xi1>, vector<4x128xf32>
    %480 = vector.extract_strided_slice %479 {offsets = [0, 0], sizes = [4, 32], strides = [1, 1]} : vector<4x128xf32> to vector<4x32xf32>
    %481 = vector.extract_strided_slice %479 {offsets = [0, 32], sizes = [4, 32], strides = [1, 1]} : vector<4x128xf32> to vector<4x32xf32>
    %482 = vector.extract_strided_slice %479 {offsets = [0, 64], sizes = [4, 32], strides = [1, 1]} : vector<4x128xf32> to vector<4x32xf32>
    %483 = vector.extract_strided_slice %479 {offsets = [0, 96], sizes = [4, 32], strides = [1, 1]} : vector<4x128xf32> to vector<4x32xf32>
    %484 = arith.mulf %481, %427 : vector<4x32xf32>
    %485 = arith.mulf %480, %482 : vector<4x32xf32>
    %486 = arith.addf %484, %485 : vector<4x32xf32>
    %487 = math.tanh %486 : vector<4x32xf32>
    %488 = arith.mulf %483, %487 : vector<4x32xf32>
    %489 = tpu.concatenate %488, %448 in 1 : vector<4x32xf32>, vector<4x32xf32> -> vector<4x64xf32>
    %cst_75 = arith.constant dense<0.000000e+00> : vector<4x128xf32>
    %490 = tpu.matmul %489, %5, %cst_75 {dimension_numbers = #tpu.dot_dimension_numbers<[1], [0], [0], [1], [0, 0, 1, 1], [], []>} : vector<4x64xf32>, vector<64x128xf32>, vector<4x128xf32> -> vector<4x128xf32>
    %491 = arith.addf %490, %17 : vector<4x128xf32>
    %492 = math.tanh %491 : vector<4x128xf32>
    %493 = arith.negf %491 : vector<4x128xf32>
    %494 = math.exp %493 : vector<4x128xf32>
    %cst_76 = arith.constant 1.000000e+00 : f32
    %495 = vector.broadcast %cst_76 : f32 to vector<4x128xf32>
    %496 = arith.addf %495, %494 : vector<4x128xf32>
    %497 = arith.divf %495, %496 : vector<4x128xf32>
    %498 = arith.select %29, %492, %497 : vector<4x128xi1>, vector<4x128xf32>
    %499 = vector.extract_strided_slice %498 {offsets = [0, 0], sizes = [4, 32], strides = [1, 1]} : vector<4x128xf32> to vector<4x32xf32>
    %500 = vector.extract_strided_slice %498 {offsets = [0, 32], sizes = [4, 32], strides = [1, 1]} : vector<4x128xf32> to vector<4x32xf32>
    %501 = vector.extract_strided_slice %498 {offsets = [0, 64], sizes = [4, 32], strides = [1, 1]} : vector<4x128xf32> to vector<4x32xf32>
    %502 = vector.extract_strided_slice %498 {offsets = [0, 96], sizes = [4, 32], strides = [1, 1]} : vector<4x128xf32> to vector<4x32xf32>
    %503 = arith.mulf %500, %446 : vector<4x32xf32>
    %504 = arith.mulf %499, %501 : vector<4x32xf32>
    %505 = arith.addf %503, %504 : vector<4x32xf32>
    %506 = math.tanh %505 : vector<4x32xf32>
    %507 = arith.mulf %502, %506 : vector<4x32xf32>
    %508 = vector.broadcast %18 : vector<1x32xf32> to vector<4x32xf32>
    %509 = arith.mulf %507, %508 : vector<4x32xf32>
    %cst_77 = arith.constant dense<0.000000e+00> : vector<4xf32>
    %510 = vector.multi_reduction <add>, %509, %cst_77 [1] : vector<4x32xf32> to vector<4xf32>
    %511 = vector.shape_cast %510 : vector<4xf32> to vector<4x1xf32>
    %512 = vector.broadcast %19 : vector<1x1xf32> to vector<4x1xf32>
    %513 = arith.addf %511, %512 : vector<4x1xf32>
    %c0_78 = arith.constant 0 : index
    %c0_79 = arith.constant 0 : index
    %514 = vector.load %arg7[%c0_78, %c0_79] : memref<4x1xf32, #tpu.memory_space<vmem>>, vector<4x1xf32>
    tpu.vector_store %arg7[%c0_78, %c0_79], %513 {strides = array<i32>} : memref<4x1xf32, #tpu.memory_space<vmem>>, vector<4x1xf32>,
    return
  }
}

</mosaic_0001>

<bundles_post_ra>
// kernel: tpu_custom_call.1
= control target key start
LH: loop header
LB: loop body
LE: loop exit
PB: predicated region body
PF: predicated region fallthrough
CT: control target
= control target key end

     0   :  { %s4303_s0 = inlined_call_operand.vmem [shape: f32[4,8,4], index: 0, kind: input, shape index: {}]   ;;  %s4304_s1 = inlined_call_operand.vmem [shape: f32[4,128], index: 1, kind: input, shape index: {}]   ;;  %s4305_s2 = inlined_call_operand.vmem [shape: f32[32,128], index: 2, kind: input, shape index: {}]   ;;  %s4306_s3 = inlined_call_operand.hbm [shape: f32[2,64,128], index: 3, kind: input, shape index: {}]   ;;  %s4307_s4 = inlined_call_operand.vmem [shape: f32[3,1,128], index: 4, kind: input, shape index: {}]   ;;  %s4308_s5 = inlined_call_operand.vmem [shape: f32[1,32], index: 5, kind: input, shape index: {}]   ;;  %s4309_s6 = inlined_call_operand.<no memory space> [shape: f32[1,1], index: 6, kind: input, shape index: {}]   ;;  %s4310_s7 = inlined_call_operand.vmem [shape: f32[4,1], index: 7, kind: output, shape index: {}]  }
   0x1   :  { %v12_v0 = vstv %s4309_s6 }
   0x2   :  { %13 = vst [vmem:[#allocation2] sm:$0x1] %v12_v0 }
   0x3   :  { %14 = vsyncpa [#allocation4], 0  ;;  %s25_s28 = sshll.u32 %s4306_s3, 4  ;;  %s3031_s29 = smov [#allocation3]   ;;  %s26_s28 = int_to_ptr.hbm [resolvable:$true] %s25_s28 }
   0x4   :  { %s27_s30 = sshll.u32 %s3031_s29, 4  ;;  %s3032_s8 = smov 128   ;;  %s28_s30 = int_to_ptr.vmem [resolvable:$true] %s27_s30 }
   0x5   :  { %s3033_s9 = smov 8  }
   0x6   :  { %33 = dma.hbm_to_vmem [thread:$0]  %s26_s28, 2048, %s28_s30, [#allocation4], %s3032_s8, %s3032_s8, %s3033_s9  }
   0x7   :  { %3029 = dma.done.wait [#allocation4], 2048  }
   0x8   :  { %3030 = vsyncadd [#allocation4], 4294965248  ;;  %vm99_vm0 = vcmask 1043456   ;;  %vm86_vm1 = vcmask 31744   ;;  %v85_v1 = vld [vmem:[%s4304_s1] sm:$0xf]  ;;  %v132_v50 = vlaneseq }
   0x9   :  { %v3090_v2 = vld [vmem:[%s4305_s2 + $0x18] sm:$0xff]  ;;  %v44_v3 = vld [vmem:[%s4303_s0] sm:$0xff]  ;;  %2551 = vmatpush.msk.msra.mxu0 %vm99_vm0, %v85_v1  ;;  %v3099_v4 = vld [vmem:[%s4305_s2 + $0x10] sm:$0xff]  ;;  %v3034_v8 = vmov 0.0   ;;  %vm4314_vm7 = vcmask 1041409   ;;  %s3036_s27 = smov 32  }
   0xa   :  { %153 = vmatpush.msra.mxu1 %v3090_v2  ;;  %2552 = vmatmul.msk.f32.vlgmr.msra.gmra.mxu0 %vm86_vm1, %v44_v3  ;;  %v3105_v5 = vld [vmem:[%s4305_s2 + $0x8] sm:$0xff]  ;;  %v3111_v6 = vld [vmem:[%s4305_s2] sm:$0xff]  ;;  %v46_v9 = vld [vmem:[%s4303_s0 + $0x10] sm:$0xff]  ;;  %v133_v59 = vand.u32 127, %v132_v50  ;;  %s3037_s6 = smov 96  }
   0xb   :  { %v45_v7 = vld [vmem:[%s4303_s0 + $0x8] sm:$0xff]  ;;  %v47_v10 = vld [vmem:[%s4303_s0 + $0x18] sm:$0xff]  ;;  %v3136_v12 = vld [vmem:[%s4307_s4] ss:$0 sm:$0xff]  ;;  %s3035_s0 = smov 64  }
   0xc   :  { %154 = vmatpush.msra.mxu1 %v3099_v4  ;;  %vm134_vm14 = vcmp.ge.s32.totalorder %v133_v59, 64  ;;  %vm135_vm15 = vcmp.lt.s32.totalorder %v133_v59, 96  ;;  %v3237_v59 = vld [vmem:[#allocation3 + $0x10] sm:$0xff]  ;;  %v3242_v60 = vld [vmem:[#allocation3 + $0x8] sm:$0xff]  ;;  %v3252_v63 = vld [vmem:[#allocation3] sm:$0xff] }
   0xe   :  { %155 = vmatpush.msra.mxu1 %v3105_v5 }
  0x10   :  { %156 = vmatpush.msra.mxu1 %v3111_v6 }
  0x11   :  { %157 = vmatmul.f32.vlgmr.msra.gmra.mxu1 %v3034_v8 }
  0x12   :  { %447 = vmatpush.msrb.mxu1 %v3090_v2  ;;  %2553 = vmatmul.msk.f32.gmra.mxu0 %vm86_vm1, %v45_v7 }
  0x14   :  { %448 = vmatpush.msrb.mxu1 %v3099_v4 }
  0x16   :  { %449 = vmatpush.msrb.mxu1 %v3105_v5 }
  0x18   :  { %450 = vmatpush.msrb.mxu1 %v3111_v6 }
  0x1a   :  { %2554 = vmatmul.msk.f32.gmra.mxu0 %vm86_vm1, %v46_v9 }
  0x22   :  { %2555 = vmatmul.msk.f32.gmra.mxu0 %vm86_vm1, %v47_v10  ;;  %vm265_vm1 = vcmask 1042434  }
  0x87   :  { %v3131_v11 = vpop.f32.mrf.mxu0 }
  0x8e   :  { %v158_v13 = vpop.f32.mrf.mxu1 }
  0x8f   :  { %v162_v14 = vrot.slane %v158_v13, 1  ;;  %v169_v15 = vadd.f32 %v158_v13, %v3131_v11  ;;  %v3139_v16 = vpop.f32.mrf.mxu0  ;;  %v163_v21 = vrot.slane %v158_v13, 2  ;;  %v164_v30 = vrot.slane %v158_v13, 3 }
  0x91   :  { %v173_v17 = vadd.f32 %v3136_v12, %v169_v15  ;;  %v170_v18 = vadd.f32 %v162_v14, %v3139_v16 }
  0x93   :  { %v2556_v19 = vmul.f32 -1.442695, %v173_v17  ;;  %v174_v20 = vadd.f32 %v3136_v12, %v170_v18 }
  0x95   :  { %v2557_v22 = vmul.f32 -1.442695, %v174_v20  ;;  %2639 = vpow2.f32 %v2556_v19 }
  0x97   :  { %2641 = vpow2.f32 %v2557_v22  ;;  %v3144_v23 = vpop.f32.mrf.mxu0 }
  0x98   :  { %v171_v24 = vadd.f32 %v163_v21, %v3144_v23 }
  0x9a   :  { %v175_v25 = vadd.f32 %v3136_v12, %v171_v24 }
  0x9b   :  { %v2640_v26 = vpop.eup %2639 }
  0x9c   :  { %v2558_v28 = vmul.f32 -1.442695, %v175_v25  ;;  %v3148_v31 = vadd.f32 1.0, %v2640_v26 }
  0x9d   :  { %v2642_v27 = vpop.eup %2641 }
  0x9e   :  { %v194_v29 = vadd.f32 1.0, %v2642_v27  ;;  %2643 = vpow2.f32 %v2558_v28  ;;  %vm202_vm8 = vweird.f32 %v3148_v31  ;;  %v206_v1 = vand.u32 2147483647, %v3148_v31 }
  0x9f   :  { %v3150_v32 = vpop.f32.mrf.mxu0  ;;  %v208_v15 = vand.u32 2147483648, %v3148_v31 }
  0xa0   :  { %2645 = vrcp.f32 %v194_v29  ;;  %v172_v33 = vadd.f32 %v164_v30, %v3150_v32  ;;  %v221_v53 = vand.u32 2147483647, %v194_v29  ;;  %v223_v54 = vand.u32 2147483648, %v194_v29 }
  0xa1   :  { %2647 = vrcp.f32 %v3148_v31  ;;  %vm217_vm4 = vweird.f32 %v194_v29  ;;  %v209_v30 = vor.u32 1.1754944e-38, %v208_v15 }
  0xa2   :  { %v176_v34 = vadd.f32 %v3136_v12, %v172_v33  ;;  %vm222_vm10 = vcmp.eq.f32.partialorder %v221_v53, 8.507059e+37  ;;  %v224_v3 = vor.u32 1.1754944e-38, %v223_v54  ;;  %v3216_v54 = vld [vmem:[#allocation3 + $0x38] sm:$0xff] }
  0xa3   :  { %317 = vmatpush.msra.mxu2 %v3216_v54  ;;  %610 = vmatpush.msra.mxu1 %v3216_v54 }
  0xa4   :  { %v2644_v35 = vpop.eup %2643  ;;  %v2559_v36 = vmul.f32 -1.442695, %v176_v34  ;;  %907 = vmatpush.msrb.mxu0 %v3216_v54 }
  0xa5   :  { %v195_v38 = vadd.f32 1.0, %v2644_v35 }
  0xa6   :  { %v2646_v37 = vpop.eup %2645  ;;  %2649 = vpow2.f32 %v2559_v36 }
  0xa7   :  { %v213_v39 = vmul.f32 %v2646_v37, %v194_v29  ;;  %2651 = vrcp.f32 %v195_v38  ;;  %v3155_v40 = vpop.eup %2647  ;;  %vm218_vm2 = vweird.f32 %v2646_v37  ;;  %v238_v57 = vand.u32 2147483648, %v195_v38 }
  0xa8   :  { %v198_v43 = vmul.f32 %v3155_v40, %v3148_v31  ;;  %vm3163_vm5 = vmor %vm217_vm4, %vm218_vm2  ;;  %vm232_vm6 = vweird.f32 %v195_v38  ;;  %v236_v61 = vand.u32 2147483647, %v195_v38  ;;  %vm203_vm11 = vweird.f32 %v3155_v40 }
  0xa9   :  { %v214_v41 = vsub.f32 1.0, %v213_v39  ;;  %v239_v10 = vor.u32 1.1754944e-38, %v238_v57  ;;  %vm3188_vm0 = vmor %vm202_vm8, %vm203_vm11  ;;  %vm207_vm4 = vcmp.eq.f32.partialorder %v206_v1, 8.507059e+37  ;;  %v3227_v57 = vld [vmem:[#allocation3 + $0x20] sm:$0xff] }
  0xaa   :  { %v199_v48 = vsub.f32 1.0, %v198_v43  ;;  %vm237_vm12 = vcmp.eq.f32.partialorder %v236_v61, 8.507059e+37  ;;  %vm3198_vm8 = vmand %vm134_vm14, %vm135_vm15 }
  0xab   :  { %v215_v46 = vmul.f32 %v2646_v37, %v214_v41 }
  0xac   :  { %v2650_v42 = vpop.eup %2649  ;;  %v200_v55 = vmul.f32 %v3155_v40, %v199_v48 }
  0xad   :  { %v2652_v44 = vpop.eup %2651  ;;  %v3159_v45 = vadd.f32 1.0, %v2650_v42  ;;  %v216_v51 = vadd.f32 %v2646_v37, %v215_v46 }
  0xae   :  { %v228_v47 = vmul.f32 %v2652_v44, %v195_v38  ;;  %vm233_vm3 = vweird.f32 %v2652_v44  ;;  %v201_v9 = vadd.f32 %v3155_v40, %v200_v55  ;;  %v3218_v55 = vld [vmem:[#allocation3 + $0x30] sm:$0xff] }
  0xaf   :  { %2653 = vrcp.f32 %v3159_v45  ;;  %v220_v62 = vsel %vm3163_vm5, %v2646_v37, %v216_v51  ;;  %vm3171_vm9 = vmor %vm232_vm6, %vm233_vm3  ;;  %v253_v18 = vand.u32 2147483648, %v3159_v45  ;;  %v251_v21 = vand.u32 2147483647, %v3159_v45  ;;  %318 = vmatpush.msra.mxu2 %v3218_v55  ;;  %611 = vmatpush.msra.mxu1 %v3218_v55 }
  0xb0   :  { %v229_v49 = vsub.f32 1.0, %v228_v47  ;;  %2655 = vtanh.f32 %v174_v20  ;;  %v205_v27 = vsel %vm3188_vm0, %v3155_v40, %v201_v9  ;;  %vm247_vm2 = vweird.f32 %v3159_v45  ;;  %908 = vmatpush.msrb.mxu0 %v3218_v55 }
  0xb1   :  { %2657 = vtanh.f32 %v175_v25  ;;  %v254_v33 = vor.u32 1.1754944e-38, %v253_v18  ;;  %vm252_vm5 = vcmp.eq.f32.partialorder %v251_v21, 8.507059e+37  ;;  %v210_v37 = vsel %vm207_vm4, %v209_v30, %v205_v27  ;;  %v3272_v18 = vld [vmem:[%s4307_s4 + $0x1] ss:$0 sm:$0xff] }
  0xb2   :  { %v230_v52 = vmul.f32 %v2652_v44, %v229_v49  ;;  %2659 = vtanh.f32 %v176_v34  ;;  %vm4313_vm6 = vcmask 1043459  }
  0xb3   :  { %2661 = vtanh.f32 %v173_v17  ;;  %v225_v17 = vsel %vm222_vm10, %v224_v3, %v220_v62  ;;  %vm4311_vm10 = vcmask 523264  }
  0xb4   :  { %v231_v56 = vadd.f32 %v2652_v44, %v230_v52  ;;  %v275_v29 = vrot.slane %v225_v17, 7 }
  0xb5   :  { %v2654_v58 = vpop.eup %2653 }
  0xb6   :  { %v243_v0 = vmul.f32 %v2654_v58, %v3159_v45  ;;  %v235_v7 = vsel %vm3171_vm9, %v2652_v44, %v231_v56  ;;  %v2656_v8 = vpop.eup %2655  ;;  %vm248_vm13 = vweird.f32 %v2654_v58  ;;  %v276_v41 = vsel %vm4314_vm7, %v275_v29, %v210_v37  ;;  %v3222_v56 = vld [vmem:[#allocation3 + $0x28] sm:$0xff] }
  0xb7   :  { %v2658_v14 = vpop.eup %2657  ;;  %v240_v19 = vsel %vm237_vm12, %v239_v10, %v235_v7  ;;  %v261_v25 = vrot.slane %v2656_v8, 7  ;;  %vm249_vm3 = vmor %vm247_vm2, %vm248_vm13  ;;  %319 = vmatpush.msra.mxu2 %v3222_v56  ;;  %612 = vmatpush.msra.mxu1 %v3222_v56  ;;  %vm4312_vm9 = vcmask 261120  }
  0xb8   :  { %v244_v13 = vsub.f32 1.0, %v243_v0  ;;  %v2660_v22 = vpop.eup %2659  ;;  %v264_v34 = vrot.slane %v2658_v14, 6  ;;  %v277_v31 = vrot.slane %v240_v19, 6  ;;  %909 = vmatpush.msrb.mxu0 %v3222_v56 }
  0xb9   :  { %v2662_v26 = vpop.eup %2661  ;;  %v267_v36 = vrot.slane %v2660_v22, 5  ;;  %320 = vmatpush.msra.mxu2 %v3227_v57  ;;  %613 = vmatpush.msra.mxu1 %v3227_v57 }
  0xba   :  { %v245_v20 = vmul.f32 %v2654_v58, %v244_v13  ;;  %v263_v40 = vsel %vm4314_vm7, %v261_v25, %v2662_v26  ;;  %v278_v44 = vsel %vm265_vm1, %v277_v31, %v276_v41  ;;  %910 = vmatpush.msrb.mxu0 %v3227_v57 }
  0xbb   :  { %v266_v43 = vsel %vm265_vm1, %v264_v34, %v263_v40 }
  0xbc   :  { %v246_v28 = vadd.f32 %v2654_v58, %v245_v20  ;;  %v269_v45 = vsel %vm4313_vm6, %v267_v36, %v266_v43 }
  0xbe   :  { %v250_v35 = vsel %vm249_vm3, %v2654_v58, %v246_v28  ;;  %v3232_v58 = vld [vmem:[#allocation3 + $0x18] sm:$0xff] }
  0xbf   :  { %v255_v38 = vsel %vm252_vm5, %v254_v33, %v250_v35  ;;  %321 = vmatpush.msra.mxu2 %v3232_v58  ;;  %614 = vmatpush.msra.mxu1 %v3232_v58 }
  0xc0   :  { %v279_v42 = vrot.slane %v255_v38, 5  ;;  %911 = vmatpush.msrb.mxu0 %v3232_v58 }
  0xc1   :  { %322 = vmatpush.msra.mxu2 %v3237_v59  ;;  %615 = vmatpush.msra.mxu1 %v3237_v59 }
  0xc2   :  { %v280_v46 = vsel %vm4313_vm6, %v279_v42, %v278_v44  ;;  %912 = vmatpush.msrb.mxu0 %v3237_v59 }
  0xc3   :  { %v282_v47 = vsel %vm3198_vm8, %v269_v45, %v280_v46  ;;  %323 = vmatpush.msra.mxu2 %v3242_v60  ;;  %616 = vmatpush.msra.mxu1 %v3242_v60 }
  0xc4   :  { %285 = vrot.lane.b32.xlu0 %v282_v47, %s3035_s0  ;;  %v283_v50 = vmul.f32 0.0, %v282_v47  ;;  %913 = vmatpush.msrb.mxu0 %v3242_v60 }
  0xc5   :  { %324 = vmatpush.msra.mxu2 %v3252_v63  ;;  %617 = vmatpush.msra.mxu1 %v3252_v63 }
  0xc6   :  { %914 = vmatpush.msrb.mxu0 %v3252_v63 }
 0x136   :  { %v286_v48 = vpop.permute.xlu0 %285 }
 0x137   :  { %v288_v49 = vmul.f32 %v286_v48, %v282_v47 }
 0x139   :  { %290 = vrot.lane.b32.xlu0 %v288_v49, %s3036_s27 }
 0x1ab   :  { %v291_v51 = vpop.permute.xlu0 %290 }
 0x1ac   :  { %v3212_v52 = vadd.f32 %v291_v51, %v283_v50 }
 0x1ae   :  { %2663 = vtanh.f32 %v3212_v52 }
 0x1b4   :  { %v2664_v53 = vpop.eup %2663 }
 0x1b5   :  { %296 = vrot.lane.b32.xlu1 %v2664_v53, %s3035_s0 }
 0x227   :  { %v297_v61 = vpop.permute.xlu1 %296 }
 0x228   :  { %v299_v62 = vmul.f32 %v297_v61, %v282_v47 }
 0x22a   :  { %301 = vrot.lane.b32.xlu1 %v299_v62, %s3036_s27 }
 0x29c   :  { %v302_v0 = vpop.permute.xlu1 %301 }
 0x29d   :  { %2564 = vmatmul.msk.f32.vlgmr.msrb.gmra.mxu1 %vm4312_vm9, %v302_v0  ;;  %v304_v1 = vsel %vm4312_vm9, %v302_v0, 0.0 }
 0x29e   :  { %2560 = vmatmul.msk.f32.vlgmr.msra.gmra.mxu2 %vm4311_vm10, %v304_v1  ;;  %1041 = vmatpush.msrb.mxu1 %v3090_v2 }
 0x2a0   :  { %1042 = vmatpush.msrb.mxu1 %v3099_v4 }
 0x2a2   :  { %1043 = vmatpush.msrb.mxu1 %v3105_v5 }
 0x2a4   :  { %1044 = vmatpush.msrb.mxu1 %v3111_v6 }
 0x31a   :  { %v452_v3 = vpop.f32.mrf.mxu1 }
 0x31b   :  { %v456_v7 = vrot.slane %v452_v3, 7  ;;  %v457_v8 = vrot.slane %v452_v3, 1  ;;  %v458_v9 = vrot.slane %v452_v3, 2  ;;  %v464_v10 = vadd.f32 %v452_v3, %v3139_v16 }
 0x31d   :  { %v463_v13 = vadd.f32 %v456_v7, %v3131_v11  ;;  %v465_v14 = vadd.f32 %v457_v8, %v3144_v23  ;;  %v466_v15 = vadd.f32 %v458_v9, %v3150_v32  ;;  %v468_v17 = vadd.f32 %v3136_v12, %v464_v10 }
 0x31f   :  { %v467_v19 = vadd.f32 %v3136_v12, %v463_v13  ;;  %v469_v20 = vadd.f32 %v3136_v12, %v465_v14  ;;  %v470_v21 = vadd.f32 %v3136_v12, %v466_v15  ;;  %v2566_v24 = vmul.f32 -1.442695, %v468_v17 }
 0x321   :  { %v2565_v22 = vmul.f32 -1.442695, %v467_v19  ;;  %v326_v25 = vpop.f32.mrf.mxu2  ;;  %v2567_v26 = vmul.f32 -1.442695, %v469_v20  ;;  %v2568_v28 = vmul.f32 -1.442695, %v470_v21 }
 0x322   :  { %v327_v27 = vadd.f32 %v3272_v18, %v326_v25 }
 0x323   :  { %2665 = vpow2.f32 %v2565_v22 }
 0x324   :  { %2667 = vpow2.f32 %v2566_v24  ;;  %v2561_v29 = vmul.f32 -1.442695, %v327_v27 }
 0x325   :  { %2669 = vpow2.f32 %v2567_v26 }
 0x326   :  { %2671 = vpow2.f32 %v2568_v28 }
 0x327   :  { %2673 = vpow2.f32 %v2561_v29 }
 0x328   :  { %2675 = vtanh.f32 %v467_v19 }
 0x329   :  { %v2666_v30 = vpop.eup %2665  ;;  %2677 = vtanh.f32 %v468_v17 }
 0x32a   :  { %v2668_v33 = vpop.eup %2667  ;;  %v487_v34 = vadd.f32 1.0, %v2666_v30  ;;  %2679 = vtanh.f32 %v469_v20 }
 0x32b   :  { %v2670_v31 = vpop.eup %2669  ;;  %v3278_v35 = vadd.f32 1.0, %v2668_v33 }
 0x32c   :  { %v2672_v36 = vpop.eup %2671  ;;  %v3280_v37 = vadd.f32 1.0, %v2670_v31  ;;  %2681 = vrcp.f32 %v487_v34  ;;  %v500_v43 = vand.u32 2147483647, %v487_v34  ;;  %v502_v45 = vand.u32 2147483648, %v487_v34 }
 0x32d   :  { %v3282_v38 = vadd.f32 1.0, %v2672_v36  ;;  %2683 = vrcp.f32 %v3278_v35  ;;  %v2674_v40 = vpop.eup %2673  ;;  %vm496_vm11 = vweird.f32 %v487_v34  ;;  %vm511_vm13 = vweird.f32 %v3278_v35 }
 0x32e   :  { %2685 = vrcp.f32 %v3280_v37  ;;  %v3286_v41 = vpop.eup %2675  ;;  %v3289_v42 = vadd.f32 1.0, %v2674_v40  ;;  %vm3299_vm12 = vcmp.eq.f32.partialorder %v500_v43, 8.507059e+37  ;;  %v530_v53 = vand.u32 2147483647, %v3280_v37 }
 0x32f   :  { %2687 = vrcp.f32 %v3282_v38  ;;  %v3291_v44 = vpop.eup %2677  ;;  %v555_v48 = vrot.slane %v3286_v41, 1  ;;  %v503_v62 = vor.u32 1.1754944e-38, %v502_v45  ;;  %v515_v1 = vand.u32 2147483647, %v3278_v35 }
 0x330   :  { %2689 = vtanh.f32 %v470_v21  ;;  %v3293_v46 = vpop.eup %2679  ;;  %v517_v3 = vand.u32 2147483648, %v3278_v35  ;;  %vm526_vm14 = vweird.f32 %v3280_v37  ;;  %v532_v10 = vand.u32 2147483648, %v3280_v37 }
 0x331   :  { %2691 = vrcp.f32 %v3289_v42  ;;  %v343_v14 = vand.u32 2147483647, %v3289_v42  ;;  %v345_v15 = vand.u32 2147483648, %v3289_v42  ;;  %vm3320_vm0 = vcmp.eq.f32.partialorder %v530_v53, 8.507059e+37 }
 0x332   :  { %v2682_v47 = vpop.eup %2681  ;;  %2693 = vtanh.f32 %v327_v27  ;;  %v533_v33 = vor.u32 1.1754944e-38, %v532_v10  ;;  %vm541_vm5 = vweird.f32 %v3282_v38  ;;  %v547_v53 = vand.u32 2147483648, %v3282_v38 }
 0x333   :  { %v3297_v49 = vpop.eup %2683  ;;  %v492_v50 = vmul.f32 %v2682_v47, %v487_v34  ;;  %vm497_vm15 = vweird.f32 %v2682_v47 }
 0x334   :  { %v2686_v61 = vpop.eup %2685  ;;  %v507_v0 = vmul.f32 %v3297_v49, %v3278_v35  ;;  %vm512_vm2 = vweird.f32 %v3297_v49  ;;  %vm498_vm4 = vmor %vm496_vm11, %vm497_vm15 }
 0x335   :  { %v3309_v7 = vpop.eup %2687  ;;  %v493_v8 = vsub.f32 1.0, %v492_v50  ;;  %v522_v9 = vmul.f32 %v2686_v61, %v3280_v37  ;;  %vm527_vm3 = vweird.f32 %v2686_v61  ;;  %vm3333_vm10 = vmor %vm511_vm13, %vm512_vm2  ;;  %vm339_vm13 = vweird.f32 %v3289_v42 }
 0x336   :  { %v3314_v13 = vpop.eup %2689  ;;  %v508_v17 = vsub.f32 1.0, %v507_v0  ;;  %v537_v19 = vmul.f32 %v3309_v7, %v3282_v38  ;;  %vm542_vm9 = vweird.f32 %v3309_v7  ;;  %vm528_vm15 = vmor %vm526_vm14, %vm527_vm3  ;;  %vm344_vm2 = vcmp.eq.f32.partialorder %v343_v14, 8.507059e+37 }
 0x337   :  { %v2692_v20 = vpop.eup %2691  ;;  %v494_v21 = vmul.f32 %v2682_v47, %v493_v8  ;;  %v523_v22 = vsub.f32 1.0, %v522_v9  ;;  %v545_v9 = vand.u32 2147483647, %v3282_v38  ;;  %v346_v37 = vor.u32 1.1754944e-38, %v345_v15 }
 0x338   :  { %v2694_v25 = vpop.eup %2693  ;;  %v335_v26 = vmul.f32 %v2692_v20, %v3289_v42  ;;  %v509_v27 = vmul.f32 %v3297_v49, %v508_v17  ;;  %v538_v28 = vsub.f32 1.0, %v537_v19  ;;  %vm340_vm11 = vweird.f32 %v2692_v20 }
 0x339   :  { %v495_v29 = vadd.f32 %v2682_v47, %v494_v21  ;;  %v524_v30 = vmul.f32 %v2686_v61, %v523_v22  ;;  %v518_v19 = vor.u32 1.1754944e-38, %v517_v3  ;;  %vm341_vm14 = vmor %vm339_vm13, %vm340_vm11  ;;  %v548_v21 = vor.u32 1.1754944e-38, %v547_v53  ;;  %v3387_v53 = vld [vmem:[#allocation3 + $0x78] sm:$0xff] }
 0x33a   :  { %v336_v31 = vsub.f32 1.0, %v335_v26  ;;  %v510_v36 = vadd.f32 %v3297_v49, %v509_v27  ;;  %v539_v40 = vmul.f32 %v3309_v7, %v538_v28  ;;  %vm546_vm3 = vcmp.eq.f32.partialorder %v545_v9, 8.507059e+37  ;;  %383 = vmatpush.msra.mxu3 %v3387_v53  ;;  %680 = vmatpush.msrb.mxu2 %v3387_v53 }
 0x33b   :  { %v499_v43 = vsel %vm498_vm4, %v2682_v47, %v495_v29  ;;  %v525_v50 = vadd.f32 %v2686_v61, %v524_v30  ;;  %v557_v38 = vrot.slane %v3293_v46, 7  ;;  %1274 = vmatpush.msra.mxu0 %v3387_v53 }
 0x33c   :  { %v337_v34 = vmul.f32 %v2692_v20, %v336_v31  ;;  %v504_v0 = vsel %vm3299_vm12, %v503_v62, %v499_v43  ;;  %v540_v35 = vadd.f32 %v3309_v7, %v539_v40  ;;  %v514_v47 = vsel %vm3333_vm10, %v3297_v49, %v510_v36  ;;  %vm543_vm12 = vmor %vm541_vm5, %vm542_vm9 }
 0x33d   :  { %v529_v8 = vsel %vm528_vm15, %v2686_v61, %v525_v50  ;;  %v566_v10 = vrot.slane %v504_v0, 1  ;;  %vm516_vm10 = vcmp.eq.f32.partialorder %v515_v1, 8.507059e+37  ;;  %v556_v1 = vsel %vm4314_vm7, %v3291_v44, %v555_v48  ;;  %v3398_v0 = vld [vmem:[#allocation3 + $0x60] sm:$0xff] }
 0x33e   :  { %v338_v17 = vadd.f32 %v2692_v20, %v337_v34  ;;  %v534_v51 = vsel %vm3320_vm0, %v533_v33, %v529_v8  ;;  %v544_v49 = vsel %vm543_vm12, %v3309_v7, %v540_v35  ;;  %v519_v62 = vsel %vm516_vm10, %v518_v19, %v514_v47  ;;  %v3393_v34 = vld [vmem:[#allocation3 + $0x68] sm:$0xff]  ;;  %v3403_v35 = vld [vmem:[#allocation3 + $0x58] sm:$0xff]  ;;  %v3408_v47 = vld [vmem:[#allocation3 + $0x50] sm:$0xff] }
 0x33f   :  { %v568_v22 = vrot.slane %v534_v51, 7  ;;  %v567_v3 = vsel %vm4314_vm7, %v519_v62, %v566_v10  ;;  %v549_v26 = vsel %vm546_vm3, %v548_v21, %v544_v49  ;;  %v558_v15 = vsel %vm265_vm1, %v557_v38, %v556_v1  ;;  %v3413_v8 = vld [vmem:[#allocation3 + $0x48] sm:$0xff] }
 0x340   :  { %v342_v61 = vsel %vm341_vm14, %v2692_v20, %v338_v17  ;;  %v570_v14 = vrot.slane %v549_v26, 6  ;;  %v559_v20 = vrot.slane %v3314_v13, 6  ;;  %v3423_v17 = vld [vmem:[#allocation3 + $0x40] sm:$0xff]  ;;  %vm4329_vm9 = vcmask 261120  }
 0x341   :  { %v347_v42 = vsel %vm344_vm2, %v346_v37, %v342_v61  ;;  %v569_v7 = vsel %vm265_vm1, %v568_v22, %v567_v3  ;;  %vm4330_vm0 = vcmask 523264   ;;  %vm4331_vm4 = vmmov %vm4329_vm9 }
 0x342   :  { %v349_v24 = vsel %vm3198_vm8, %v2694_v25, %v347_v42  ;;  %v571_v27 = vsel %vm4313_vm6, %v570_v14, %v569_v7  ;;  %v560_v25 = vsel %vm4313_vm6, %v559_v20, %v558_v15  ;;  %vm4332_vm5 = vmmov %vm4330_vm0 }
 0x343   :  { %352 = vrot.lane.b32.xlu2 %v349_v24, %s3035_s0  ;;  %v573_v46 = vsel %vm3198_vm8, %v560_v25, %v571_v27  ;;  %v350_v29 = vmul.f32 0.0, %v349_v24  ;;  %vm4333_vm11 = vmmov %vm4331_vm4 }
 0x344   :  { %v574_v33 = vmul.f32 %v573_v46, %v3212_v52  ;;  %v3389_v52 = vld [vmem:[#allocation3 + $0x70] sm:$0xff] }
 0x345   :  { %384 = vmatpush.msra.mxu3 %v3389_v52  ;;  %681 = vmatpush.msrb.mxu2 %v3389_v52 }
 0x346   :  { %1275 = vmatpush.msra.mxu0 %v3389_v52 }
 0x347   :  { %385 = vmatpush.msra.mxu3 %v3393_v34  ;;  %682 = vmatpush.msrb.mxu2 %v3393_v34 }
 0x348   :  { %1276 = vmatpush.msra.mxu0 %v3393_v34 }
 0x349   :  { %386 = vmatpush.msra.mxu3 %v3398_v0  ;;  %683 = vmatpush.msrb.mxu2 %v3398_v0 }
 0x34a   :  { %1277 = vmatpush.msra.mxu0 %v3398_v0 }
 0x34b   :  { %576 = vrot.lane.b32.xlu2 %v573_v46, %s3035_s0  ;;  %387 = vmatpush.msra.mxu3 %v3403_v35 }
 0x34c   :  { %684 = vmatpush.msrb.mxu2 %v3403_v35  ;;  %1278 = vmatpush.msra.mxu0 %v3403_v35 }
 0x34d   :  { %388 = vmatpush.msra.mxu3 %v3408_v47 }
 0x34e   :  { %685 = vmatpush.msrb.mxu2 %v3408_v47  ;;  %1279 = vmatpush.msra.mxu0 %v3408_v47 }
 0x34f   :  { %389 = vmatpush.msra.mxu3 %v3413_v8 }
 0x350   :  { %686 = vmatpush.msrb.mxu2 %v3413_v8  ;;  %1280 = vmatpush.msra.mxu0 %v3413_v8 }
 0x351   :  { %390 = vmatpush.msra.mxu3 %v3423_v17 }
 0x352   :  { %687 = vmatpush.msrb.mxu2 %v3423_v17  ;;  %1281 = vmatpush.msra.mxu0 %v3423_v17 }
 0x353   :  { %744 = vmatpush.msrb.mxu3 %v3090_v2 }
 0x354   :  { %1204 = vmatpush.msra.mxu2 %v3216_v54 }
 0x355   :  { %745 = vmatpush.msrb.mxu3 %v3099_v4 }
 0x356   :  { %1205 = vmatpush.msra.mxu2 %v3218_v55 }
 0x357   :  { %746 = vmatpush.msrb.mxu3 %v3105_v5 }
 0x358   :  { %1206 = vmatpush.msra.mxu2 %v3222_v56 }
 0x359   :  { %747 = vmatpush.msrb.mxu3 %v3111_v6 }
 0x35a   :  { %1207 = vmatpush.msra.mxu2 %v3227_v57 }
 0x35c   :  { %1208 = vmatpush.msra.mxu2 %v3232_v58 }
 0x35e   :  { %1209 = vmatpush.msra.mxu2 %v3237_v59 }
 0x360   :  { %1210 = vmatpush.msra.mxu2 %v3242_v60 }
 0x362   :  { %1211 = vmatpush.msra.mxu2 %v3252_v63 }
 0x39d   :  { %v353_v41 = vpop.permute.xlu2 %352 }
 0x39e   :  { %v355_v28 = vmul.f32 %v353_v41, %v349_v24 }
 0x3a0   :  { %357 = vrot.lane.b32.xlu0 %v355_v28, %s3036_s27 }
 0x3a5   :  { %v577_v44 = vpop.permute.xlu2 %576 }
 0x3a6   :  { %v579_v48 = vmul.f32 %v577_v44, %v573_v46 }
 0x3a8   :  { %581 = vrot.lane.b32.xlu1 %v579_v48, %s3036_s27 }
 0x412   :  { %v358_v30 = vpop.permute.xlu0 %357 }
 0x413   :  { %v3376_v13 = vadd.f32 %v358_v30, %v350_v29 }
 0x415   :  { %2695 = vtanh.f32 %v3376_v13 }
 0x41a   :  { %v582_v31 = vpop.permute.xlu1 %581 }
 0x41b   :  { %v2696_v36 = vpop.eup %2695  ;;  %v3380_v40 = vadd.f32 %v582_v31, %v574_v33 }
 0x41c   :  { %363 = vrot.lane.b32.xlu2 %v2696_v36, %s3035_s0 }
 0x41d   :  { %2697 = vtanh.f32 %v3380_v40 }
 0x423   :  { %v2698_v43 = vpop.eup %2697 }
 0x424   :  { %587 = vrot.lane.b32.xlu0 %v2698_v43, %s3035_s0 }
 0x476   :  { %v364_v45 = vpop.permute.xlu2 %363 }
 0x477   :  { %v366_v50 = vmul.f32 %v364_v45, %v349_v24 }
 0x479   :  { %595 = vrot.lane.b32.xlu0 %v366_v50, %s3035_s0  ;;  %368 = vrot.lane.b32.xlu1 %v366_v50, %s3036_s27 }
 0x496   :  { %v588_v9 = vpop.permute.xlu0 %587 }
 0x497   :  { %v590_v10 = vmul.f32 %v588_v9, %v573_v46 }
 0x499   :  { %592 = vrot.lane.b32.xlu2 %v590_v10, %s3036_s27 }
 0x4eb   :  { %v369_v19 = vpop.permute.xlu1 %368  ;;  %v596_v37 = vpop.permute.xlu0 %595 }
 0x4ec   :  { %v371_v51 = vsel %vm4329_vm9, %v369_v19, 0.0 }
 0x4ed   :  { %2562 = vmatmul.msk.f32.vlgmr.msra.gmra.mxu3 %vm4330_vm0, %v371_v51 }
 0x4ee   :  { %977 = vmatpush.msra.mxu3 %v3387_v53 }
 0x4f0   :  { %978 = vmatpush.msra.mxu3 %v3389_v52 }
 0x4f2   :  { %979 = vmatpush.msra.mxu3 %v3393_v34 }
 0x4f3   :  { %v593_v49 = vpop.permute.xlu2 %592 }
 0x4f4   :  { %v598_v61 = vsel %vm4331_vm4, %v593_v49, %v596_v37  ;;  %980 = vmatpush.msra.mxu3 %v3398_v0 }
 0x4f5   :  { %2569 = vmatmul.msk.f32.vlgmr.msra.gmra.mxu1 %vm4332_vm5, %v598_v61  ;;  %2573 = vmatmul.msk.f32.vlgmr.msrb.gmra.mxu3 %vm4333_vm11, %v593_v49 }
 0x4f6   :  { %1338 = vmatpush.msra.mxu1 %v3090_v2  ;;  %981 = vmatpush.msra.mxu3 %v3403_v35  ;;  %v3468_v2 = vld [vmem:[%s4307_s4 + $0x2] ss:$0 sm:$0xff] }
 0x4f8   :  { %1339 = vmatpush.msra.mxu1 %v3099_v4  ;;  %982 = vmatpush.msra.mxu3 %v3408_v47 }
 0x4fa   :  { %1340 = vmatpush.msra.mxu1 %v3105_v5  ;;  %983 = vmatpush.msra.mxu3 %v3413_v8 }
 0x4fc   :  { %1341 = vmatpush.msra.mxu1 %v3111_v6  ;;  %984 = vmatpush.msra.mxu3 %v3423_v17 }
 0x4fe   :  { %1504 = vmatpush.msrb.mxu3 %v3216_v54 }
 0x500   :  { %1505 = vmatpush.msrb.mxu3 %v3218_v55 }
 0x502   :  { %1506 = vmatpush.msrb.mxu3 %v3222_v56 }
 0x504   :  { %1507 = vmatpush.msrb.mxu3 %v3227_v57 }
 0x506   :  { %1508 = vmatpush.msrb.mxu3 %v3232_v58 }
 0x508   :  { %1509 = vmatpush.msrb.mxu3 %v3237_v59 }
 0x50a   :  { %1510 = vmatpush.msrb.mxu3 %v3242_v60 }
 0x50c   :  { %1511 = vmatpush.msrb.mxu3 %v3252_v63 }
 0x570   :  { %v392_v4 = vpop.f32.mrf.mxu3 }
 0x571   :  { %v3471_v5 = vadd.f32 %v3468_v2, %v392_v4 }
 0x572   :  { %v619_v6 = vpop.f32.mrf.mxu1 }
 0x573   :  { %v2563_v62 = vmul.f32 -1.442695, %v3471_v5  ;;  %v620_v21 = vadd.f32 %v3272_v18, %v619_v6 }
 0x575   :  { %2699 = vpow2.f32 %v2563_v62  ;;  %v2570_v22 = vmul.f32 -1.442695, %v620_v21 }
 0x577   :  { %2701 = vpow2.f32 %v2570_v22 }
 0x578   :  { %v749_v42 = vpop.f32.mrf.mxu3 }
 0x579   :  { %v753_v3 = vrot.slane %v749_v42, 6  ;;  %v754_v24 = vrot.slane %v749_v42, 7  ;;  %v755_v26 = vrot.slane %v749_v42, 1  ;;  %v762_v38 = vadd.f32 %v749_v42, %v3144_v23 }
 0x57b   :  { %v2700_v1 = vpop.eup %2699  ;;  %v760_v7 = vadd.f32 %v753_v3, %v3131_v11  ;;  %v761_v14 = vadd.f32 %v754_v24, %v3139_v16  ;;  %v763_v15 = vadd.f32 %v755_v26, %v3150_v32  ;;  %v766_v41 = vadd.f32 %v3136_v12, %v762_v38 }
 0x57c   :  { %v3479_v27 = vadd.f32 1.0, %v2700_v1 }
 0x57d   :  { %v2702_v20 = vpop.eup %2701  ;;  %v764_v25 = vadd.f32 %v3136_v12, %v760_v7  ;;  %v765_v46 = vadd.f32 %v3136_v12, %v761_v14  ;;  %v767_v44 = vadd.f32 %v3136_v12, %v763_v15  ;;  %v2576_v30 = vmul.f32 -1.442695, %v766_v41 }
 0x57e   :  { %v626_v28 = vadd.f32 1.0, %v2702_v20 }
 0x57f   :  { %v2574_v48 = vmul.f32 -1.442695, %v764_v25  ;;  %v2575_v29 = vmul.f32 -1.442695, %v765_v46  ;;  %v2577_v33 = vmul.f32 -1.442695, %v767_v44 }
 0x580   :  { %2703 = vrcp.f32 %v626_v28  ;;  %v636_v19 = vand.u32 2147483647, %v626_v28  ;;  %v638_v51 = vand.u32 2147483648, %v626_v28  ;;  %vm632_vm13 = vweird.f32 %v626_v28 }
 0x581   :  { %2705 = vrcp.f32 %v3479_v27 }
 0x582   :  { %2707 = vtanh.f32 %v764_v25  ;;  %v639_v3 = vor.u32 1.1754944e-38, %v638_v51  ;;  %vm637_vm14 = vcmp.eq.f32.partialorder %v636_v19, 8.507059e+37 }
 0x583   :  { %2709 = vpow2.f32 %v2574_v48 }
 0x584   :  { %2711 = vpow2.f32 %v2575_v29 }
 0x585   :  { %2713 = vpow2.f32 %v2576_v30 }
 0x586   :  { %v2704_v31 = vpop.eup %2703  ;;  %2715 = vpow2.f32 %v2577_v33 }
 0x587   :  { %v3486_v36 = vpop.eup %2705  ;;  %2717 = vtanh.f32 %v765_v46  ;;  %v628_v43 = vmul.f32 %v2704_v31, %v626_v28  ;;  %vm633_vm15 = vweird.f32 %v2704_v31 }
 0x588   :  { %v2708_v45 = vpop.eup %2707  ;;  %2719 = vtanh.f32 %v620_v21  ;;  %v401_v4 = vmul.f32 %v3486_v36, %v3479_v27  ;;  %vm634_vm12 = vmor %vm632_vm13, %vm633_vm15 }
 0x589   :  { %v2710_v50 = vpop.eup %2709  ;;  %v629_v12 = vsub.f32 1.0, %v628_v43  ;;  %v852_v1 = vrot.slane %v2708_v45, 2 }
 0x58a   :  { %v2712_v9 = vpop.eup %2711  ;;  %v3488_v10 = vadd.f32 1.0, %v2710_v50  ;;  %v402_v26 = vsub.f32 1.0, %v401_v4 }
 0x58b   :  { %v2714_v37 = vpop.eup %2713  ;;  %v3490_v49 = vadd.f32 1.0, %v2712_v9  ;;  %v630_v61 = vmul.f32 %v2704_v31, %v629_v12 }
 0x58c   :  { %v2716_v6 = vpop.eup %2715  ;;  %v3494_v62 = vadd.f32 1.0, %v2714_v37  ;;  %2721 = vrcp.f32 %v3488_v10  ;;  %v797_v15 = vand.u32 2147483647, %v3488_v10  ;;  %v799_v25 = vand.u32 2147483648, %v3488_v10 }
 0x58d   :  { %v2718_v22 = vpop.eup %2717  ;;  %v3497_v42 = vadd.f32 1.0, %v2716_v6  ;;  %2723 = vrcp.f32 %v3490_v49  ;;  %v631_v21 = vadd.f32 %v2704_v31, %v630_v61  ;;  %v812_v28 = vand.u32 2147483647, %v3490_v49 }
 0x58e   :  { %2725 = vrcp.f32 %v3494_v62  ;;  %v2720_v38 = vpop.eup %2719  ;;  %v853_v7 = vrot.slane %v2718_v22, 1  ;;  %v403_v30 = vmul.f32 %v3486_v36, %v402_v26  ;;  %vm793_vm2 = vweird.f32 %v3488_v10 }
 0x58f   :  { %2727 = vrcp.f32 %v3497_v42  ;;  %v635_v24 = vsel %vm634_vm12, %v2704_v31, %v631_v21  ;;  %vm3514_vm10 = vcmp.eq.f32.partialorder %v797_v15, 8.507059e+37  ;;  %v800_v12 = vor.u32 1.1754944e-38, %v799_v25 }
 0x590   :  { %v640_v14 = vsel %vm637_vm14, %v639_v3, %v635_v24  ;;  %2729 = vtanh.f32 %v766_v41  ;;  %v854_v43 = vsel %vm4314_vm7, %v853_v7, %v852_v1  ;;  %vm808_vm3 = vweird.f32 %v3490_v49 }
 0x591   :  { %v3505_v20 = vsel %vm3198_vm8, %v2720_v38, %v640_v14  ;;  %2731 = vtanh.f32 %v767_v44  ;;  %vm3522_vm9 = vcmp.eq.f32.partialorder %v812_v28, 8.507059e+37  ;;  %v814_v51 = vand.u32 2147483648, %v3490_v49 }
 0x592   :  { %v2722_v46 = vpop.eup %2721  ;;  %645 = vrot.lane.b32.xlu2 %v3505_v20, %s3035_s0  ;;  %vm823_vm4 = vweird.f32 %v3494_v62  ;;  %v829_v21 = vand.u32 2147483648, %v3494_v62  ;;  %v844_v1 = vand.u32 2147483648, %v3497_v42  ;;  %v842_v15 = vand.u32 2147483647, %v3497_v42 }
 0x593   :  { %v2724_v48 = vpop.eup %2723  ;;  %v789_v29 = vmul.f32 %v2722_v46, %v3488_v10  ;;  %vm794_vm0 = vweird.f32 %v2722_v46  ;;  %v815_v28 = vor.u32 1.1754944e-38, %v814_v51  ;;  %2733 = vtanh.f32 %v3471_v5 }
 0x594   :  { %v2726_v33 = vpop.eup %2725  ;;  %v804_v41 = vmul.f32 %v2724_v48, %v3490_v49  ;;  %vm809_vm5 = vweird.f32 %v2724_v48  ;;  %vm795_vm15 = vmor %vm793_vm2, %vm794_vm0  ;;  %vm838_vm2 = vweird.f32 %v3497_v42  ;;  %v845_v51 = vor.u32 1.1754944e-38, %v844_v1 }
 0x595   :  { %v2728_v45 = vpop.eup %2727  ;;  %v790_v50 = vsub.f32 1.0, %v789_v29  ;;  %v819_v44 = vmul.f32 %v2726_v33, %v3494_v62  ;;  %vm824_vm11 = vweird.f32 %v2726_v33  ;;  %vm810_vm12 = vmor %vm808_vm3, %vm809_vm5 }
 0x596   :  { %v805_v9 = vsub.f32 1.0, %v804_v41  ;;  %v834_v37 = vmul.f32 %v2728_v45, %v3497_v42  ;;  %v2730_v6 = vpop.eup %2729  ;;  %vm839_vm13 = vweird.f32 %v2728_v45  ;;  %v827_v41 = vand.u32 2147483647, %v3494_v62  ;;  %vm3541_vm14 = vmor %vm823_vm4, %vm824_vm11 }
 0x597   :  { %v791_v61 = vmul.f32 %v2722_v46, %v790_v50  ;;  %v820_v4 = vsub.f32 1.0, %v819_v44  ;;  %v2732_v24 = vpop.eup %2731  ;;  %vm840_vm3 = vmor %vm838_vm2, %vm839_vm13  ;;  %vm405_vm4 = vweird.f32 %v3479_v27 }
 0x598   :  { %v806_v22 = vmul.f32 %v2724_v48, %v805_v9  ;;  %v835_v3 = vsub.f32 1.0, %v834_v37  ;;  %vm828_vm0 = vcmp.eq.f32.partialorder %v827_v41, 8.507059e+37 }
 0x599   :  { %v792_v26 = vadd.f32 %v2722_v46, %v791_v61  ;;  %v821_v38 = vmul.f32 %v2726_v33, %v820_v4  ;;  %v855_v61 = vsel %vm265_vm1, %v2730_v6, %v854_v43  ;;  %v409_v6 = vand.u32 2147483647, %v3479_v27  ;;  %v2734_v1 = vpop.eup %2733 }
 0x59a   :  { %v807_v7 = vadd.f32 %v2724_v48, %v806_v22  ;;  %v836_v14 = vmul.f32 %v2728_v45, %v835_v3  ;;  %v856_v22 = vrot.slane %v2732_v24, 7 }
 0x59b   :  { %v796_v25 = vsel %vm795_vm15, %v2722_v46, %v792_v26  ;;  %v822_v29 = vadd.f32 %v2726_v33, %v821_v38  ;;  %v411_v26 = vand.u32 2147483648, %v3479_v27  ;;  %vm410_vm11 = vcmp.eq.f32.partialorder %v409_v6, 8.507059e+37 }
 0x59c   :  { %v801_v50 = vsel %vm3514_vm10, %v800_v12, %v796_v25  ;;  %v811_v44 = vsel %vm810_vm12, %v2724_v48, %v807_v7  ;;  %v837_v9 = vadd.f32 %v2728_v45, %v836_v14  ;;  %v830_v12 = vor.u32 1.1754944e-38, %v829_v21 }
 0x59d   :  { %v816_v49 = vsel %vm3522_vm9, %v815_v28, %v811_v44  ;;  %v826_v46 = vsel %vm3541_vm14, %v2726_v33, %v822_v29  ;;  %v863_v31 = vrot.slane %v801_v50, 2  ;;  %vm843_vm10 = vcmp.eq.f32.partialorder %v842_v15, 8.507059e+37 }
 0x59e   :  { %v841_v48 = vsel %vm840_vm3, %v2728_v45, %v837_v9  ;;  %v864_v62 = vrot.slane %v816_v49, 1  ;;  %v831_v4 = vsel %vm828_vm0, %v830_v12, %v826_v46  ;;  %v404_v33 = vadd.f32 %v3486_v36, %v403_v30 }
 0x59f   :  { %v846_v37 = vsel %vm843_vm10, %v845_v51, %v841_v48  ;;  %vm406_vm9 = vweird.f32 %v3486_v36  ;;  %v857_v21 = vsel %vm4313_vm6, %v856_v22, %v855_v61  ;;  %v412_v24 = vor.u32 1.1754944e-38, %v411_v26 }
 0x5a0   :  { %v865_v42 = vsel %vm4314_vm7, %v864_v62, %v863_v31  ;;  %v867_v19 = vrot.slane %v846_v37, 7  ;;  %vm407_vm5 = vmor %vm405_vm4, %vm406_vm9  ;;  %v643_v28 = vmul.f32 %v3505_v20, %v3376_v13  ;;  %vm4340_vm15 = vcmask 261120  }
 0x5a1   :  { %v866_v3 = vsel %vm265_vm1, %v831_v4, %v865_v42  ;;  %v408_v30 = vsel %vm407_vm5, %v3486_v36, %v404_v33  ;;  %vm4341_vm13 = vmmov %vm4340_vm15  ;;  %vm4342_vm12 = vcmask 523264  }
 0x5a2   :  { %v868_v45 = vsel %vm4313_vm6, %v867_v19, %v866_v3  ;;  %v413_v38 = vsel %vm410_vm11, %v412_v24, %v408_v30  ;;  %vm4343_vm14 = vmmov %vm4341_vm13 }
 0x5a3   :  { %v870_v43 = vsel %vm3198_vm8, %v857_v21, %v868_v45  ;;  %v415_v7 = vsel %vm3198_vm8, %v2734_v1, %v413_v38  ;;  %vm4344_vm2 = vmmov %vm4342_vm12 }
 0x5a4   :  { %873 = vrot.lane.b32.xlu1 %v870_v43, %s3035_s0  ;;  %v871_v44 = vmul.f32 %v870_v43, %v3380_v40  ;;  %v416_v49 = vmul.f32 0.0, %v415_v7 }
 0x5ac   :  { %418 = vrot.lane.b32.xlu1 %v415_v7, %s3035_s0 }
 0x5ec   :  { %v646_v14 = vpop.permute.xlu2 %645 }
 0x5ed   :  { %v648_v15 = vmul.f32 %v646_v14, %v3505_v20 }
 0x5ef   :  { %650 = vrot.lane.b32.xlu2 %v648_v15, %s3036_s27 }
 0x616   :  { %v874_v5 = vpop.permute.xlu1 %873 }
 0x617   :  { %v876_v27 = vmul.f32 %v874_v5, %v870_v43 }
 0x619   :  { %878 = vrot.lane.b32.xlu0 %v876_v27, %s3036_s27 }
 0x61e   :  { %v419_v25 = vpop.permute.xlu1 %418 }
 0x61f   :  { %v421_v36 = vmul.f32 %v419_v25, %v415_v7 }
 0x621   :  { %423 = vrot.lane.b32.xlu0 %v421_v36, %s3036_s27 }
 0x649   :  { %v651_v29 = vpop.permute.xlu2 %650 }
 0x64a   :  { %v3574_v41 = vadd.f32 %v651_v29, %v643_v28 }
 0x64c   :  { %2735 = vtanh.f32 %v3574_v41 }
 0x652   :  { %v2736_v50 = vpop.eup %2735 }
 0x653   :  { %656 = vrot.lane.b32.xlu2 %v2736_v50, %s3035_s0 }
 0x68b   :  { %v879_v10 = vpop.permute.xlu0 %878 }
 0x68c   :  { %v3579_v9 = vadd.f32 %v879_v10, %v871_v44 }
 0x68e   :  { %2737 = vtanh.f32 %v3579_v9 }
 0x693   :  { %v424_v46 = vpop.permute.xlu0 %423 }
 0x694   :  { %v2738_v51 = vpop.eup %2737  ;;  %v3582_v31 = vadd.f32 %v424_v46, %v416_v49 }
 0x695   :  { %884 = vrot.lane.b32.xlu1 %v2738_v51, %s3035_s0 }
 0x696   :  { %2739 = vtanh.f32 %v3582_v31 }
 0x69c   :  { %v2740_v13 = vpop.eup %2739 }
 0x69d   :  { %429 = vrot.lane.b32.xlu1 %v2740_v13, %s3035_s0 }
 0x6ad   :  { %v657_v12 = vpop.permute.xlu2 %656 }
 0x6ae   :  { %v659_v40 = vmul.f32 %v657_v12, %v3505_v20 }
 0x6b0   :  { %892 = vrot.lane.b32.xlu2 %v659_v40, %s3035_s0 }
 0x707   :  { %v885_v48 = vpop.permute.xlu1 %884 }
 0x708   :  { %v887_v62 = vmul.f32 %v885_v48, %v870_v43 }
 0x70a   :  { %889 = vrot.lane.b32.xlu0 %v887_v62, %s3036_s27  ;;  %v893_v4 = vpop.permute.xlu2 %892 }
 0x70f   :  { %v430_v37 = vpop.permute.xlu1 %429 }
 0x710   :  { %v432_v61 = vmul.f32 %v430_v37, %v415_v7 }
 0x712   :  { %665 = vrot.lane.b32.xlu1 %v432_v61, %s3035_s0  ;;  %661 = vrot.lane.b32.xlu0 %v659_v40, %s3036_s27 }
 0x77c   :  { %v890_v22 = vpop.permute.xlu0 %889 }
 0x77d   :  { %v895_v42 = vsel %vm4340_vm15, %v890_v22, %v893_v4  ;;  %2582 = vmatmul.msk.f32.vlgmr.msrb.gmra.mxu1 %vm4341_vm13, %v890_v22 }
 0x77e   :  { %2578 = vmatmul.msk.f32.vlgmr.msrb.gmra.mxu0 %vm4342_vm12, %v895_v42  ;;  %1574 = vmatpush.msrb.mxu1 %v3387_v53 }
 0x77f   :  { %1804 = vmatpush.msrb.mxu0 %v3216_v54  ;;  %v3609_v54 = vld [vmem:[%s4305_s2 + $0x18] sm:$0xff] }
 0x780   :  { %1575 = vmatpush.msrb.mxu1 %v3389_v52 }
 0x781   :  { %1805 = vmatpush.msrb.mxu0 %v3218_v55  ;;  %v3617_v55 = vld [vmem:[%s4305_s2 + $0x10] sm:$0xff] }
 0x782   :  { %1576 = vmatpush.msrb.mxu1 %v3393_v34 }
 0x783   :  { %1806 = vmatpush.msrb.mxu0 %v3222_v56  ;;  %v3625_v56 = vld [vmem:[%s4305_s2 + $0x8] sm:$0xff] }
 0x784   :  { %v666_v20 = vpop.permute.xlu1 %665  ;;  %v662_v19 = vpop.permute.xlu0 %661  ;;  %1577 = vmatpush.msrb.mxu1 %v3398_v0 }
 0x785   :  { %v668_v3 = vsel %vm4343_vm14, %v662_v19, %v666_v20  ;;  %1807 = vmatpush.msrb.mxu0 %v3227_v57  ;;  %v3633_v57 = vld [vmem:[%s4305_s2] sm:$0xff] }
 0x786   :  { %2571 = vmatmul.msk.f32.vlgmr.msrb.gmra.mxu2 %vm4344_vm2, %v668_v3  ;;  %1578 = vmatpush.msrb.mxu1 %v3403_v35 }
 0x787   :  { %1638 = vmatpush.msrb.mxu2 %v3609_v54  ;;  %1808 = vmatpush.msrb.mxu0 %v3232_v58 }
 0x788   :  { %1579 = vmatpush.msrb.mxu1 %v3408_v47 }
 0x789   :  { %1639 = vmatpush.msrb.mxu2 %v3617_v55  ;;  %1809 = vmatpush.msrb.mxu0 %v3237_v59 }
 0x78a   :  { %1580 = vmatpush.msrb.mxu1 %v3413_v8 }
 0x78b   :  { %1640 = vmatpush.msrb.mxu2 %v3625_v56  ;;  %1810 = vmatpush.msrb.mxu0 %v3242_v60 }
 0x78c   :  { %1581 = vmatpush.msrb.mxu1 %v3423_v17 }
 0x78d   :  { %1641 = vmatpush.msrb.mxu2 %v3633_v57  ;;  %1811 = vmatpush.msrb.mxu0 %v3252_v63  ;;  %v3645_v63 = vld [vmem:[%s4307_s4] ss:$0 sm:$0xff] }
 0x7fa   :  { %v1046_v58 = vpop.f32.mrf.mxu1 }
 0x7fb   :  { %v1050_v59 = vrot.slane %v1046_v58, 5  ;;  %v1051_v53 = vrot.slane %v1046_v58, 6  ;;  %v1052_v52 = vrot.slane %v1046_v58, 7  ;;  %v1060_v34 = vadd.f32 %v1046_v58, %v3150_v32  ;;  %v916_v0 = vpop.f32.mrf.mxu0 }
 0x7fc   :  { %v917_v60 = vadd.f32 %v3272_v18, %v916_v0 }
 0x7fd   :  { %v1057_v35 = vadd.f32 %v1050_v59, %v3131_v11  ;;  %v1058_v33 = vadd.f32 %v1051_v53, %v3139_v16  ;;  %v1059_v21 = vadd.f32 %v1052_v52, %v3144_v23  ;;  %v1064_v18 = vadd.f32 %v3645_v63, %v1060_v34 }
 0x7fe   :  { %v2579_v45 = vmul.f32 -1.442695, %v917_v60 }
 0x7ff   :  { %v1061_v26 = vadd.f32 %v3645_v63, %v1057_v35  ;;  %v1062_v43 = vadd.f32 %v3645_v63, %v1058_v33  ;;  %v1063_v6 = vadd.f32 %v3645_v63, %v1059_v21  ;;  %v2586_v1 = vmul.f32 -1.442695, %v1064_v18 }
 0x800   :  { %2741 = vpow2.f32 %v2579_v45 }
 0x801   :  { %v2583_v30 = vmul.f32 -1.442695, %v1061_v26  ;;  %v2584_v24 = vmul.f32 -1.442695, %v1062_v43  ;;  %2743 = vtanh.f32 %v1061_v26  ;;  %v2585_v38 = vmul.f32 -1.442695, %v1063_v6 }
 0x802   :  { %2745 = vtanh.f32 %v1062_v43 }
 0x803   :  { %2747 = vpow2.f32 %v2583_v30 }
 0x804   :  { %2749 = vpow2.f32 %v2584_v24 }
 0x805   :  { %2751 = vpow2.f32 %v2585_v38 }
 0x806   :  { %v2742_v7 = vpop.eup %2741  ;;  %2753 = vpow2.f32 %v2586_v1 }
 0x807   :  { %v3651_v14 = vadd.f32 1.0, %v2742_v7  ;;  %v2744_v15 = vpop.eup %2743  ;;  %2755 = vtanh.f32 %v1063_v6 }
 0x808   :  { %v2746_v5 = vpop.eup %2745  ;;  %v1149_v40 = vrot.slane %v2744_v15, 3 }
 0x809   :  { %2757 = vrcp.f32 %v3651_v14  ;;  %v689_v27 = vpop.f32.mrf.mxu2  ;;  %v2748_v25 = vpop.eup %2747  ;;  %v1150_v48 = vrot.slane %v2746_v5, 2  ;;  %v935_v62 = vand.u32 2147483648, %v3651_v14  ;;  %vm929_vm3 = vweird.f32 %v3651_v14 }
 0x80a   :  { %v3655_v36 = vadd.f32 %v3468_v2, %v689_v27  ;;  %v2750_v28 = vpop.eup %2749  ;;  %v3657_v29 = vadd.f32 1.0, %v2748_v25  ;;  %2759 = vtanh.f32 %v917_v60  ;;  %v933_v2 = vand.u32 2147483647, %v3651_v14 }
 0x80b   :  { %v2752_v50 = vpop.eup %2751  ;;  %2761 = vtanh.f32 %v1064_v18  ;;  %v3659_v44 = vadd.f32 1.0, %v2750_v28  ;;  %v936_v52 = vor.u32 1.1754944e-38, %v935_v62  ;;  %v3690_v34 = vsel %vm4314_vm7, %v1150_v48, %v1149_v40 }
 0x80c   :  { %v2754_v10 = vpop.eup %2753  ;;  %v3661_v49 = vadd.f32 1.0, %v2752_v50  ;;  %2763 = vrcp.f32 %v3657_v29  ;;  %v2572_v46 = vmul.f32 -1.442695, %v3655_v36  ;;  %v1094_v61 = vand.u32 2147483647, %v3657_v29 }
 0x80d   :  { %v3665_v51 = vpop.eup %2755  ;;  %v3667_v13 = vadd.f32 1.0, %v2754_v10  ;;  %2765 = vrcp.f32 %v3659_v44  ;;  %v1096_v4 = vand.u32 2147483648, %v3657_v29  ;;  %v1109_v42 = vand.u32 2147483647, %v3659_v44 }
 0x80e   :  { %2767 = vrcp.f32 %v3661_v49  ;;  %v1111_v20 = vand.u32 2147483648, %v3659_v44  ;;  %vm3682_vm10 = vcmp.eq.f32.partialorder %v933_v2, 8.507059e+37  ;;  %v1152_v59 = vrot.slane %v3665_v51, 1 }
 0x80f   :  { %v2758_v12 = vpop.eup %2757  ;;  %2769 = vrcp.f32 %v3667_v13  ;;  %vm1090_vm0 = vweird.f32 %v3657_v29  ;;  %vm1105_vm9 = vweird.f32 %v3659_v44  ;;  %vm3693_vm5 = vcmp.eq.f32.partialorder %v1094_v61, 8.507059e+37 }
 0x810   :  { %v925_v37 = vmul.f32 %v2758_v12, %v3651_v14  ;;  %v2760_v22 = vpop.eup %2759  ;;  %2771 = vpow2.f32 %v2572_v46  ;;  %vm930_vm4 = vweird.f32 %v2758_v12  ;;  %v1097_v21 = vor.u32 1.1754944e-38, %v1096_v4 }
 0x811   :  { %v3679_v19 = vpop.eup %2761  ;;  %vm3698_vm11 = vcmp.eq.f32.partialorder %v1109_v42, 8.507059e+37  ;;  %v1112_v6 = vor.u32 1.1754944e-38, %v1111_v20  ;;  %vm1120_vm15 = vweird.f32 %v3661_v49  ;;  %v1124_v18 = vand.u32 2147483647, %v3661_v49  ;;  %vm931_vm13 = vmor %vm929_vm3, %vm930_vm4 }
 0x812   :  { %v926_v3 = vsub.f32 1.0, %v925_v37  ;;  %v2764_v53 = vpop.eup %2763  ;;  %v1126_v7 = vand.u32 2147483648, %v3661_v49  ;;  %v1141_v42 = vand.u32 2147483648, %v3667_v13 }
 0x813   :  { %v2766_v0 = vpop.eup %2765  ;;  %v1086_v35 = vmul.f32 %v2764_v53, %v3657_v29  ;;  %vm1091_vm12 = vweird.f32 %v2764_v53 }
 0x814   :  { %v927_v60 = vmul.f32 %v2758_v12, %v926_v3  ;;  %v2768_v45 = vpop.eup %2767  ;;  %v1101_v26 = vmul.f32 %v2766_v0, %v3659_v44  ;;  %vm1106_vm14 = vweird.f32 %v2766_v0  ;;  %vm1092_vm3 = vmor %vm1090_vm0, %vm1091_vm12  ;;  %v1127_v3 = vor.u32 1.1754944e-38, %v1126_v7 }
 0x815   :  { %v2770_v30 = vpop.eup %2769  ;;  %v1087_v38 = vsub.f32 1.0, %v1086_v35  ;;  %v1116_v1 = vmul.f32 %v2768_v45, %v3661_v49  ;;  %vm1121_vm2 = vweird.f32 %v2768_v45  ;;  %v1153_v49 = vsel %vm265_vm1, %v1152_v59, %v3690_v34 }
 0x816   :  { %v928_v24 = vadd.f32 %v2758_v12, %v927_v60  ;;  %v2772_v15 = vpop.eup %2771  ;;  %v1102_v5 = vsub.f32 1.0, %v1101_v26  ;;  %v1131_v27 = vmul.f32 %v2770_v30, %v3667_v13  ;;  %vm1136_vm4 = vweird.f32 %v2770_v30  ;;  %vm1122_vm0 = vmor %vm1120_vm15, %vm1121_vm2 }
 0x817   :  { %v696_v25 = vadd.f32 1.0, %v2772_v15  ;;  %v1088_v50 = vmul.f32 %v2764_v53, %v1087_v38  ;;  %v1117_v10 = vsub.f32 1.0, %v1116_v1 }
 0x818   :  { %v932_v28 = vsel %vm931_vm13, %v2758_v12, %v928_v24  ;;  %v1103_v2 = vmul.f32 %v2766_v0, %v1102_v5  ;;  %v1132_v40 = vsub.f32 1.0, %v1131_v27  ;;  %vm1107_vm13 = vmor %vm1105_vm9, %vm1106_vm14  ;;  %vm1125_vm9 = vcmp.eq.f32.partialorder %v1124_v18, 8.507059e+37 }
 0x819   :  { %v937_v46 = vsel %vm3682_vm10, %v936_v52, %v932_v28  ;;  %2773 = vrcp.f32 %v696_v25  ;;  %v1089_v48 = vadd.f32 %v2764_v53, %v1088_v50  ;;  %v1118_v62 = vmul.f32 %v2768_v45, %v1117_v10 }
 0x81a   :  { %v3714_v14 = vsel %vm3198_vm8, %v2760_v22, %v937_v46  ;;  %v1104_v12 = vadd.f32 %v2766_v0, %v1103_v2  ;;  %v1133_v37 = vmul.f32 %v2770_v30, %v1132_v40  ;;  %vm1135_vm10 = vweird.f32 %v3667_v13 }
 0x81b   :  { %942 = vrot.lane.b32.xlu0 %v3714_v14, %s3035_s0  ;;  %v1093_v61 = vsel %vm1092_vm3, %v2764_v53, %v1089_v48  ;;  %v1119_v4 = vadd.f32 %v2768_v45, %v1118_v62  ;;  %v1139_v22 = vand.u32 2147483647, %v3667_v13  ;;  %vm1137_vm12 = vmor %vm1135_vm10, %vm1136_vm4  ;;  %v1154_v18 = vsel %vm4313_vm6, %v3679_v19, %v1153_v49  ;;  %v3799_v49 = vld [vmem:[#allocation3] sm:$0xff] }
 0x81c   :  { %v1098_v20 = vsel %vm3693_vm5, %v1097_v21, %v1093_v61  ;;  %v1108_v29 = vsel %vm1107_vm13, %v2766_v0, %v1104_v12  ;;  %v1134_v58 = vadd.f32 %v2770_v30, %v1133_v37  ;;  %v1142_v0 = vor.u32 1.1754944e-38, %v1141_v42 }
 0x81d   :  { %v1113_v53 = vsel %vm3698_vm11, %v1112_v6, %v1108_v29  ;;  %v1123_v44 = vsel %vm1122_vm0, %v2768_v45, %v1119_v4  ;;  %v1160_v52 = vrot.slane %v1098_v20, 3  ;;  %vm1140_vm5 = vcmp.eq.f32.partialorder %v1139_v22, 8.507059e+37 }
 0x81e   :  { %v1128_v60 = vsel %vm1125_vm9, %v1127_v3, %v1123_v44  ;;  %v1138_v35 = vsel %vm1137_vm12, %v2770_v30, %v1134_v58  ;;  %v1161_v33 = vrot.slane %v1113_v53, 2  ;;  %2775 = vtanh.f32 %v3655_v36 }
 0x81f   :  { %v2774_v21 = vpop.eup %2773  ;;  %v1163_v26 = vrot.slane %v1128_v60, 1  ;;  %v1143_v6 = vsel %vm1140_vm5, %v1142_v0, %v1138_v35  ;;  %v708_v59 = vand.u32 2147483648, %v696_v25  ;;  %v706_v38 = vand.u32 2147483647, %v696_v25  ;;  %v3781_v60 = vld [vmem:[#allocation3 + $0x30] sm:$0xff]  ;;  %v3787_v35 = vld [vmem:[#allocation3 + $0x20] sm:$0xff] }
 0x820   :  { %v1162_v43 = vsel %vm4314_vm7, %v1161_v33, %v1160_v52  ;;  %v698_v45 = vmul.f32 %v2774_v21, %v696_v25  ;;  %vm703_vm11 = vweird.f32 %v2774_v21  ;;  %vm702_vm15 = vweird.f32 %v696_v25  ;;  %v3778_v52 = vld [vmem:[#allocation3 + $0x38] sm:$0xff]  ;;  %v3796_v0 = vld [vmem:[#allocation3 + $0x8] sm:$0xff] }
 0x821   :  { %v1164_v13 = vsel %vm265_vm1, %v1163_v26, %v1162_v43  ;;  %vm704_vm14 = vmor %vm702_vm15, %vm703_vm11  ;;  %v709_v7 = vor.u32 1.1754944e-38, %v708_v59  ;;  %vm707_vm2 = vcmp.eq.f32.partialorder %v706_v38, 8.507059e+37  ;;  %v940_v12 = vmul.f32 %v3714_v14, %v3574_v41  ;;  %v3790_v33 = vld [vmem:[#allocation3 + $0x18] sm:$0xff] }
 0x822   :  { %v1165_v30 = vsel %vm4313_vm6, %v1143_v6, %v1164_v13  ;;  %v699_v24 = vsub.f32 1.0, %v698_v45  ;;  %vm4351_vm3 = vcmask 261120   ;;  %vm4354_vm13 = vcmask 523264  }
 0x823   :  { %v1167_v51 = vsel %vm3198_vm8, %v1154_v18, %v1165_v30  ;;  %vm4352_vm10 = vmmov %vm4351_vm3  ;;  %v3807_v18 = vld [vmem:[#allocation3 + $0x78] sm:$0xff]  ;;  %v3811_v30 = vld [vmem:[#allocation3 + $0x70] sm:$0xff] }
 0x824   :  { %1170 = vrot.lane.b32.xlu2 %v1167_v51, %s3035_s0  ;;  %v700_v34 = vmul.f32 %v2774_v21, %v699_v24  ;;  %v2776_v19 = vpop.eup %2775  ;;  %v1168_v2 = vmul.f32 %v1167_v51, %v3579_v9  ;;  %vm4353_vm4 = vmmov %vm4351_vm3  ;;  %v3815_v24 = vld [vmem:[#allocation3 + $0x68] sm:$0xff] }
 0x825   :  { %vm4355_vm0 = vmmov %vm4354_vm13 }
 0x826   :  { %v701_v1 = vadd.f32 %v2774_v21, %v700_v34 }
 0x828   :  { %v705_v15 = vsel %vm704_vm14, %v2774_v21, %v701_v1  ;;  %v3793_v21 = vld [vmem:[#allocation3 + $0x10] sm:$0xff] }
 0x829   :  { %v710_v5 = vsel %vm707_vm2, %v709_v7, %v705_v15 }
 0x82a   :  { %v712_v36 = vsel %vm3198_vm8, %v2776_v19, %v710_v5 }
 0x82b   :  { %715 = vrot.lane.b32.xlu1 %v712_v36, %s3035_s0  ;;  %v713_v9 = vmul.f32 %v712_v36, %v3582_v31 }
 0x87e   :  { %v1171_v27 = vpop.permute.xlu2 %1170 }
 0x87f   :  { %v1173_v28 = vmul.f32 %v1171_v27, %v1167_v51 }
 0x881   :  { %1175 = vrot.lane.b32.xlu2 %v1173_v28, %s3036_s27 }
 0x88d   :  { %v943_v50 = vpop.permute.xlu0 %942 }
 0x88e   :  { %v945_v10 = vmul.f32 %v943_v50, %v3714_v14 }
 0x890   :  { %947 = vrot.lane.b32.xlu0 %v945_v10, %s3036_s27 }
 0x89d   :  { %v716_v25 = vpop.permute.xlu1 %715 }
 0x89e   :  { %v718_v46 = vmul.f32 %v716_v25, %v712_v36 }
 0x8a0   :  { %720 = vrot.lane.b32.xlu1 %v718_v46, %s3036_s27 }
 0x8db   :  { %v1176_v40 = vpop.permute.xlu2 %1175 }
 0x8dc   :  { %v3757_v48 = vadd.f32 %v1176_v40, %v1168_v2 }
 0x8de   :  { %2777 = vtanh.f32 %v3757_v48 }
 0x8e4   :  { %v2778_v62 = vpop.eup %2777 }
 0x8e5   :  { %1181 = vrot.lane.b32.xlu2 %v2778_v62, %s3035_s0 }
 0x902   :  { %v948_v37 = vpop.permute.xlu0 %947 }
 0x903   :  { %v3763_v61 = vadd.f32 %v948_v37, %v940_v12 }
 0x905   :  { %2779 = vtanh.f32 %v3763_v61 }
 0x90b   :  { %v2780_v4 = vpop.eup %2779 }
 0x90c   :  { %953 = vrot.lane.b32.xlu0 %v2780_v4, %s3035_s0 }
 0x912   :  { %v721_v22 = vpop.permute.xlu1 %720 }
 0x913   :  { %v3768_v42 = vadd.f32 %v721_v22, %v713_v9 }
 0x915   :  { %2781 = vtanh.f32 %v3768_v42 }
 0x91b   :  { %v2782_v20 = vpop.eup %2781 }
 0x91c   :  { %726 = vrot.lane.b32.xlu1 %v2782_v20, %s3035_s0 }
 0x93f   :  { %v1182_v29 = vpop.permute.xlu2 %1181 }
 0x940   :  { %v1184_v41 = vmul.f32 %v1182_v29, %v1167_v51  ;;  %v3819_v51 = vld [vmem:[#allocation3 + $0x60] sm:$0xff] }
 0x942   :  { %1186 = vrot.lane.b32.xlu2 %v1184_v41, %s3036_s27 }
 0x97e   :  { %v954_v3 = vpop.permute.xlu0 %953 }
 0x97f   :  { %v956_v58 = vmul.f32 %v954_v3, %v3714_v14  ;;  %v3784_v14 = vld [vmem:[#allocation3 + $0x28] sm:$0xff] }
 0x981   :  { %958 = vrot.lane.b32.xlu1 %v956_v58, %s3036_s27  ;;  %1189 = vrot.lane.b32.xlu0 %v956_v58, %s3035_s0 }
 0x98e   :  { %v727_v31 = vpop.permute.xlu1 %726 }
 0x98f   :  { %v729_v53 = vmul.f32 %v727_v31, %v712_v36 }
 0x991   :  { %962 = vrot.lane.b32.xlu2 %v729_v53, %s3035_s0 }
 0x99c   :  { %v1187_v44 = vpop.permute.xlu2 %1186 }
 0x99d   :  { %2591 = vmatmul.msk.f32.vlgmr.msra.gmra.mxu1 %vm4351_vm3, %v1187_v44 }
 0x99e   :  { %2104 = vmatpush.msra.mxu1 %v3778_v52 }
 0x9a0   :  { %2105 = vmatpush.msra.mxu1 %v3781_v60 }
 0x9a2   :  { %2106 = vmatpush.msra.mxu1 %v3784_v14 }
 0x9a4   :  { %2107 = vmatpush.msra.mxu1 %v3787_v35 }
 0x9a6   :  { %2108 = vmatpush.msra.mxu1 %v3790_v33 }
 0x9a8   :  { %2109 = vmatpush.msra.mxu1 %v3793_v21 }
 0x9aa   :  { %2110 = vmatpush.msra.mxu1 %v3796_v0 }
 0x9ac   :  { %2111 = vmatpush.msra.mxu1 %v3799_v49 }
 0x9eb   :  { %v963_v26 = vpop.permute.xlu2 %962 }
 0x9f3   :  { %v959_v43 = vpop.permute.xlu1 %958  ;;  %v1190_v45 = vpop.permute.xlu0 %1189 }
 0x9f4   :  { %v965_v6 = vsel %vm4352_vm10, %v959_v43, %v963_v26  ;;  %v1192_v13 = vsel %vm4353_vm4, %v1187_v44, %v1190_v45 }
 0x9f5   :  { %2580 = vmatmul.msk.f32.vlgmr.msra.gmra.mxu3 %vm4354_vm13, %v965_v6  ;;  %2587 = vmatmul.msk.f32.vlgmr.msra.gmra.mxu2 %vm4355_vm0, %v1192_v13 }
 0x9f6   :  { %1938 = vmatpush.msra.mxu3 %v3609_v54  ;;  %1874 = vmatpush.msra.mxu2 %v3807_v18  ;;  %v3822_v54 = vld [vmem:[#allocation3 + $0x58] sm:$0xff] }
 0x9f8   :  { %1939 = vmatpush.msra.mxu3 %v3617_v55  ;;  %1875 = vmatpush.msra.mxu2 %v3811_v30 }
 0x9fa   :  { %1940 = vmatpush.msra.mxu3 %v3625_v56  ;;  %1876 = vmatpush.msra.mxu2 %v3815_v24 }
 0x9fc   :  { %1941 = vmatpush.msra.mxu3 %v3633_v57  ;;  %1877 = vmatpush.msra.mxu2 %v3819_v51 }
 0x9fe   :  { %1878 = vmatpush.msra.mxu2 %v3822_v54 }
 0xa00   :  { %1879 = vmatpush.msra.mxu2 %v3408_v47 }
 0xa02   :  { %1880 = vmatpush.msra.mxu2 %v3413_v8 }
 0xa04   :  { %1881 = vmatpush.msra.mxu2 %v3423_v17 }
 0xa1a   :  { %v1343_v55 = vpop.f32.mrf.mxu1 }
 0xa1b   :  { %v1347_v56 = vrot.slane %v1343_v55, 4  ;;  %v1348_v59 = vrot.slane %v1343_v55, 5  ;;  %v1349_v34 = vrot.slane %v1343_v55, 6  ;;  %v1350_v38 = vrot.slane %v1343_v55, 7 }
 0xa1d   :  { %v1355_v57 = vadd.f32 %v1347_v56, %v3131_v11  ;;  %v1356_v1 = vadd.f32 %v1348_v59, %v3139_v16  ;;  %v1357_v7 = vadd.f32 %v1349_v34, %v3144_v23  ;;  %v1358_v15 = vadd.f32 %v1350_v38, %v3150_v32 }
 0xa1f   :  { %v1359_v19 = vadd.f32 %v3645_v63, %v1355_v57  ;;  %v1360_v47 = vadd.f32 %v3645_v63, %v1356_v1  ;;  %v1361_v8 = vadd.f32 %v3645_v63, %v1357_v7  ;;  %v1362_v17 = vadd.f32 %v3645_v63, %v1358_v15 }
 0xa21   :  { %v2592_v5 = vmul.f32 -1.442695, %v1359_v19  ;;  %v2593_v36 = vmul.f32 -1.442695, %v1360_v47  ;;  %2783 = vtanh.f32 %v1359_v19  ;;  %v2594_v27 = vmul.f32 -1.442695, %v1361_v8 }
 0xa22   :  { %2785 = vtanh.f32 %v1360_v47  ;;  %v2595_v28 = vmul.f32 -1.442695, %v1362_v17 }
 0xa23   :  { %2787 = vpow2.f32 %v2592_v5 }
 0xa24   :  { %2789 = vpow2.f32 %v2593_v36 }
 0xa25   :  { %2791 = vpow2.f32 %v2594_v27 }
 0xa26   :  { %2793 = vpow2.f32 %v2595_v28 }
 0xa27   :  { %v2784_v50 = vpop.eup %2783  ;;  %2795 = vtanh.f32 %v1361_v8 }
 0xa28   :  { %v2786_v10 = vpop.eup %2785  ;;  %v1447_v9 = vrot.slane %v2784_v50, 4 }
 0xa29   :  { %v2788_v25 = vpop.eup %2787  ;;  %v1448_v22 = vrot.slane %v2786_v10, 3 }
 0xa2a   :  { %v2790_v46 = vpop.eup %2789  ;;  %v1379_v2 = vadd.f32 1.0, %v2788_v25 }
 0xa2b   :  { %v2792_v40 = vpop.eup %2791  ;;  %v1380_v62 = vadd.f32 1.0, %v2790_v46  ;;  %v1449_v26 = vsel %vm4314_vm7, %v1448_v22, %v1447_v9 }
 0xa2c   :  { %v2794_v12 = vpop.eup %2793  ;;  %v1381_v37 = vadd.f32 1.0, %v2792_v40  ;;  %2797 = vrcp.f32 %v1379_v2  ;;  %v1392_v29 = vand.u32 2147483647, %v1379_v2  ;;  %v1394_v41 = vand.u32 2147483648, %v1379_v2 }
 0xa2d   :  { %v3836_v4 = vadd.f32 1.0, %v2794_v12  ;;  %2799 = vrcp.f32 %v1380_v62  ;;  %v3839_v20 = vpop.eup %2795  ;;  %v1407_v58 = vand.u32 2147483647, %v1380_v62  ;;  %v1409_v44 = vand.u32 2147483648, %v1380_v62 }
 0xa2e   :  { %2801 = vrcp.f32 %v1381_v37  ;;  %v1450_v43 = vrot.slane %v3839_v20, 2  ;;  %vm1388_vm9 = vweird.f32 %v1379_v2  ;;  %vm3843_vm12 = vcmp.eq.f32.partialorder %v1392_v29, 8.507059e+37 }
 0xa2f   :  { %2803 = vrcp.f32 %v3836_v4  ;;  %vm1403_vm5 = vweird.f32 %v1380_v62  ;;  %v1395_v59 = vor.u32 1.1754944e-38, %v1394_v41  ;;  %vm1418_vm11 = vweird.f32 %v1381_v37 }
 0xa30   :  { %2805 = vtanh.f32 %v1362_v17  ;;  %vm3847_vm15 = vcmp.eq.f32.partialorder %v1407_v58, 8.507059e+37  ;;  %v1422_v1 = vand.u32 2147483647, %v1381_v37  ;;  %v1410_v19 = vor.u32 1.1754944e-38, %v1409_v44 }
 0xa31   :  { %v1424_v5 = vand.u32 2147483648, %v1381_v37  ;;  %v1439_v50 = vand.u32 2147483648, %v3836_v4  ;;  %v1437_v46 = vand.u32 2147483647, %v3836_v4  ;;  %vm1433_vm6 = vweird.f32 %v3836_v4 }
 0xa32   :  { %v2798_v3 = vpop.eup %2797  ;;  %vm1423_vm0 = vcmp.eq.f32.partialorder %v1422_v1, 8.507059e+37  ;;  %v1451_v6 = vsel %vm265_vm1, %v1450_v43, %v1449_v26  ;;  %v3876_v43 = vld [vmem:[%s4307_s4 + $0x2] ss:$0 sm:$0xff]  ;;  %v3882_v1 = vld [vmem:[%s4307_s4 + $0x1] ss:$0 sm:$0xff] }
 0xa33   :  { %v2800_v31 = vpop.eup %2799  ;;  %v1384_v53 = vmul.f32 %v2798_v3, %v1379_v2  ;;  %vm1389_vm14 = vweird.f32 %v2798_v3  ;;  %v1425_v2 = vor.u32 1.1754944e-38, %v1424_v5 }
 0xa34   :  { %v2802_v45 = vpop.eup %2801  ;;  %v1399_v13 = vmul.f32 %v2800_v31, %v1380_v62  ;;  %vm1404_vm2 = vweird.f32 %v2800_v31  ;;  %vm1390_vm10 = vmor %vm1388_vm9, %vm1389_vm14 }
 0xa35   :  { %v2804_v55 = vpop.eup %2803  ;;  %v1385_v56 = vsub.f32 1.0, %v1384_v53  ;;  %v1414_v34 = vmul.f32 %v2802_v45, %v1381_v37  ;;  %vm1419_vm3 = vweird.f32 %v2802_v45  ;;  %vm1405_vm13 = vmor %vm1403_vm5, %vm1404_vm2  ;;  %vm1438_vm5 = vcmp.eq.f32.partialorder %v1437_v46, 8.507059e+37 }
 0xa36   :  { %v1400_v38 = vsub.f32 1.0, %v1399_v13  ;;  %v1429_v7 = vmul.f32 %v2804_v55, %v3836_v4  ;;  %v2806_v8 = vpop.eup %2805  ;;  %vm1434_vm4 = vweird.f32 %v2804_v55  ;;  %vm1420_vm7 = vmor %vm1418_vm11, %vm1419_vm3  ;;  %vm4361_vm11 = vcmask 1043459  }
 0xa37   :  { %v1386_v15 = vmul.f32 %v2798_v3, %v1385_v56  ;;  %v1415_v47 = vsub.f32 1.0, %v1414_v34  ;;  %vm1435_vm9 = vmor %vm1433_vm6, %vm1434_vm4 }
 0xa38   :  { %v1401_v17 = vmul.f32 %v2800_v31, %v1400_v38  ;;  %v1430_v36 = vsub.f32 1.0, %v1429_v7 }
 0xa39   :  { %v1387_v27 = vadd.f32 %v2798_v3, %v1386_v15  ;;  %v1416_v28 = vmul.f32 %v2802_v45, %v1415_v47 }
 0xa3a   :  { %v1402_v10 = vadd.f32 %v2800_v31, %v1401_v17  ;;  %v1431_v25 = vmul.f32 %v2804_v55, %v1430_v36 }
 0xa3b   :  { %v1391_v40 = vsel %vm1390_vm10, %v2798_v3, %v1387_v27  ;;  %v1417_v12 = vadd.f32 %v2802_v45, %v1416_v28  ;;  %v1440_v3 = vor.u32 1.1754944e-38, %v1439_v50 }
 0xa3c   :  { %v1396_v9 = vsel %vm3843_vm12, %v1395_v59, %v1391_v40  ;;  %v1406_v22 = vsel %vm1405_vm13, %v2800_v31, %v1402_v10  ;;  %v1432_v20 = vadd.f32 %v2804_v55, %v1431_v25  ;;  %v1452_v31 = vrot.slane %v2806_v8, 1 }
 0xa3d   :  { %v1411_v29 = vsel %vm3847_vm15, %v1410_v19, %v1406_v22  ;;  %v1421_v41 = vsel %vm1420_vm7, %v2802_v45, %v1417_v12  ;;  %v1459_v62 = vrot.slane %v1396_v9, 4  ;;  %vm4360_vm12 = vcmask 1041409   ;;  %vm4362_vm7 = vmmov %vm4361_vm11 }
 0xa3e   :  { %v1426_v58 = vsel %vm1423_vm0, %v1425_v2, %v1421_v41  ;;  %v1436_v53 = vsel %vm1435_vm9, %v2804_v55, %v1432_v20  ;;  %v1460_v44 = vrot.slane %v1411_v29, 3  ;;  %v1453_v34 = vsel %vm4361_vm11, %v1452_v31, %v1451_v6 }
 0xa3f   :  { %v1441_v4 = vsel %vm1438_vm5, %v1440_v3, %v1436_v53  ;;  %v1462_v13 = vrot.slane %v1426_v58, 2  ;;  %vm4363_vm0 = vcmask 261120   ;;  %vm4365_vm5 = vcmask 523264  }
 0xa40   :  { %v1461_v37 = vsel %vm4360_vm12, %v1460_v44, %v1459_v62  ;;  %v1464_v56 = vrot.slane %v1441_v4, 1  ;;  %vm4364_vm9 = vmmov %vm4363_vm0 }
 0xa41   :  { %v1463_v59 = vsel %vm265_vm1, %v1462_v13, %v1461_v37  ;;  %vm4366_vm12 = vmmov %vm4363_vm0 }
 0xa42   :  { %v1465_v45 = vsel %vm4362_vm7, %v1464_v56, %v1463_v59  ;;  %vm4367_vm11 = vmmov %vm4365_vm5  ;;  %vm4368_vm7 = vcmask 1041409  }
 0xa43   :  { %v3869_v38 = vsel %vm3198_vm8, %v1453_v34, %v1465_v45 }
 0xa44   :  { %1470 = vrot.lane.b32.xlu0 %v3869_v38, %s3035_s0 }
 0xa78   :  { %v986_v55 = vpop.f32.mrf.mxu3  ;;  %v1213_v26 = vpop.f32.mrf.mxu2 }
 0xa79   :  { %v987_v57 = vadd.f32 %v3876_v43, %v986_v55  ;;  %v1214_v7 = vadd.f32 %v3882_v1, %v1213_v26  ;;  %v1468_v26 = vmul.f32 %v3869_v38, %v3757_v48 }
 0xa7b   :  { %v2581_v15 = vmul.f32 -1.442695, %v987_v57  ;;  %v2588_v19 = vmul.f32 -1.442695, %v1214_v7 }
 0xa7d   :  { %2807 = vpow2.f32 %v2581_v15 }
 0xa7e   :  { %2809 = vpow2.f32 %v2588_v19 }
 0xa83   :  { %v2808_v47 = vpop.eup %2807 }
 0xa84   :  { %v2810_v8 = vpop.eup %2809  ;;  %v993_v17 = vadd.f32 1.0, %v2808_v47 }
 0xa85   :  { %v1220_v5 = vadd.f32 1.0, %v2810_v8 }
 0xa86   :  { %2811 = vrcp.f32 %v993_v17  ;;  %v1005_v46 = vand.u32 2147483648, %v993_v17  ;;  %v1003_v9 = vand.u32 2147483647, %v993_v17  ;;  %vm999_vm14 = vweird.f32 %v993_v17 }
 0xa87   :  { %2813 = vrcp.f32 %v1220_v5  ;;  %v1232_v40 = vand.u32 2147483648, %v1220_v5  ;;  %v1230_v2 = vand.u32 2147483647, %v1220_v5  ;;  %vm1226_vm2 = vweird.f32 %v1220_v5 }
 0xa88   :  { %2815 = vtanh.f32 %v987_v57  ;;  %v1006_v41 = vor.u32 1.1754944e-38, %v1005_v46  ;;  %vm1004_vm4 = vcmp.eq.f32.partialorder %v1003_v9, 8.507059e+37 }
 0xa89   :  { %2817 = vtanh.f32 %v1214_v7  ;;  %v1233_v62 = vor.u32 1.1754944e-38, %v1232_v40  ;;  %vm1231_vm13 = vcmp.eq.f32.partialorder %v1230_v2, 8.507059e+37 }
 0xa8c   :  { %v2812_v36 = vpop.eup %2811 }
 0xa8d   :  { %v2814_v27 = vpop.eup %2813  ;;  %v995_v28 = vmul.f32 %v2812_v36, %v993_v17  ;;  %vm1000_vm6 = vweird.f32 %v2812_v36 }
 0xa8e   :  { %v1222_v50 = vmul.f32 %v2814_v27, %v1220_v5  ;;  %vm1227_vm15 = vweird.f32 %v2814_v27  ;;  %vm1001_vm3 = vmor %vm999_vm14, %vm1000_vm6  ;;  %v2816_v3 = vpop.eup %2815 }
 0xa8f   :  { %v996_v10 = vsub.f32 1.0, %v995_v28  ;;  %vm1228_vm10 = vmor %vm1226_vm2, %vm1227_vm15  ;;  %v2818_v53 = vpop.eup %2817 }
 0xa90   :  { %v1223_v25 = vsub.f32 1.0, %v1222_v50 }
 0xa91   :  { %v997_v12 = vmul.f32 %v2812_v36, %v996_v10 }
 0xa92   :  { %v1224_v22 = vmul.f32 %v2814_v27, %v1223_v25 }
 0xa93   :  { %v998_v20 = vadd.f32 %v2812_v36, %v997_v12 }
 0xa94   :  { %v1225_v29 = vadd.f32 %v2814_v27, %v1224_v22 }
 0xa95   :  { %v1002_v58 = vsel %vm1001_vm3, %v2812_v36, %v998_v20 }
 0xa96   :  { %v1229_v44 = vsel %vm1228_vm10, %v2814_v27, %v1225_v29  ;;  %v1007_v4 = vsel %vm1004_vm4, %v1006_v41, %v1002_v58 }
 0xa97   :  { %v1234_v6 = vsel %vm1231_vm13, %v1233_v62, %v1229_v44  ;;  %v1009_v13 = vsel %vm3198_vm8, %v2816_v3, %v1007_v4 }
 0xa98   :  { %v1236_v31 = vsel %vm3198_vm8, %v2818_v53, %v1234_v6  ;;  %1012 = vrot.lane.b32.xlu2 %v1009_v13, %s3035_s0  ;;  %v1010_v19 = vmul.f32 %v1009_v13, %v3768_v42 }
 0xa99   :  { %1239 = vrot.lane.b32.xlu1 %v1236_v31, %s3035_s0  ;;  %v1237_v48 = vmul.f32 %v1236_v31, %v3763_v61 }
 0xab6   :  { %v1471_v37 = vpop.permute.xlu0 %1470 }
 0xab7   :  { %v1473_v56 = vmul.f32 %v1471_v37, %v3869_v38 }
 0xab9   :  { %1475 = vrot.lane.b32.xlu0 %v1473_v56, %s3036_s27 }
 0xaf2   :  { %v1013_v59 = vpop.permute.xlu2 %1012 }
 0xaf3   :  { %v1015_v34 = vmul.f32 %v1013_v59, %v1009_v13 }
 0xaf5   :  { %1017 = vrot.lane.b32.xlu2 %v1015_v34, %s3036_s27 }
 0xb0b   :  { %v1240_v45 = vpop.permute.xlu1 %1239 }
 0xb0c   :  { %v1242_v55 = vmul.f32 %v1240_v45, %v1236_v31 }
 0xb0e   :  { %1244 = vrot.lane.b32.xlu1 %v1242_v55, %s3036_s27 }
 0xb2b   :  { %v1476_v57 = vpop.permute.xlu0 %1475 }
 0xb2c   :  { %v3897_v7 = vadd.f32 %v1476_v57, %v1468_v26 }
 0xb2e   :  { %2819 = vtanh.f32 %v3897_v7 }
 0xb34   :  { %v2820_v15 = vpop.eup %2819 }
 0xb35   :  { %1481 = vrot.lane.b32.xlu0 %v2820_v15, %s3035_s0 }
 0xb4f   :  { %v1018_v47 = vpop.permute.xlu2 %1017 }
 0xb50   :  { %v3902_v8 = vadd.f32 %v1018_v47, %v1010_v19 }
 0xb52   :  { %2821 = vtanh.f32 %v3902_v8 }
 0xb58   :  { %v2822_v17 = vpop.eup %2821 }
 0xb59   :  { %1023 = vrot.lane.b32.xlu2 %v2822_v17, %s3035_s0 }
 0xb80   :  { %v1245_v5 = vpop.permute.xlu1 %1244 }
 0xb81   :  { %v3907_v36 = vadd.f32 %v1245_v5, %v1237_v48 }
 0xb83   :  { %2823 = vtanh.f32 %v3907_v36 }
 0xb89   :  { %v2824_v27 = vpop.eup %2823 }
 0xb8a   :  { %1250 = vrot.lane.b32.xlu1 %v2824_v27, %s3035_s0 }
 0xba7   :  { %v1482_v28 = vpop.permute.xlu0 %1481 }
 0xba8   :  { %v1484_v42 = vmul.f32 %v1482_v28, %v3869_v38 }
 0xbaa   :  { %1486 = vrot.lane.b32.xlu0 %v1484_v42, %s3036_s27 }
 0xbb3   :  { %v1024_v50 = vpop.permute.xlu2 %1023 }
 0xbb4   :  { %v1026_v10 = vmul.f32 %v1024_v50, %v1009_v13 }
 0xbb6   :  { %1259 = vrot.lane.b32.xlu0 %v1026_v10, %s3035_s0 }
 0xbfc   :  { %v1251_v25 = vpop.permute.xlu1 %1250 }
 0xbfd   :  { %v1253_v46 = vmul.f32 %v1251_v25, %v1236_v31 }
 0xbff   :  { %1489 = vrot.lane.b32.xlu1 %v1253_v46, %s3035_s0  ;;  %1255 = vrot.lane.b32.xlu2 %v1253_v46, %s3036_s27 }
 0xc1c   :  { %v1487_v61 = vpop.permute.xlu0 %1486 }
 0xc1d   :  { %2600 = vmatmul.msk.f32.vlgmr.msrb.gmra.mxu2 %vm4363_vm0, %v1487_v61 }
 0xc1e   :  { %2404 = vmatpush.msrb.mxu2 %v3778_v52  ;;  %v2995_v52 = vld [vmem:[#allocation3 + $0x50] sm:$0xff] }
 0xc20   :  { %2405 = vmatpush.msrb.mxu2 %v3781_v60  ;;  %v2996_v60 = vld [vmem:[#allocation3 + $0x48] sm:$0xff] }
 0xc22   :  { %2406 = vmatpush.msrb.mxu2 %v3784_v14  ;;  %v2997_v14 = vld [vmem:[#allocation3 + $0x40] sm:$0xff] }
 0xc24   :  { %2407 = vmatpush.msrb.mxu2 %v3787_v35 }
 0xc26   :  { %2408 = vmatpush.msrb.mxu2 %v3790_v33 }
 0xc28   :  { %2409 = vmatpush.msrb.mxu2 %v3793_v21  ;;  %v1260_v38 = vpop.permute.xlu0 %1259 }
 0xc2a   :  { %2410 = vmatpush.msrb.mxu2 %v3796_v0 }
 0xc2c   :  { %2411 = vmatpush.msrb.mxu2 %v3799_v49 }
 0xc59   :  { %v1256_v40 = vpop.permute.xlu2 %1255 }
 0xc5a   :  { %v1262_v12 = vsel %vm4364_vm9, %v1256_v40, %v1260_v38 }
 0xc5b   :  { %2589 = vmatmul.msk.f32.vlgmr.msra.gmra.mxu0 %vm4365_vm5, %v1262_v12 }
 0xc5c   :  { %2474 = vmatpush.msra.mxu0 %v3807_v18 }
 0xc5e   :  { %2475 = vmatpush.msra.mxu0 %v3811_v30 }
 0xc60   :  { %2476 = vmatpush.msra.mxu0 %v3815_v24 }
 0xc62   :  { %2477 = vmatpush.msra.mxu0 %v3819_v51 }
 0xc64   :  { %2478 = vmatpush.msra.mxu0 %v3822_v54 }
 0xc66   :  { %2479 = vmatpush.msra.mxu0 %v2995_v52 }
 0xc68   :  { %2480 = vmatpush.msra.mxu0 %v2996_v60 }
 0xc6a   :  { %2481 = vmatpush.msra.mxu0 %v2997_v14 }
 0xc71   :  { %v1490_v35 = vpop.permute.xlu1 %1489 }
 0xc72   :  { %v1492_v33 = vsel %vm4366_vm12, %v1487_v61, %v1490_v35 }
 0xc73   :  { %2596 = vmatmul.msk.f32.vlgmr.msrb.gmra.mxu3 %vm4367_vm11, %v1492_v33 }
 0xc74   :  { %2174 = vmatpush.msrb.mxu3 %v3807_v18 }
 0xc76   :  { %2175 = vmatpush.msrb.mxu3 %v3811_v30 }
 0xc78   :  { %2176 = vmatpush.msrb.mxu3 %v3815_v24 }
 0xc7a   :  { %2177 = vmatpush.msrb.mxu3 %v3819_v51 }
 0xc7c   :  { %2178 = vmatpush.msrb.mxu3 %v3822_v54 }
 0xc7e   :  { %2179 = vmatpush.msrb.mxu3 %v2995_v52 }
 0xc80   :  { %2180 = vmatpush.msrb.mxu3 %v2996_v60 }
 0xc82   :  { %2181 = vmatpush.msrb.mxu3 %v2997_v14 }
 0xca0   :  { %v1643_v21 = vpop.f32.mrf.mxu2 }
 0xca1   :  { %v1647_v0 = vrot.slane %v1643_v21, 3  ;;  %v1648_v49 = vrot.slane %v1643_v21, 4  ;;  %v1649_v9 = vrot.slane %v1643_v21, 5  ;;  %v1650_v22 = vrot.slane %v1643_v21, 6 }
 0xca3   :  { %v1655_v2 = vadd.f32 %v1647_v0, %v3131_v11  ;;  %v1656_v18 = vadd.f32 %v1648_v49, %v3139_v16  ;;  %v1657_v30 = vadd.f32 %v1649_v9, %v3144_v23  ;;  %v1658_v24 = vadd.f32 %v1650_v22, %v3150_v32 }
 0xca5   :  { %v1659_v51 = vadd.f32 %v3645_v63, %v1655_v2  ;;  %v1660_v54 = vadd.f32 %v3645_v63, %v1656_v18  ;;  %v1661_v20 = vadd.f32 %v3645_v63, %v1657_v30  ;;  %v1662_v29 = vadd.f32 %v3645_v63, %v1658_v24 }
 0xca7   :  { %v2601_v41 = vmul.f32 -1.442695, %v1659_v51  ;;  %v2602_v3 = vmul.f32 -1.442695, %v1660_v54  ;;  %2825 = vtanh.f32 %v1659_v51  ;;  %v2603_v62 = vmul.f32 -1.442695, %v1661_v20 }
 0xca8   :  { %2827 = vtanh.f32 %v1660_v54  ;;  %v2604_v58 = vmul.f32 -1.442695, %v1662_v29 }
 0xca9   :  { %2829 = vpow2.f32 %v2601_v41 }
 0xcaa   :  { %2831 = vpow2.f32 %v2602_v3 }
 0xcab   :  { %2833 = vpow2.f32 %v2603_v62 }
 0xcac   :  { %2835 = vpow2.f32 %v2604_v58 }
 0xcad   :  { %v2826_v53 = vpop.eup %2825  ;;  %2837 = vtanh.f32 %v1661_v20 }
 0xcae   :  { %v2828_v44 = vpop.eup %2827  ;;  %v1747_v34 = vrot.slane %v2826_v53, 5 }
 0xcaf   :  { %v2830_v4 = vpop.eup %2829  ;;  %v1748_v45 = vrot.slane %v2828_v44, 4 }
 0xcb0   :  { %v2832_v6 = vpop.eup %2831  ;;  %v1679_v13 = vadd.f32 1.0, %v2830_v4 }
 0xcb1   :  { %v2834_v31 = vpop.eup %2833  ;;  %v1680_v37 = vadd.f32 1.0, %v2832_v6  ;;  %v1749_v5 = vsel %vm4368_vm7, %v1748_v45, %v1747_v34 }
 0xcb2   :  { %v2836_v56 = vpop.eup %2835  ;;  %v1681_v63 = vadd.f32 1.0, %v2834_v31  ;;  %2839 = vrcp.f32 %v1679_v13  ;;  %v1692_v26 = vand.u32 2147483647, %v1679_v13  ;;  %v1694_v57 = vand.u32 2147483648, %v1679_v13 }
 0xcb3   :  { %v3947_v59 = vadd.f32 1.0, %v2836_v56  ;;  %2841 = vrcp.f32 %v1680_v37  ;;  %v3950_v55 = vpop.eup %2837  ;;  %v1707_v19 = vand.u32 2147483647, %v1680_v37  ;;  %v1709_v48 = vand.u32 2147483648, %v1680_v37 }
 0xcb4   :  { %2843 = vrcp.f32 %v1681_v63  ;;  %v1750_v27 = vrot.slane %v3950_v55, 3  ;;  %vm1688_vm6 = vweird.f32 %v1679_v13  ;;  %vm3954_vm15 = vcmp.eq.f32.partialorder %v1692_v26, 8.507059e+37 }
 0xcb5   :  { %2845 = vrcp.f32 %v3947_v59  ;;  %vm1703_vm14 = vweird.f32 %v1680_v37  ;;  %v1695_v46 = vor.u32 1.1754944e-38, %v1694_v57  ;;  %vm1718_vm2 = vweird.f32 %v1681_v63 }
 0xcb6   :  { %2847 = vtanh.f32 %v1662_v29  ;;  %vm3958_vm3 = vcmp.eq.f32.partialorder %v1707_v19, 8.507059e+37  ;;  %v1722_v12 = vand.u32 2147483647, %v1681_v63  ;;  %v1710_v14 = vor.u32 1.1754944e-38, %v1709_v48 }
 0xcb7   :  { %v1724_v0 = vand.u32 2147483648, %v1681_v63  ;;  %v1739_v2 = vand.u32 2147483648, %v3947_v59  ;;  %v1737_v24 = vand.u32 2147483647, %v3947_v59  ;;  %vm1733_vm11 = vweird.f32 %v3947_v59 }
 0xcb8   :  { %v2840_v15 = vpop.eup %2839  ;;  %vm1723_vm12 = vcmp.eq.f32.partialorder %v1722_v12, 8.507059e+37 }
 0xcb9   :  { %v2842_v47 = vpop.eup %2841  ;;  %v1684_v17 = vmul.f32 %v2840_v15, %v1679_v13  ;;  %vm1689_vm10 = vweird.f32 %v2840_v15  ;;  %v1725_v41 = vor.u32 1.1754944e-38, %v1724_v0  ;;  %v1740_v53 = vor.u32 1.1754944e-38, %v1739_v2 }
 0xcba   :  { %v2844_v28 = vpop.eup %2843  ;;  %v1699_v50 = vmul.f32 %v2842_v47, %v1680_v37  ;;  %vm1704_vm4 = vweird.f32 %v2842_v47  ;;  %vm1690_vm0 = vmor %vm1688_vm6, %vm1689_vm10  ;;  %v1751_v37 = vsel %vm265_vm1, %v1750_v27, %v1749_v5 }
 0xcbb   :  { %v2846_v10 = vpop.eup %2845  ;;  %v1685_v25 = vsub.f32 1.0, %v1684_v17  ;;  %v1714_v61 = vmul.f32 %v2844_v28, %v1681_v63  ;;  %vm1719_vm13 = vweird.f32 %v2844_v28  ;;  %vm1705_vm5 = vmor %vm1703_vm14, %vm1704_vm4  ;;  %vm1738_vm14 = vcmp.eq.f32.partialorder %v1737_v24, 8.507059e+37 }
 0xcbc   :  { %v1700_v38 = vsub.f32 1.0, %v1699_v50  ;;  %v1729_v52 = vmul.f32 %v2846_v10, %v3947_v59  ;;  %v2848_v33 = vpop.eup %2847  ;;  %vm1734_vm9 = vweird.f32 %v2846_v10  ;;  %vm1720_vm7 = vmor %vm1718_vm2, %vm1719_vm13  ;;  %vm4374_vm2 = vcmask 1043459  }
 0xcbd   :  { %v1686_v60 = vmul.f32 %v2840_v15, %v1685_v25  ;;  %v1715_v35 = vsub.f32 1.0, %v1714_v61  ;;  %vm1735_vm6 = vmor %vm1733_vm11, %vm1734_vm9  ;;  %v1752_v59 = vrot.slane %v2848_v33, 2 }
 0xcbe   :  { %v1701_v21 = vmul.f32 %v2842_v47, %v1700_v38  ;;  %v1730_v49 = vsub.f32 1.0, %v1729_v52 }
 0xcbf   :  { %v1687_v9 = vadd.f32 %v2840_v15, %v1686_v60  ;;  %v1716_v22 = vmul.f32 %v2844_v28, %v1715_v35  ;;  %v1753_v55 = vsel %vm4374_vm2, %v1752_v59, %v1751_v37 }
 0xcc0   :  { %v1702_v18 = vadd.f32 %v2842_v47, %v1701_v21  ;;  %v1731_v30 = vmul.f32 %v2846_v10, %v1730_v49 }
 0xcc1   :  { %v1691_v51 = vsel %vm1690_vm0, %v2840_v15, %v1687_v9  ;;  %v1717_v54 = vadd.f32 %v2844_v28, %v1716_v22 }
 0xcc2   :  { %v1696_v20 = vsel %vm3954_vm15, %v1695_v46, %v1691_v51  ;;  %v1706_v29 = vsel %vm1705_vm5, %v2842_v47, %v1702_v18  ;;  %v1732_v3 = vadd.f32 %v2846_v10, %v1731_v30  ;;  %vm4373_vm15 = vcmask 1041409  }
 0xcc3   :  { %v1711_v62 = vsel %vm3958_vm3, %v1710_v14, %v1706_v29  ;;  %v1721_v58 = vsel %vm1720_vm7, %v2844_v28, %v1717_v54  ;;  %v1759_v44 = vrot.slane %v1696_v20, 5  ;;  %vm4375_vm3 = vmmov %vm4374_vm2  ;;  %vm4376_vm7 = vcmask 261120  }
 0xcc4   :  { %v1726_v4 = vsel %vm1723_vm12, %v1725_v41, %v1721_v58  ;;  %v1736_v6 = vsel %vm1735_vm6, %v2846_v10, %v1732_v3  ;;  %v1760_v13 = vrot.slane %v1711_v62, 4  ;;  %vm4377_vm6 = vmmov %vm4376_vm7 }
 0xcc5   :  { %v1741_v31 = vsel %vm1738_vm14, %v1740_v53, %v1736_v6  ;;  %v1762_v56 = vrot.slane %v1726_v4, 3  ;;  %vm4378_vm14 = vcmask 523264  }
 0xcc6   :  { %v1761_v63 = vsel %vm4373_vm15, %v1760_v13, %v1759_v44  ;;  %v1764_v34 = vrot.slane %v1741_v31, 2  ;;  %vm4379_vm15 = vmmov %vm4377_vm6 }
 0xcc7   :  { %v1763_v45 = vsel %vm265_vm1, %v1762_v56, %v1761_v63  ;;  %vm4380_vm2 = vmmov %vm4378_vm14 }
 0xcc8   :  { %v1765_v26 = vsel %vm4375_vm3, %v1764_v34, %v1763_v45 }
 0xcc9   :  { %v3980_v57 = vsel %vm3198_vm8, %v1753_v55, %v1765_v26 }
 0xcca   :  { %1770 = vrot.lane.b32.xlu1 %v3980_v57, %s3035_s0  ;;  %v1768_v44 = vmul.f32 %v3980_v57, %v3897_v7 }
 0xcd8   :  { %v1283_v15 = vpop.f32.mrf.mxu0 }
 0xcd9   :  { %v1284_v19 = vadd.f32 %v3876_v43, %v1283_v15 }
 0xcdb   :  { %v2590_v47 = vmul.f32 -1.442695, %v1284_v19 }
 0xcdd   :  { %2849 = vpow2.f32 %v2590_v47 }
 0xce3   :  { %v2850_v17 = vpop.eup %2849 }
 0xce4   :  { %v1290_v48 = vadd.f32 1.0, %v2850_v17 }
 0xce6   :  { %2851 = vrcp.f32 %v1290_v48  ;;  %v1302_v42 = vand.u32 2147483648, %v1290_v48  ;;  %v1300_v10 = vand.u32 2147483647, %v1290_v48  ;;  %vm1296_vm4 = vweird.f32 %v1290_v48 }
 0xce7   :  { %2853 = vtanh.f32 %v1284_v19 }
 0xce8   :  { %v1303_v46 = vor.u32 1.1754944e-38, %v1302_v42  ;;  %vm1301_vm0 = vcmp.eq.f32.partialorder %v1300_v10, 8.507059e+37  ;;  %v2999_v42 = vld [vmem:[%s4305_s2 + $0x10] sm:$0xff]  ;;  %v3001_v10 = vld [vmem:[%s4305_s2] sm:$0xff] }
 0xcec   :  { %v2852_v5 = vpop.eup %2851 }
 0xced   :  { %v1292_v27 = vmul.f32 %v2852_v5, %v1290_v48  ;;  %vm1297_vm10 = vweird.f32 %v2852_v5  ;;  %v2854_v38 = vpop.eup %2853 }
 0xcee   :  { %vm1298_vm13 = vmor %vm1296_vm4, %vm1297_vm10 }
 0xcef   :  { %v1293_v28 = vsub.f32 1.0, %v1292_v27 }
 0xcf1   :  { %v1294_v50 = vmul.f32 %v2852_v5, %v1293_v28  ;;  %v2998_v28 = vld [vmem:[%s4305_s2 + $0x18] sm:$0xff] }
 0xcf3   :  { %v1295_v25 = vadd.f32 %v2852_v5, %v1294_v50  ;;  %v3000_v50 = vld [vmem:[%s4305_s2 + $0x8] sm:$0xff] }
 0xcf5   :  { %v1299_v61 = vsel %vm1298_vm13, %v2852_v5, %v1295_v25 }
 0xcf6   :  { %v1513_v40 = vpop.f32.mrf.mxu3  ;;  %v1304_v12 = vsel %vm1301_vm0, %v1303_v46, %v1299_v61 }
 0xcf7   :  { %v1514_v52 = vadd.f32 %v3882_v1, %v1513_v40  ;;  %v1306_v60 = vsel %vm3198_vm8, %v2854_v38, %v1304_v12 }
 0xcf8   :  { %1309 = vrot.lane.b32.xlu0 %v1306_v60, %s3035_s0  ;;  %v1307_v7 = vmul.f32 %v1306_v60, %v3902_v8 }
 0xcf9   :  { %v2597_v14 = vmul.f32 -1.442695, %v1514_v52 }
 0xcfb   :  { %2855 = vpow2.f32 %v2597_v14 }
 0xd01   :  { %v2856_v35 = vpop.eup %2855 }
 0xd02   :  { %v1520_v33 = vadd.f32 1.0, %v2856_v35 }
 0xd04   :  { %2857 = vrcp.f32 %v1520_v33  ;;  %v1532_v9 = vand.u32 2147483648, %v1520_v33  ;;  %v1530_v2 = vand.u32 2147483647, %v1520_v33  ;;  %vm1526_vm5 = vweird.f32 %v1520_v33 }
 0xd05   :  { %2859 = vtanh.f32 %v1514_v52 }
 0xd06   :  { %v1533_v30 = vor.u32 1.1754944e-38, %v1532_v9  ;;  %vm1531_vm11 = vcmp.eq.f32.partialorder %v1530_v2, 8.507059e+37 }
 0xd0a   :  { %v2858_v21 = vpop.eup %2857 }
 0xd0b   :  { %v1522_v0 = vmul.f32 %v2858_v21, %v1520_v33  ;;  %vm1527_vm9 = vweird.f32 %v2858_v21  ;;  %v2860_v51 = vpop.eup %2859 }
 0xd0c   :  { %vm1528_vm12 = vmor %vm1526_vm5, %vm1527_vm9  ;;  %vm4381_vm9 = vcmask 1041409  }
 0xd0d   :  { %v1523_v49 = vsub.f32 1.0, %v1522_v0  ;;  %v4042_v0 = vld [vmem:[%s4307_s4] ss:$0 sm:$0xff] }
 0xd0f   :  { %v1524_v22 = vmul.f32 %v2858_v21, %v1523_v49 }
 0xd11   :  { %v1525_v18 = vadd.f32 %v2858_v21, %v1524_v22 }
 0xd13   :  { %v1529_v24 = vsel %vm1528_vm12, %v2858_v21, %v1525_v18 }
 0xd14   :  { %v1534_v54 = vsel %vm1531_vm11, %v1533_v30, %v1529_v24 }
 0xd15   :  { %v1536_v20 = vsel %vm3198_vm8, %v2860_v51, %v1534_v54 }
 0xd16   :  { %1539 = vrot.lane.b32.xlu2 %v1536_v20, %s3035_s0  ;;  %v1537_v31 = vmul.f32 %v1536_v20, %v3907_v36 }
 0xd3c   :  { %v1771_v29 = vpop.permute.xlu1 %1770 }
 0xd3d   :  { %v1773_v41 = vmul.f32 %v1771_v29, %v3980_v57 }
 0xd3f   :  { %1775 = vrot.lane.b32.xlu1 %v1773_v41, %s3036_s27 }
 0xd6a   :  { %v1310_v3 = vpop.permute.xlu0 %1309 }
 0xd6b   :  { %v1312_v62 = vmul.f32 %v1310_v3, %v1306_v60 }
 0xd6d   :  { %1314 = vrot.lane.b32.xlu0 %v1312_v62, %s3036_s27 }
 0xd70   :  { %v1540_v58 = vpop.permute.xlu2 %1539 }
 0xd71   :  { %v1542_v53 = vmul.f32 %v1540_v58, %v1536_v20 }
 0xd73   :  { %1544 = vrot.lane.b32.xlu2 %v1542_v53, %s3036_s27 }
 0xdb1   :  { %v1776_v4 = vpop.permute.xlu1 %1775 }
 0xdb2   :  { %v3998_v6 = vadd.f32 %v1776_v4, %v1768_v44 }
 0xdb4   :  { %2861 = vtanh.f32 %v3998_v6 }
 0xdba   :  { %v2862_v13 = vpop.eup %2861 }
 0xdbb   :  { %1781 = vrot.lane.b32.xlu1 %v2862_v13, %s3035_s0 }
 0xdcd   :  { %v1545_v37 = vpop.permute.xlu2 %1544 }
 0xdce   :  { %v4003_v56 = vadd.f32 %v1545_v37, %v1537_v31 }
 0xdd0   :  { %2863 = vtanh.f32 %v4003_v56 }
 0xdd6   :  { %v2864_v59 = vpop.eup %2863 }
 0xdd7   :  { %1550 = vrot.lane.b32.xlu2 %v2864_v59, %s3035_s0 }
 0xddf   :  { %v1315_v63 = vpop.permute.xlu0 %1314 }
 0xde0   :  { %v4008_v34 = vadd.f32 %v1315_v63, %v1307_v7 }
 0xde2   :  { %2865 = vtanh.f32 %v4008_v34 }
 0xde8   :  { %v2866_v45 = vpop.eup %2865 }
 0xde9   :  { %1320 = vrot.lane.b32.xlu0 %v2866_v45, %s3035_s0 }
 0xe2d   :  { %v1782_v36 = vpop.permute.xlu1 %1781 }
 0xe2e   :  { %v1784_v15 = vmul.f32 %v1782_v36, %v3980_v57 }
 0xe30   :  { %1786 = vrot.lane.b32.xlu1 %v1784_v15, %s3036_s27 }
 0xe31   :  { %v1551_v55 = vpop.permute.xlu2 %1550 }
 0xe32   :  { %v1553_v26 = vmul.f32 %v1551_v55, %v1536_v20 }
 0xe34   :  { %1555 = vrot.lane.b32.xlu0 %v1553_v26, %s3036_s27  ;;  %1789 = vrot.lane.b32.xlu2 %v1553_v26, %s3035_s0 }
 0xe5b   :  { %v1321_v8 = vpop.permute.xlu0 %1320 }
 0xe5c   :  { %v1323_v19 = vmul.f32 %v1321_v8, %v1306_v60 }
 0xe5e   :  { %1559 = vrot.lane.b32.xlu1 %v1323_v19, %s3035_s0 }
 0xe8e   :  { %v1790_v47 = vpop.permute.xlu2 %1789 }
 0xea2   :  { %v1787_v17 = vpop.permute.xlu1 %1786 }
 0xea3   :  { %v1792_v48 = vsel %vm4376_vm7, %v1787_v17, %v1790_v47  ;;  %2609 = vmatmul.msk.f32.vlgmr.msra.gmra.mxu3 %vm4377_vm6, %v1787_v17 }
 0xea4   :  { %2605 = vmatmul.msk.f32.vlgmr.msrb.gmra.mxu0 %vm4378_vm14, %v1792_v48 }
 0xea6   :  { %v1556_v5 = vpop.permute.xlu0 %1555 }
 0xed0   :  { %v1560_v57 = vpop.permute.xlu1 %1559 }
 0xed1   :  { %v1562_v27 = vsel %vm4379_vm15, %v1556_v5, %v1560_v57 }
 0xed2   :  { %2598 = vmatmul.msk.f32.vlgmr.msrb.gmra.mxu1 %vm4380_vm2, %v1562_v27 }
 0xed3   :  { %2238 = vmatpush.msrb.mxu1 %v2998_v28 }
 0xed5   :  { %2239 = vmatpush.msrb.mxu1 %v2999_v42 }
 0xed7   :  { %2240 = vmatpush.msrb.mxu1 %v3000_v50 }
 0xed9   :  { %2241 = vmatpush.msrb.mxu1 %v3001_v10 }
 0xf21   :  { %v1813_v25 = vpop.f32.mrf.mxu0 }
 0xf22   :  { %v1814_v46 = vadd.f32 %v3882_v1, %v1813_v25 }
 0xf24   :  { %v2606_v61 = vmul.f32 -1.442695, %v1814_v46 }
 0xf26   :  { %2867 = vpow2.f32 %v2606_v61  ;;  %v1943_v38 = vpop.f32.mrf.mxu3 }
 0xf27   :  { %v1947_v40 = vrot.slane %v1943_v38, 2  ;;  %v1948_v12 = vrot.slane %v1943_v38, 3  ;;  %v1949_v52 = vrot.slane %v1943_v38, 4  ;;  %v1950_v60 = vrot.slane %v1943_v38, 5 }
 0xf29   :  { %v1955_v14 = vadd.f32 %v1947_v40, %v3131_v11  ;;  %v1956_v35 = vadd.f32 %v1948_v12, %v3139_v16  ;;  %v1957_v33 = vadd.f32 %v1949_v52, %v3144_v23  ;;  %v1958_v21 = vadd.f32 %v1950_v60, %v3150_v32 }
 0xf2b   :  { %v1959_v1 = vadd.f32 %v4042_v0, %v1955_v14  ;;  %v1960_v49 = vadd.f32 %v4042_v0, %v1956_v35  ;;  %v1961_v22 = vadd.f32 %v4042_v0, %v1957_v33  ;;  %v1962_v18 = vadd.f32 %v4042_v0, %v1958_v21 }
 0xf2c   :  { %v2868_v9 = vpop.eup %2867 }
 0xf2d   :  { %v1820_v2 = vadd.f32 1.0, %v2868_v9  ;;  %v2610_v30 = vmul.f32 -1.442695, %v1959_v1  ;;  %v2611_v24 = vmul.f32 -1.442695, %v1960_v49 }
 0xf2e   :  { %v2612_v51 = vmul.f32 -1.442695, %v1961_v22  ;;  %v2613_v54 = vmul.f32 -1.442695, %v1962_v18 }
 0xf2f   :  { %2869 = vrcp.f32 %v1820_v2  ;;  %v1830_v4 = vand.u32 2147483647, %v1820_v2  ;;  %v1832_v13 = vand.u32 2147483648, %v1820_v2  ;;  %vm1826_vm10 = vweird.f32 %v1820_v2 }
 0xf30   :  { %2871 = vtanh.f32 %v1959_v1 }
 0xf31   :  { %2873 = vtanh.f32 %v1960_v49  ;;  %vm1831_vm13 = vcmp.eq.f32.partialorder %v1830_v4, 8.507059e+37  ;;  %v1833_v36 = vor.u32 1.1754944e-38, %v1832_v13 }
 0xf32   :  { %2875 = vpow2.f32 %v2610_v30 }
 0xf33   :  { %2877 = vpow2.f32 %v2611_v24 }
 0xf34   :  { %2879 = vpow2.f32 %v2612_v51 }
 0xf35   :  { %v2870_v20 = vpop.eup %2869  ;;  %2881 = vpow2.f32 %v2613_v54 }
 0xf36   :  { %v2872_v29 = vpop.eup %2871  ;;  %v1822_v41 = vmul.f32 %v2870_v20, %v1820_v2  ;;  %2883 = vtanh.f32 %v1814_v46  ;;  %vm1827_vm3 = vweird.f32 %v2870_v20 }
 0xf37   :  { %v2874_v3 = vpop.eup %2873  ;;  %2885 = vtanh.f32 %v1961_v22  ;;  %vm1828_vm4 = vmor %vm1826_vm10, %vm1827_vm3  ;;  %v2047_v15 = vrot.slane %v2872_v29, 6 }
 0xf38   :  { %v2876_v62 = vpop.eup %2875  ;;  %v1823_v58 = vsub.f32 1.0, %v1822_v41  ;;  %v2048_v8 = vrot.slane %v2874_v3, 5 }
 0xf39   :  { %v2878_v53 = vpop.eup %2877  ;;  %v4048_v44 = vadd.f32 1.0, %v2876_v62 }
 0xf3a   :  { %v2880_v31 = vpop.eup %2879  ;;  %v4050_v37 = vadd.f32 1.0, %v2878_v53  ;;  %v1824_v59 = vmul.f32 %v2870_v20, %v1823_v58  ;;  %v2049_v25 = vsel %vm4381_vm9, %v2048_v8, %v2047_v15 }
 0xf3b   :  { %v2882_v7 = vpop.eup %2881  ;;  %v4052_v63 = vadd.f32 1.0, %v2880_v31  ;;  %2887 = vrcp.f32 %v4048_v44  ;;  %v1992_v48 = vand.u32 2147483647, %v4048_v44  ;;  %v1994_v5 = vand.u32 2147483648, %v4048_v44 }
 0xf3c   :  { %v4055_v45 = vadd.f32 1.0, %v2882_v7  ;;  %2889 = vrcp.f32 %v4050_v37  ;;  %v1825_v55 = vadd.f32 %v2870_v20, %v1824_v59  ;;  %v2884_v26 = vpop.eup %2883  ;;  %v2007_v27 = vand.u32 2147483647, %v4050_v37 }
 0xf3d   :  { %2891 = vrcp.f32 %v4052_v63  ;;  %v4060_v47 = vpop.eup %2885  ;;  %v2009_v42 = vand.u32 2147483648, %v4050_v37  ;;  %vm1988_vm0 = vweird.f32 %v4048_v44  ;;  %vm4076_vm5 = vcmp.eq.f32.partialorder %v1992_v48, 8.507059e+37 }
 0xf3e   :  { %2893 = vrcp.f32 %v4055_v45  ;;  %v1829_v19 = vsel %vm1828_vm4, %v2870_v20, %v1825_v55  ;;  %v2050_v46 = vrot.slane %v4060_v47, 4  ;;  %v1995_v40 = vor.u32 1.1754944e-38, %v1994_v5 }
 0xf3f   :  { %v1834_v17 = vsel %vm1831_vm13, %v1833_v36, %v1829_v19  ;;  %2895 = vtanh.f32 %v1962_v18  ;;  %vm2003_vm12 = vweird.f32 %v4050_v37  ;;  %vm4082_vm11 = vcmp.eq.f32.partialorder %v2007_v27, 8.507059e+37 }
 0xf40   :  { %v4066_v57 = vsel %vm3198_vm8, %v2884_v26, %v1834_v17  ;;  %vm2018_vm7 = vweird.f32 %v4052_v63  ;;  %v2010_v21 = vor.u32 1.1754944e-38, %v2009_v42  ;;  %v2022_v1 = vand.u32 2147483647, %v4052_v63 }
 0xf41   :  { %v2888_v28 = vpop.eup %2887  ;;  %1839 = vrot.lane.b32.xlu2 %v4066_v57, %s3035_s0  ;;  %v2024_v2 = vand.u32 2147483648, %v4052_v63  ;;  %vm2033_vm15 = vweird.f32 %v4055_v45  ;;  %v2039_v20 = vand.u32 2147483648, %v4055_v45  ;;  %v2037_v3 = vand.u32 2147483647, %v4055_v45 }
 0xf42   :  { %v2890_v50 = vpop.eup %2889  ;;  %v1984_v10 = vmul.f32 %v2888_v28, %v4048_v44  ;;  %vm1989_vm6 = vweird.f32 %v2888_v28  ;;  %vm2023_vm13 = vcmp.eq.f32.partialorder %v2022_v1, 8.507059e+37 }
 0xf43   :  { %v2892_v61 = vpop.eup %2891  ;;  %v1999_v12 = vmul.f32 %v2890_v50, %v4050_v37  ;;  %vm2004_vm14 = vweird.f32 %v2890_v50  ;;  %vm1990_vm3 = vmor %vm1988_vm0, %vm1989_vm6  ;;  %v2025_v53 = vor.u32 1.1754944e-38, %v2024_v2  ;;  %v2040_v55 = vor.u32 1.1754944e-38, %v2039_v20 }
 0xf44   :  { %v2894_v52 = vpop.eup %2893  ;;  %v1985_v60 = vsub.f32 1.0, %v1984_v10  ;;  %v2014_v35 = vmul.f32 %v2892_v61, %v4052_v63  ;;  %vm2019_vm2 = vweird.f32 %v2892_v61  ;;  %vm2005_vm4 = vmor %vm2003_vm12, %vm2004_vm14  ;;  %v2051_v63 = vsel %vm265_vm1, %v2050_v46, %v2049_v25 }
 0xf45   :  { %v2000_v33 = vsub.f32 1.0, %v1999_v12  ;;  %v2029_v49 = vmul.f32 %v2894_v52, %v4055_v45  ;;  %v2896_v18 = vpop.eup %2895  ;;  %vm2034_vm10 = vweird.f32 %v2894_v52  ;;  %vm2020_vm0 = vmor %vm2018_vm7, %vm2019_vm2  ;;  %vm4386_vm12 = vcmask 1041409  }
 0xf46   :  { %v1986_v9 = vmul.f32 %v2888_v28, %v1985_v60  ;;  %v2015_v22 = vsub.f32 1.0, %v2014_v35  ;;  %vm2035_vm9 = vmor %vm2033_vm15, %vm2034_vm10  ;;  %vm4390_vm10 = vcmask 523264  }
 0xf47   :  { %v2001_v30 = vmul.f32 %v2890_v50, %v2000_v33  ;;  %v2030_v24 = vsub.f32 1.0, %v2029_v49 }
 0xf48   :  { %v1987_v51 = vadd.f32 %v2888_v28, %v1986_v9  ;;  %v2016_v54 = vmul.f32 %v2892_v61, %v2015_v22 }
 0xf49   :  { %v2002_v29 = vadd.f32 %v2890_v50, %v2001_v30  ;;  %v2031_v41 = vmul.f32 %v2894_v52, %v2030_v24  ;;  %v1837_v30 = vmul.f32 %v4066_v57, %v4003_v56 }
 0xf4a   :  { %v1991_v62 = vsel %vm1990_vm3, %v2888_v28, %v1987_v51  ;;  %v2017_v58 = vadd.f32 %v2892_v61, %v2016_v54  ;;  %vm4389_vm3 = vcmask 261120  }
 0xf4b   :  { %v1996_v13 = vsel %vm4076_vm5, %v1995_v40, %v1991_v62  ;;  %v2006_v31 = vsel %vm2005_vm4, %v2890_v50, %v2002_v29  ;;  %v2032_v44 = vadd.f32 %v2894_v52, %v2031_v41  ;;  %vm2038_vm5 = vcmp.eq.f32.partialorder %v2037_v3, 8.507059e+37  ;;  %vm4391_vm4 = vmmov %vm4389_vm3 }
 0xf4c   :  { %v2011_v7 = vsel %vm4082_vm11, %v2010_v21, %v2006_v31  ;;  %v2021_v37 = vsel %vm2020_vm0, %v2892_v61, %v2017_v58  ;;  %v2059_v36 = vrot.slane %v1996_v13, 6  ;;  %vm4387_vm11 = vcmask 1043459   ;;  %vm4393_vm0 = vmmov %vm4390_vm10 }
 0xf4d   :  { %v2026_v26 = vsel %vm2023_vm13, %v2025_v53, %v2021_v37  ;;  %v2036_v15 = vsel %vm2035_vm9, %v2894_v52, %v2032_v44  ;;  %v2060_v8 = vrot.slane %v2011_v7, 5  ;;  %vm4388_vm7 = vmmov %vm4387_vm11 }
 0xf4e   :  { %v2041_v19 = vsel %vm2038_vm5, %v2040_v55, %v2036_v15  ;;  %v2062_v47 = vrot.slane %v2026_v26, 4  ;;  %vm4392_vm13 = vmmov %vm4389_vm3  ;;  %v4153_v15 = vld [vmem:[%s4307_s4 + $0x1] ss:$0 sm:$0xff] }
 0xf4f   :  { %v1583_v4 = vpop.f32.mrf.mxu1  ;;  %v2061_v48 = vsel %vm4386_vm12, %v2060_v8, %v2059_v36  ;;  %v2064_v5 = vrot.slane %v2041_v19, 3 }
 0xf50   :  { %v1584_v59 = vadd.f32 %v3876_v43, %v1583_v4  ;;  %v2052_v43 = vrot.slane %v2896_v18, 3  ;;  %v2063_v27 = vsel %vm265_vm1, %v2062_v47, %v2061_v48 }
 0xf51   :  { %v2065_v28 = vsel %vm4388_vm7, %v2064_v5, %v2063_v27 }
 0xf52   :  { %v2599_v17 = vmul.f32 -1.442695, %v1584_v59  ;;  %v2053_v45 = vsel %vm4387_vm11, %v2052_v43, %v2051_v63 }
 0xf53   :  { %v2067_v42 = vsel %vm3198_vm8, %v2053_v45, %v2065_v28 }
 0xf54   :  { %2897 = vpow2.f32 %v2599_v17  ;;  %2070 = vrot.lane.b32.xlu0 %v2067_v42, %s3035_s0  ;;  %v2068_v20 = vmul.f32 %v2067_v42, %v3998_v6 }
 0xf5a   :  { %v2898_v50 = vpop.eup %2897 }
 0xf5b   :  { %v1590_v10 = vadd.f32 1.0, %v2898_v50 }
 0xf5d   :  { %2899 = vrcp.f32 %v1590_v10  ;;  %v1602_v38 = vand.u32 2147483648, %v1590_v10  ;;  %v1600_v12 = vand.u32 2147483647, %v1590_v10  ;;  %vm1596_vm14 = vweird.f32 %v1590_v10 }
 0xf5e   :  { %2901 = vtanh.f32 %v1584_v59 }
 0xf5f   :  { %v1603_v60 = vor.u32 1.1754944e-38, %v1602_v38  ;;  %vm1601_vm2 = vcmp.eq.f32.partialorder %v1600_v12, 8.507059e+37 }
 0xf63   :  { %v2900_v25 = vpop.eup %2899 }
 0xf64   :  { %v1592_v46 = vmul.f32 %v2900_v25, %v1590_v10  ;;  %vm1597_vm6 = vweird.f32 %v2900_v25  ;;  %v2902_v35 = vpop.eup %2901 }
 0xf65   :  { %vm1598_vm15 = vmor %vm1596_vm14, %vm1597_vm6  ;;  %vm4394_vm6 = vcmask 1041409  }
 0xf66   :  { %v1593_v61 = vsub.f32 1.0, %v1592_v46 }
 0xf68   :  { %v1594_v40 = vmul.f32 %v2900_v25, %v1593_v61 }
 0xf6a   :  { %v1595_v52 = vadd.f32 %v2900_v25, %v1594_v40 }
 0xf6c   :  { %v1599_v14 = vsel %vm1598_vm15, %v2900_v25, %v1595_v52 }
 0xf6d   :  { %v1604_v33 = vsel %vm1601_vm2, %v1603_v60, %v1599_v14 }
 0xf6e   :  { %v1606_v21 = vsel %vm3198_vm8, %v2902_v35, %v1604_v33 }
 0xf6f   :  { %1609 = vrot.lane.b32.xlu1 %v1606_v21, %s3035_s0  ;;  %v1607_v56 = vmul.f32 %v1606_v21, %v4008_v34 }
 0xf9b   :  { %v1840_v1 = vpop.permute.xlu2 %1839 }
 0xf9c   :  { %v1842_v49 = vmul.f32 %v1840_v1, %v4066_v57 }
 0xf9e   :  { %1844 = vrot.lane.b32.xlu2 %v1842_v49, %s3036_s27 }
 0xfc6   :  { %v2071_v9 = vpop.permute.xlu0 %2070 }
 0xfc7   :  { %v2073_v22 = vmul.f32 %v2071_v9, %v2067_v42 }
 0xfc9   :  { %2075 = vrot.lane.b32.xlu0 %v2073_v22, %s3036_s27 }
 0xfe1   :  { %v1610_v2 = vpop.permute.xlu1 %1609 }
 0xfe2   :  { %v1612_v18 = vmul.f32 %v1610_v2, %v1606_v21 }
 0xfe4   :  { %1614 = vrot.lane.b32.xlu1 %v1612_v18, %s3036_s27 }
 0xff8   :  { %v1845_v24 = vpop.permute.xlu2 %1844 }
 0xff9   :  { %v4126_v51 = vadd.f32 %v1845_v24, %v1837_v30 }
 0xffb   :  { %2903 = vtanh.f32 %v4126_v51 }
0x1001   :  { %v2904_v54 = vpop.eup %2903 }
0x1002   :  { %1850 = vrot.lane.b32.xlu2 %v2904_v54, %s3035_s0 }
0x103b   :  { %v2076_v29 = vpop.permute.xlu0 %2075 }
0x103c   :  { %v4131_v41 = vadd.f32 %v2076_v29, %v2068_v20 }
0x103e   :  { %2905 = vtanh.f32 %v4131_v41 }
0x1044   :  { %v2906_v3 = vpop.eup %2905 }
0x1045   :  { %2081 = vrot.lane.b32.xlu0 %v2906_v3, %s3035_s0 }
0x1056   :  { %v1615_v62 = vpop.permute.xlu1 %1614 }
0x1057   :  { %v4136_v58 = vadd.f32 %v1615_v62, %v1607_v56 }
0x1059   :  { %2907 = vtanh.f32 %v4136_v58 }
0x105c   :  { %v1851_v4 = vpop.permute.xlu2 %1850 }
0x105d   :  { %v1853_v6 = vmul.f32 %v1851_v4, %v4066_v57 }
0x105f   :  { %v2908_v53 = vpop.eup %2907  ;;  %2089 = vrot.lane.b32.xlu0 %v1853_v6, %s3035_s0 }
0x1060   :  { %1620 = vrot.lane.b32.xlu1 %v2908_v53, %s3035_s0 }
0x1068   :  { %1855 = vrot.lane.b32.xlu1 %v1853_v6, %s3036_s27  ;;  %v4185_v6 = vld [vmem:[%s4307_s4 + $0x2] ss:$0 sm:$0xff] }
0x10b7   :  { %v2082_v13 = vpop.permute.xlu0 %2081 }
0x10b8   :  { %v2084_v31 = vmul.f32 %v2082_v13, %v2067_v42 }
0x10ba   :  { %2086 = vrot.lane.b32.xlu2 %v2084_v31, %s3036_s27 }
0x10d1   :  { %v2090_v59 = vpop.permute.xlu0 %2089 }
0x10d2   :  { %v1621_v34 = vpop.permute.xlu1 %1620 }
0x10d3   :  { %v1623_v44 = vmul.f32 %v1621_v34, %v1606_v21 }
0x10d5   :  { %1859 = vrot.lane.b32.xlu2 %v1623_v44, %s3035_s0 }
0x10da   :  { %v1856_v57 = vpop.permute.xlu1 %1855 }
0x1114   :  { %v2087_v7 = vpop.permute.xlu2 %2086 }
0x1115   :  { %v2092_v37 = vsel %vm4389_vm3, %v2087_v7, %v2090_v59 }
0x1116   :  { %2614 = vmatmul.msk.f32.vlgmr.msra.gmra.mxu1 %vm4390_vm10, %v2092_v37 }
0x111e   :  { %2618 = vmatmul.msk.f32.vlgmr.msrb.gmra.mxu1 %vm4391_vm4, %v2087_v7 }
0x112f   :  { %v1860_v55 = vpop.permute.xlu2 %1859 }
0x1130   :  { %v1862_v36 = vsel %vm4392_vm13, %v1856_v57, %v1860_v55 }
0x1131   :  { %2607 = vmatmul.msk.f32.vlgmr.msra.gmra.mxu2 %vm4393_vm0, %v1862_v36 }
0x1193   :  { %v2113_v26 = vpop.f32.mrf.mxu1 }
0x1194   :  { %v2114_v8 = vadd.f32 %v4153_v15, %v2113_v26 }
0x1196   :  { %v2615_v19 = vmul.f32 -1.442695, %v2114_v8 }
0x1198   :  { %2909 = vpow2.f32 %v2615_v19 }
0x119b   :  { %v2243_v63 = vpop.f32.mrf.mxu1 }
0x119c   :  { %v2247_v47 = vrot.slane %v2243_v63, 1  ;;  %v2248_v17 = vrot.slane %v2243_v63, 2  ;;  %v2249_v43 = vrot.slane %v2243_v63, 3  ;;  %v2250_v48 = vrot.slane %v2243_v63, 4 }
0x119e   :  { %v2910_v5 = vpop.eup %2909  ;;  %v2255_v27 = vadd.f32 %v2247_v47, %v3131_v11  ;;  %v2256_v45 = vadd.f32 %v2248_v17, %v3139_v16  ;;  %v2257_v28 = vadd.f32 %v2249_v43, %v3144_v23  ;;  %v2258_v42 = vadd.f32 %v2250_v48, %v3150_v32 }
0x119f   :  { %v2120_v50 = vadd.f32 1.0, %v2910_v5 }
0x11a0   :  { %v2259_v10 = vadd.f32 %v4042_v0, %v2255_v27  ;;  %v2260_v25 = vadd.f32 %v4042_v0, %v2256_v45  ;;  %v2261_v46 = vadd.f32 %v4042_v0, %v2257_v28  ;;  %v2262_v61 = vadd.f32 %v4042_v0, %v2258_v42 }
0x11a1   :  { %2911 = vrcp.f32 %v2120_v50  ;;  %v2132_v14 = vand.u32 2147483648, %v2120_v50  ;;  %v2130_v33 = vand.u32 2147483647, %v2120_v50  ;;  %vm2126_vm5 = vweird.f32 %v2120_v50 }
0x11a2   :  { %v2619_v38 = vmul.f32 -1.442695, %v2259_v10  ;;  %v2620_v40 = vmul.f32 -1.442695, %v2260_v25  ;;  %2913 = vtanh.f32 %v2259_v10  ;;  %v2621_v11 = vmul.f32 -1.442695, %v2261_v46 }
0x11a3   :  { %2915 = vtanh.f32 %v2260_v25  ;;  %v2622_v16 = vmul.f32 -1.442695, %v2262_v61  ;;  %v2133_v30 = vor.u32 1.1754944e-38, %v2132_v14  ;;  %vm2131_vm11 = vcmp.eq.f32.partialorder %v2130_v33, 8.507059e+37 }
0x11a4   :  { %2917 = vpow2.f32 %v2619_v38 }
0x11a5   :  { %2919 = vpow2.f32 %v2620_v40 }
0x11a6   :  { %2921 = vpow2.f32 %v2621_v11 }
0x11a7   :  { %v2912_v23 = vpop.eup %2911  ;;  %2923 = vpow2.f32 %v2622_v16 }
0x11a8   :  { %v2122_v32 = vmul.f32 %v2912_v23, %v2120_v50  ;;  %v2914_v12 = vpop.eup %2913  ;;  %2925 = vtanh.f32 %v2114_v8  ;;  %vm2127_vm9 = vweird.f32 %v2912_v23 }
0x11a9   :  { %v2916_v60 = vpop.eup %2915  ;;  %2927 = vtanh.f32 %v2261_v46  ;;  %vm2128_vm12 = vmor %vm2126_vm5, %vm2127_vm9  ;;  %v2347_v29 = vrot.slane %v2914_v12, 7 }
0x11aa   :  { %v2123_v52 = vsub.f32 1.0, %v2122_v32  ;;  %v2918_v35 = vpop.eup %2917  ;;  %v2348_v3 = vrot.slane %v2916_v60, 6 }
0x11ab   :  { %v2920_v21 = vpop.eup %2919  ;;  %v4164_v1 = vadd.f32 1.0, %v2918_v35 }
0x11ac   :  { %v2124_v0 = vmul.f32 %v2912_v23, %v2123_v52  ;;  %v2922_v49 = vpop.eup %2921  ;;  %v4166_v9 = vadd.f32 1.0, %v2920_v21  ;;  %v2349_v57 = vsel %vm4394_vm6, %v2348_v3, %v2347_v29 }
0x11ad   :  { %v2924_v2 = vpop.eup %2923  ;;  %v4168_v18 = vadd.f32 1.0, %v2922_v49  ;;  %2929 = vrcp.f32 %v4164_v1  ;;  %v2292_v31 = vand.u32 2147483647, %v4164_v1  ;;  %v2294_v34 = vand.u32 2147483648, %v4164_v1 }
0x11ae   :  { %v2125_v22 = vadd.f32 %v2912_v23, %v2124_v0  ;;  %v4171_v24 = vadd.f32 1.0, %v2924_v2  ;;  %2931 = vrcp.f32 %v4166_v9  ;;  %v2926_v20 = vpop.eup %2925  ;;  %vm2288_vm7 = vweird.f32 %v4164_v1 }
0x11af   :  { %2933 = vrcp.f32 %v4168_v18  ;;  %v4175_v53 = vpop.eup %2927  ;;  %v2307_v37 = vand.u32 2147483647, %v4166_v9  ;;  %vm4200_vm14 = vcmp.eq.f32.partialorder %v2292_v31, 8.507059e+37  ;;  %v2309_v8 = vand.u32 2147483648, %v4166_v9 }
0x11b0   :  { %v2129_v54 = vsel %vm2128_vm12, %v2912_v23, %v2125_v22  ;;  %2935 = vrcp.f32 %v4171_v24  ;;  %v2350_v7 = vrot.slane %v4175_v53, 5  ;;  %v2295_v47 = vor.u32 1.1754944e-38, %v2294_v34 }
0x11b1   :  { %v2134_v56 = vsel %vm2131_vm11, %v2133_v30, %v2129_v54  ;;  %2937 = vtanh.f32 %v2262_v61  ;;  %vm2303_vm15 = vweird.f32 %v4166_v9  ;;  %vm2318_vm2 = vweird.f32 %v4168_v18 }
0x11b2   :  { %v4180_v4 = vsel %vm3198_vm8, %v2926_v20, %v2134_v56  ;;  %v2322_v5 = vand.u32 2147483647, %v4168_v18  ;;  %v2324_v27 = vand.u32 2147483648, %v4168_v18  ;;  %vm4211_vm3 = vcmp.eq.f32.partialorder %v2307_v37, 8.507059e+37 }
0x11b3   :  { %2139 = vrot.lane.b32.xlu1 %v4180_v4, %s3035_s0  ;;  %v2930_v59 = vpop.eup %2929  ;;  %vm2333_vm10 = vweird.f32 %v4171_v24  ;;  %v2310_v25 = vor.u32 1.1754944e-38, %v2309_v8  ;;  %v2337_v40 = vand.u32 2147483647, %v4171_v24  ;;  %v2339_v32 = vand.u32 2147483648, %v4171_v24 }
0x11b4   :  { %v1883_v62 = vpop.f32.mrf.mxu2  ;;  %v2932_v55 = vpop.eup %2931  ;;  %v2284_v36 = vmul.f32 %v2930_v59, %v4164_v1  ;;  %vm2289_vm4 = vweird.f32 %v2930_v59  ;;  %vm2323_vm11 = vcmp.eq.f32.partialorder %v2322_v5, 8.507059e+37  ;;  %v2325_v0 = vor.u32 1.1754944e-38, %v2324_v27 }
0x11b5   :  { %v4188_v13 = vadd.f32 %v4185_v6, %v1883_v62  ;;  %v2934_v19 = vpop.eup %2933  ;;  %v2299_v63 = vmul.f32 %v2932_v55, %v4166_v9  ;;  %vm2304_vm13 = vweird.f32 %v2932_v55  ;;  %vm2290_vm9 = vmor %vm2288_vm7, %vm2289_vm4  ;;  %v2340_v9 = vor.u32 1.1754944e-38, %v2339_v32 }
0x11b6   :  { %v2936_v17 = vpop.eup %2935  ;;  %v2285_v43 = vsub.f32 1.0, %v2284_v36  ;;  %v2314_v48 = vmul.f32 %v2934_v19, %v4168_v18  ;;  %vm2319_vm0 = vweird.f32 %v2934_v19  ;;  %vm2305_vm12 = vmor %vm2303_vm15, %vm2304_vm13  ;;  %vm2338_vm15 = vcmp.eq.f32.partialorder %v2337_v40, 8.507059e+37 }
0x11b7   :  { %v2608_v44 = vmul.f32 -1.442695, %v4188_v13  ;;  %v2300_v45 = vsub.f32 1.0, %v2299_v63  ;;  %v2329_v42 = vmul.f32 %v2936_v17, %v4171_v24  ;;  %v2938_v50 = vpop.eup %2937  ;;  %vm2334_vm5 = vweird.f32 %v2936_v17  ;;  %vm2320_vm6 = vmor %vm2318_vm2, %vm2319_vm0 }
0x11b8   :  { %v2286_v10 = vmul.f32 %v2930_v59, %v2285_v43  ;;  %v2315_v46 = vsub.f32 1.0, %v2314_v48  ;;  %vm2335_vm7 = vmor %vm2333_vm10, %vm2334_vm5  ;;  %v2351_v18 = vsel %vm265_vm1, %v2350_v7, %v2349_v57  ;;  %v2352_v56 = vrot.slane %v2938_v50, 4 }
0x11b9   :  { %2939 = vpow2.f32 %v2608_v44  ;;  %v2301_v61 = vmul.f32 %v2932_v55, %v2300_v45  ;;  %v2330_v38 = vsub.f32 1.0, %v2329_v42  ;;  %vm4400_vm2 = vcmask 1043459  }
0x11ba   :  { %v2287_v16 = vadd.f32 %v2930_v59, %v2286_v10  ;;  %v2316_v23 = vmul.f32 %v2934_v19, %v2315_v46  ;;  %v2353_v44 = vsel %vm4400_vm2, %v2352_v56, %v2351_v18  ;;  %vm4402_vm0 = vcmask 261120  }
0x11bb   :  { %v2302_v52 = vadd.f32 %v2932_v55, %v2301_v61  ;;  %v2331_v60 = vmul.f32 %v2936_v17, %v2330_v38  ;;  %vm4404_vm5 = vmmov %vm4402_vm0 }
0x11bc   :  { %v2291_v14 = vsel %vm2290_vm9, %v2930_v59, %v2287_v16  ;;  %v2317_v35 = vadd.f32 %v2934_v19, %v2316_v23  ;;  %vm4403_vm9 = vcmask 523264  }
0x11bd   :  { %v2296_v33 = vsel %vm4200_vm14, %v2295_v47, %v2291_v14  ;;  %v2306_v21 = vsel %vm2305_vm12, %v2932_v55, %v2302_v52  ;;  %v2332_v1 = vadd.f32 %v2936_v17, %v2331_v60  ;;  %vm4399_vm14 = vcmask 1041409   ;;  %vm4405_vm12 = vmmov %vm4403_vm9 }
0x11be   :  { %v2311_v49 = vsel %vm4211_vm3, %v2310_v25, %v2306_v21  ;;  %v2321_v22 = vsel %vm2320_vm6, %v2934_v19, %v2317_v35  ;;  %v2359_v2 = vrot.slane %v2296_v33, 7  ;;  %vm4401_vm3 = vmmov %vm4400_vm2  ;;  %v2137_v25 = vmul.f32 %v4180_v4, %v4126_v51 }
0x11bf   :  { %v2940_v11 = vpop.eup %2939  ;;  %v2326_v30 = vsel %vm2323_vm11, %v2325_v0, %v2321_v22  ;;  %v2336_v54 = vsel %vm2335_vm7, %v2936_v17, %v2332_v1  ;;  %v2360_v20 = vrot.slane %v2311_v49, 6 }
0x11c0   :  { %v1890_v12 = vadd.f32 1.0, %v2940_v11  ;;  %v2341_v29 = vsel %vm2338_vm15, %v2340_v9, %v2336_v54  ;;  %v2362_v3 = vrot.slane %v2326_v30, 5 }
0x11c1   :  { %v2361_v62 = vsel %vm4399_vm14, %v2360_v20, %v2359_v2  ;;  %v2364_v31 = vrot.slane %v2341_v29, 4 }
0x11c2   :  { %2941 = vrcp.f32 %v1890_v12  ;;  %v2363_v34 = vsel %vm265_vm1, %v2362_v3, %v2361_v62  ;;  %v1902_v7 = vand.u32 2147483648, %v1890_v12  ;;  %v1900_v36 = vand.u32 2147483647, %v1890_v12 }
0x11c3   :  { %v2365_v59 = vsel %vm4401_vm3, %v2364_v31, %v2363_v34  ;;  %2943 = vtanh.f32 %v4188_v13  ;;  %vm1896_vm1 = vweird.f32 %v1890_v12 }
0x11c4   :  { %v2367_v37 = vsel %vm3198_vm8, %v2353_v44, %v2365_v59  ;;  %v1903_v8 = vor.u32 1.1754944e-38, %v1902_v7  ;;  %vm1901_vm13 = vcmp.eq.f32.partialorder %v1900_v36, 8.507059e+37 }
0x11c5   :  { %2370 = vrot.lane.b32.xlu2 %v2367_v37, %s3035_s0  ;;  %v2368_v28 = vmul.f32 %v2367_v37, %v4131_v41 }
0x11c8   :  { %v2942_v24 = vpop.eup %2941 }
0x11c9   :  { %v1892_v55 = vmul.f32 %v2942_v24, %v1890_v12  ;;  %vm1897_vm10 = vweird.f32 %v2942_v24  ;;  %v2944_v63 = vpop.eup %2943 }
0x11ca   :  { %vm1898_vm4 = vmor %vm1896_vm1, %vm1897_vm10 }
0x11cb   :  { %v1893_v53 = vsub.f32 1.0, %v1892_v55  ;;  %vm4406_vm1 = vmmov %vm4402_vm0 }
0x11cd   :  { %v1894_v57 = vmul.f32 %v2942_v24, %v1893_v53 }
0x11cf   :  { %v1895_v26 = vadd.f32 %v2942_v24, %v1894_v57 }
0x11d1   :  { %v1899_v19 = vsel %vm1898_vm4, %v2942_v24, %v1895_v26  ;;  %vm4407_vm4 = vmmov %vm4403_vm9 }
0x11d2   :  { %v1904_v47 = vsel %vm1901_vm13, %v1903_v8, %v1899_v19 }
0x11d3   :  { %v1906_v17 = vsel %vm3198_vm8, %v2944_v63, %v1904_v47 }
0x11d4   :  { %1909 = vrot.lane.b32.xlu0 %v1906_v17, %s3035_s0  ;;  %v1907_v40 = vmul.f32 %v1906_v17, %v4136_v58 }
0x121f   :  { %v2371_v43 = vpop.permute.xlu2 %2370 }
0x1220   :  { %v2373_v48 = vmul.f32 %v2371_v43, %v2367_v37 }
0x1222   :  { %2375 = vrot.lane.b32.xlu2 %v2373_v48, %s3036_s27 }
0x1225   :  { %v2140_v13 = vpop.permute.xlu1 %2139 }
0x1226   :  { %v2142_v5 = vmul.f32 %v2140_v13, %v4180_v4 }
0x1228   :  { %2144 = vrot.lane.b32.xlu1 %v2142_v5, %s3036_s27 }
0x1246   :  { %v1910_v27 = vpop.permute.xlu0 %1909 }
0x1247   :  { %v1912_v45 = vmul.f32 %v1910_v27, %v1906_v17 }
0x1249   :  { %1914 = vrot.lane.b32.xlu0 %v1912_v45, %s3036_s27 }
0x127c   :  { %v2376_v42 = vpop.permute.xlu2 %2375 }
0x127d   :  { %v2378_v50 = vadd.f32 %v2376_v42, %v2368_v28 }
0x127f   :  { %2945 = vtanh.f32 %v2378_v50 }
0x1285   :  { %v2946_v10 = vpop.eup %2945 }
0x1286   :  { %2381 = vrot.lane.b32.xlu2 %v2946_v10, %s3035_s0 }
0x129a   :  { %v2145_v46 = vpop.permute.xlu1 %2144 }
0x129b   :  { %v4254_v61 = vadd.f32 %v2145_v46, %v2137_v25 }
0x129d   :  { %2947 = vtanh.f32 %v4254_v61 }
0x12a3   :  { %v2948_v38 = vpop.eup %2947 }
0x12a4   :  { %2150 = vrot.lane.b32.xlu1 %v2948_v38, %s3035_s0 }
0x12bb   :  { %v1915_v41 = vpop.permute.xlu0 %1914 }
0x12bc   :  { %v4259_v11 = vadd.f32 %v1915_v41, %v1907_v40 }
0x12be   :  { %2949 = vtanh.f32 %v4259_v11 }
0x12c4   :  { %v2950_v16 = vpop.eup %2949 }
0x12c5   :  { %1920 = vrot.lane.b32.xlu0 %v2950_v16, %s3035_s0 }
0x12e0   :  { %v2382_v23 = vpop.permute.xlu2 %2381 }
0x12e1   :  { %v2384_v51 = vmul.f32 %v2382_v23, %v2367_v37 }
0x12e3   :  { %2386 = vrot.lane.b32.xlu2 %v2384_v51, %s3036_s27 }
0x1316   :  { %v2151_v32 = vpop.permute.xlu1 %2150 }
0x1317   :  { %v2153_v12 = vmul.f32 %v2151_v32, %v4180_v4 }
0x1319   :  { %2155 = vrot.lane.b32.xlu0 %v2153_v12, %s3036_s27 }
0x1321   :  { %2389 = vrot.lane.b32.xlu0 %v2153_v12, %s3035_s0 }
0x1337   :  { %v1921_v58 = vpop.permute.xlu0 %1920 }
0x1338   :  { %v1923_v52 = vmul.f32 %v1921_v58, %v1906_v17 }
0x133a   :  { %2159 = vrot.lane.b32.xlu1 %v1923_v52, %s3035_s0 }
0x133d   :  { %v2387_v14 = vpop.permute.xlu2 %2386 }
0x138b   :  { %v2156_v60 = vpop.permute.xlu0 %2155 }
0x1393   :  { %v2390_v35 = vpop.permute.xlu0 %2389 }
0x1394   :  { %v2392_v0 = vsel %vm4402_vm0, %v2387_v14, %v2390_v35 }
0x1395   :  { %2623 = vmatmul.msk.f32.vlgmr.msrb.gmra.mxu2 %vm4403_vm9, %v2392_v0 }
0x13ac   :  { %v2160_v33 = vpop.permute.xlu1 %2159 }
0x13ad   :  { %v2162_v21 = vsel %vm4404_vm5, %v2156_v60, %v2160_v33 }
0x13ae   :  { %2616 = vmatmul.msk.f32.vlgmr.msrb.gmra.mxu3 %vm4405_vm12, %v2162_v21  ;;  %vm2542_vm12 = vcmask 3072  }
0x1418   :  { %v2413_v4 = vpop.f32.mrf.mxu2 }
0x1419   :  { %v2414_v1 = vadd.f32 %v4153_v15, %v2413_v4 }
0x141b   :  { %v2624_v49 = vmul.f32 -1.442695, %v2414_v1 }
0x141d   :  { %2951 = vpow2.f32 %v2624_v49 }
0x1423   :  { %v2952_v22 = vpop.eup %2951 }
0x1424   :  { %v2420_v9 = vadd.f32 1.0, %v2952_v22 }
0x1426   :  { %2953 = vrcp.f32 %v2420_v9  ;;  %v2432_v18 = vand.u32 2147483648, %v2420_v9  ;;  %v2430_v62 = vand.u32 2147483647, %v2420_v9  ;;  %vm2426_vm6 = vweird.f32 %v2420_v9 }
0x1427   :  { %2955 = vtanh.f32 %v2414_v1 }
0x1428   :  { %v2433_v15 = vor.u32 1.1754944e-38, %v2432_v18  ;;  %vm2431_vm15 = vcmp.eq.f32.partialorder %v2430_v62, 8.507059e+37 }
0x142c   :  { %v2954_v2 = vpop.eup %2953 }
0x142d   :  { %v2422_v30 = vmul.f32 %v2954_v2, %v2420_v9  ;;  %vm2427_vm11 = vweird.f32 %v2954_v2  ;;  %v2956_v24 = vpop.eup %2955 }
0x142e   :  { %vm2428_vm7 = vmor %vm2426_vm6, %vm2427_vm11 }
0x142f   :  { %v2423_v29 = vsub.f32 1.0, %v2422_v30 }
0x1431   :  { %v2183_v54 = vpop.f32.mrf.mxu3  ;;  %v2424_v56 = vmul.f32 %v2954_v2, %v2423_v29 }
0x1432   :  { %v2184_v20 = vadd.f32 %v4185_v6, %v2183_v54  ;;  %v2637_v54 = vld [vmem:[%s4308_s5] ss:$0 sm:$0xff] }
0x1433   :  { %v2425_v31 = vadd.f32 %v2954_v2, %v2424_v56 }
0x1434   :  { %v2617_v3 = vmul.f32 -1.442695, %v2184_v20 }
0x1435   :  { %v2429_v34 = vsel %vm2428_vm7, %v2954_v2, %v2425_v31 }
0x1436   :  { %2957 = vpow2.f32 %v2617_v3  ;;  %v2434_v44 = vsel %vm2431_vm15, %v2433_v15, %v2429_v34 }
0x1437   :  { %v2436_v59 = vsel %vm3198_vm8, %v2956_v24, %v2434_v44 }
0x1438   :  { %2439 = vrot.lane.b32.xlu2 %v2436_v59, %s3035_s0  ;;  %v2437_v28 = vmul.f32 %v2436_v59, %v4254_v61 }
0x143c   :  { %v2958_v37 = vpop.eup %2957 }
0x143d   :  { %v2190_v55 = vadd.f32 1.0, %v2958_v37 }
0x143f   :  { %2959 = vrcp.f32 %v2190_v55  ;;  %v2202_v36 = vand.u32 2147483648, %v2190_v55  ;;  %v2200_v8 = vand.u32 2147483647, %v2190_v55  ;;  %vm2196_vm2 = vweird.f32 %v2190_v55 }
0x1440   :  { %2961 = vtanh.f32 %v2184_v20 }
0x1441   :  { %v2203_v63 = vor.u32 1.1754944e-38, %v2202_v36  ;;  %vm2201_vm10 = vcmp.eq.f32.partialorder %v2200_v8, 8.507059e+37 }
0x1445   :  { %v2960_v53 = vpop.eup %2959 }
0x1446   :  { %v2192_v7 = vmul.f32 %v2960_v53, %v2190_v55  ;;  %vm2197_vm14 = vweird.f32 %v2960_v53  ;;  %v2962_v17 = vpop.eup %2961 }
0x1447   :  { %vm2198_vm3 = vmor %vm2196_vm2, %vm2197_vm14 }
0x1448   :  { %v2193_v57 = vsub.f32 1.0, %v2192_v7 }
0x144a   :  { %v2194_v26 = vmul.f32 %v2960_v53, %v2193_v57 }
0x144c   :  { %v2195_v19 = vadd.f32 %v2960_v53, %v2194_v26 }
0x144e   :  { %v2199_v47 = vsel %vm2198_vm3, %v2960_v53, %v2195_v19 }
0x144f   :  { %v2204_v43 = vsel %vm2201_vm10, %v2203_v63, %v2199_v47 }
0x1450   :  { %v2206_v48 = vsel %vm3198_vm8, %v2962_v17, %v2204_v43 }
0x1451   :  { %2209 = vrot.lane.b32.xlu1 %v2206_v48, %s3035_s0  ;;  %v2207_v25 = vmul.f32 %v2206_v48, %v4259_v11 }
0x1492   :  { %v2440_v13 = vpop.permute.xlu2 %2439 }
0x1493   :  { %v2442_v5 = vmul.f32 %v2440_v13, %v2436_v59 }
0x1495   :  { %2444 = vrot.lane.b32.xlu1 %v2442_v5, %s3036_s27 }
0x14c3   :  { %v2210_v27 = vpop.permute.xlu1 %2209 }
0x14c4   :  { %v2212_v45 = vmul.f32 %v2210_v27, %v2206_v48 }
0x14c6   :  { %2214 = vrot.lane.b32.xlu0 %v2212_v45, %s3036_s27 }
0x1507   :  { %v2445_v42 = vpop.permute.xlu1 %2444 }
0x1508   :  { %v2447_v50 = vadd.f32 %v2445_v42, %v2437_v28 }
0x150a   :  { %2963 = vtanh.f32 %v2447_v50 }
0x1510   :  { %v2964_v10 = vpop.eup %2963 }
0x1511   :  { %2450 = vrot.lane.b32.xlu0 %v2964_v10, %s3035_s0 }
0x1538   :  { %v2215_v46 = vpop.permute.xlu0 %2214 }
0x1539   :  { %v2217_v38 = vadd.f32 %v2215_v46, %v2207_v25 }
0x153b   :  { %2965 = vtanh.f32 %v2217_v38 }
0x1541   :  { %v2966_v40 = vpop.eup %2965 }
0x1542   :  { %2220 = vrot.lane.b32.xlu2 %v2966_v40, %s3035_s0 }
0x1583   :  { %v2451_v41 = vpop.permute.xlu0 %2450 }
0x1584   :  { %v2453_v16 = vmul.f32 %v2451_v41, %v2436_v59  ;;  %v2638_v59 = vld [vmem:[#allocation2] ss:$0 sm:$0xff] }
0x1586   :  { %2455 = vrot.lane.b32.xlu1 %v2453_v16, %s3036_s27 }
0x159c   :  { %v2221_v23 = vpop.permute.xlu2 %2220 }
0x159d   :  { %v2223_v61 = vmul.f32 %v2221_v23, %v2206_v48 }
0x159f   :  { %2459 = vrot.lane.b32.xlu2 %v2223_v61, %s3035_s0 }
0x15f8   :  { %v2456_v32 = vpop.permute.xlu1 %2455 }
0x15f9   :  { %v2460_v51 = vpop.permute.xlu2 %2459 }
0x15fa   :  { %v2462_v12 = vsel %vm4406_vm1, %v2456_v32, %v2460_v51 }
0x15fb   :  { %2625 = vmatmul.msk.f32.vlgmr.msra.gmra.mxu0 %vm4407_vm4, %v2462_v12 }
0x1678   :  { %v2483_v11 = vpop.f32.mrf.mxu0 }
0x1679   :  { %v2484_v58 = vadd.f32 %v4185_v6, %v2483_v11 }
0x167b   :  { %v2626_v52 = vmul.f32 -1.442695, %v2484_v58 }
0x167d   :  { %2967 = vpow2.f32 %v2626_v52 }
0x1683   :  { %v2968_v60 = vpop.eup %2967 }
0x1684   :  { %v2490_v14 = vadd.f32 1.0, %v2968_v60 }
0x1686   :  { %2969 = vrcp.f32 %v2490_v14  ;;  %v2502_v21 = vand.u32 2147483648, %v2490_v14  ;;  %v2500_v1 = vand.u32 2147483647, %v2490_v14  ;;  %vm2496_vm0 = vweird.f32 %v2490_v14 }
0x1687   :  { %2971 = vtanh.f32 %v2484_v58 }
0x1688   :  { %v2503_v22 = vor.u32 1.1754944e-38, %v2502_v21  ;;  %vm2501_vm5 = vcmp.eq.f32.partialorder %v2500_v1, 8.507059e+37 }
0x168c   :  { %v2970_v35 = vpop.eup %2969 }
0x168d   :  { %v2492_v0 = vmul.f32 %v2970_v35, %v2490_v14  ;;  %vm2497_vm13 = vweird.f32 %v2970_v35  ;;  %v2972_v6 = vpop.eup %2971 }
0x168e   :  { %vm2498_vm9 = vmor %vm2496_vm0, %vm2497_vm13 }
0x168f   :  { %v2493_v33 = vsub.f32 1.0, %v2492_v0 }
0x1691   :  { %v2494_v4 = vmul.f32 %v2970_v35, %v2493_v33 }
0x1693   :  { %v2495_v49 = vadd.f32 %v2970_v35, %v2494_v4 }
0x1695   :  { %v2499_v9 = vsel %vm2498_vm9, %v2970_v35, %v2495_v49 }
0x1696   :  { %v2504_v2 = vsel %vm2501_vm5, %v2503_v22, %v2499_v9 }
0x1697   :  { %v2506_v30 = vsel %vm3198_vm8, %v2972_v6, %v2504_v2  ;;  %vm2534_vm8 = vcmask 257024  }
0x1698   :  { %2509 = vrot.lane.b32.xlu0 %v2506_v30, %s3035_s0  ;;  %v2507_v18 = vmul.f32 %v2506_v30, %v2217_v38 }
0x16a0   :  { %2526 = vrot.lane.b32.xlu0 %v2637_v54, %s3037_s6 }
0x170a   :  { %v2510_v20 = vpop.permute.xlu0 %2509 }
0x170b   :  { %v2512_v29 = vmul.f32 %v2510_v20, %v2506_v30 }
0x170d   :  { %2514 = vrot.lane.b32.xlu1 %v2512_v29, %s3036_s27 }
0x1712   :  { %v2527_v31 = vpop.permute.xlu0 %2526 }
0x177f   :  { %v2515_v3 = vpop.permute.xlu1 %2514 }
0x1780   :  { %v2517_v56 = vadd.f32 %v2515_v3, %v2507_v18 }
0x1782   :  { %2973 = vtanh.f32 %v2517_v56 }
0x1788   :  { %v2974_v62 = vpop.eup %2973 }
0x1789   :  { %2520 = vrot.lane.b32.xlu2 %v2974_v62, %s3035_s0 }
0x17e3   :  { %v2521_v39 = vpop.permute.xlu2 %2520 }
0x17e4   :  { %v2523_v15 = vmul.f32 %v2521_v39, %v2506_v30 }
0x17e6   :  { %v2529_v34 = vmul.f32 %v2527_v31, %v2523_v15 }
0x17e8   :  { %2531 = vrot.lane.b32.xlu1 %v2529_v34, %s3036_s27 }
0x185a   :  { %v2532_v24 = vpop.permute.xlu1 %2531 }
0x185b   :  { %v2535_v44 = vsel %vm2534_vm8, %v2532_v24, 0.0 }
0x185c   :  { %2536 = vadd.xlane.f32.xlu2 %v2535_v44 }
0x18cf   :  { %v2537_v37 = vpop.xlane.xlu2 %2536 }
0x18d0   :  { %v2541_v55 = vadd.f32 %v2638_v59, %v2537_v37 }
0x18d2   :  { %2543 = vst.msk [vmem:[%s4310_s7] sm:$0xf] %vm2542_vm12, %v2541_v55 }
0x18d3   :  { %2548 = vsyncpa [#allocation4], 1 }

</bundles_post_ra>
